<compile_context>
chip_gen: v7x
topology: tpu7x:2x2x1
jax: 0.10.0
libtpu: 0.0.40
codegen_flags: <defaults>
</compile_context>

<pallas_src>
from functools import partial

import jax
import jax.numpy as jnp
from jax.experimental import pallas as pl
from jax.experimental.pallas import tpu as pltpu


# ----------------------------------------------------------------------------
# small helpers
# ----------------------------------------------------------------------------
def _round_up(x, m):
    return -(-x // m) * m


def _choose_tile(n_rows, max_tile=512):
    if n_rows >= max_tile:
        return max_tile
    return max(8, _round_up(n_rows, 8))


def _pad_rows(x, n_pad):
    n = x.shape[0]
    if n_pad == n:
        return x
    return jnp.pad(x, ((0, n_pad - n), (0, 0)))


# ----------------------------------------------------------------------------
# Pallas kernels
# ----------------------------------------------------------------------------
def _mm_kernel(x_ref, w_ref, b_ref, *rest, relu, has_res):
    """out = x @ w + b [+ residual] [relu] on one (tile, C) block."""
    if has_res:
        r_ref, o_ref = rest
    else:
        (o_ref,) = rest
    acc = jnp.dot(x_ref[...], w_ref[...], preferred_element_type=jnp.float32)
    acc = acc + b_ref[...]
    if has_res:
        acc = acc + r_ref[...]
    if relu:
        acc = jnp.maximum(acc, 0.0)
    o_ref[...] = acc.astype(o_ref.dtype)


def pointwise_linear(x, w, b, residual=None, relu=False, max_tile=512):
    """y = x @ w + b [+ residual] [relu].  x: (N, Cin), w: (Cin, Cout)."""
    n, cin = x.shape
    cout = w.shape[1]
    tile = _choose_tile(n, max_tile)
    n_pad = _round_up(n, tile)
    xp = _pad_rows(x, n_pad)

    args = [xp, w, b.reshape(1, cout)]
    in_specs = [
        pl.BlockSpec((tile, cin), lambda i: (i, 0)),
        pl.BlockSpec((cin, cout), lambda i: (0, 0)),
        pl.BlockSpec((1, cout), lambda i: (0, 0)),
    ]
    if residual is not None:
        args.append(_pad_rows(residual, n_pad))
        in_specs.append(pl.BlockSpec((tile, cout), lambda i: (i, 0)))

    out = pl.pallas_call(
        partial(_mm_kernel, relu=relu, has_res=residual is not None),
        out_shape=jax.ShapeDtypeStruct((n_pad, cout), x.dtype),
        grid=(n_pad // tile,),
        in_specs=in_specs,
        out_specs=pl.BlockSpec((tile, cout), lambda i: (i, 0)),
        compiler_params=pltpu.CompilerParams(
            dimension_semantics=("parallel",)),
    )(*args)
    return out[:n] if n_pad != n else out


def _head_kernel(x_ref, w1_ref, b1_ref, w2_ref, b2_ref, o_ref, *, p, width):
    """Fused fc1 -> relu -> fc2 on a packed (tile, p*width) block."""
    x = x_ref[...]
    w1 = w1_ref[...]
    b1 = b1_ref[...]
    w2 = w2_ref[...]
    b2 = b2_ref[...]
    cols = []
    for j in range(p):                       # static, unrolled
        xj = x[:, j * width:(j + 1) * width]
        hj = jnp.dot(xj, w1, preferred_element_type=jnp.float32) + b1
        hj = jnp.maximum(hj, 0.0)            # (tile, 128) stays in VMEM/vregs
        cols.append(jnp.dot(hj, w2, preferred_element_type=jnp.float32) + b2)
    out = cols[0] if p == 1 else jnp.concatenate(cols, axis=1)
    o_ref[...] = out.astype(o_ref.dtype)


def head_fused(x, w1, b1, w2, b2, p, width, max_tile=512):
    """Fused fc1(relu)+fc2.  x: (Np, p*width) packed -> (Np, p)."""
    n = x.shape[0]
    hidden = w1.shape[1]
    tile = _choose_tile(n, max_tile)
    n_pad = _round_up(n, tile)
    xp = _pad_rows(x, n_pad)
    out = pl.pallas_call(
        partial(_head_kernel, p=p, width=width),
        out_shape=jax.ShapeDtypeStruct((n_pad, p), x.dtype),
        grid=(n_pad // tile,),
        in_specs=[
            pl.BlockSpec((tile, p * width), lambda i: (i, 0)),
            pl.BlockSpec((width, hidden), lambda i: (0, 0)),
            pl.BlockSpec((1, hidden), lambda i: (0, 0)),
            pl.BlockSpec((hidden, 1), lambda i: (0, 0)),
            pl.BlockSpec((1, 1), lambda i: (0, 0)),
        ],
        out_specs=pl.BlockSpec((tile, p), lambda i: (i, 0)),
        compiler_params=pltpu.CompilerParams(
            dimension_semantics=("parallel",)),
    )(xp, w1, b1.reshape(1, hidden), w2, b2.reshape(1, 1))
    return out[:n] if n_pad != n else out


def _spectral_kernel(xr_ref, xi_ref, wr_ref, wi_ref, ws_ref, or_ref, oi_ref,
                     *, n_modes):
    """Per-mode complex matmul with the 3-mult (Gauss) product, unrolled."""
    for m in range(n_modes):                 # static, unrolled
        xr = xr_ref[m]                       # (B, Cin)
        xi = xi_ref[m]
        t1 = jnp.dot(xr, wr_ref[m], preferred_element_type=jnp.float32)
        t2 = jnp.dot(xi, wi_ref[m], preferred_element_type=jnp.float32)
        t3 = jnp.dot(xr + xi, ws_ref[m], preferred_element_type=jnp.float32)
        or_ref[m] = t1 - t2
        oi_ref[m] = t3 - t1 - t2


def spectral_mul(xr, xi, wr, wi, ws, n_modes):
    """einsum('mbi,mio->mbo') complex product.  Grid = (2,) frequency blocks."""
    m_tot, b, cin = xr.shape
    cout = wr.shape[-1]
    n_blocks = m_tot // n_modes
    return pl.pallas_call(
        partial(_spectral_kernel, n_modes=n_modes),
        out_shape=(jax.ShapeDtypeStruct((m_tot, b, cout), jnp.float32),
                   jax.ShapeDtypeStruct((m_tot, b, cout), jnp.float32)),
        grid=(n_blocks,),
        in_specs=[
            pl.BlockSpec((n_modes, b, cin), lambda g: (g, 0, 0)),
            pl.BlockSpec((n_modes, b, cin), lambda g: (g, 0, 0)),
            pl.BlockSpec((n_modes, cin, cout), lambda g: (g, 0, 0)),
            pl.BlockSpec((n_modes, cin, cout), lambda g: (g, 0, 0)),
            pl.BlockSpec((n_modes, cin, cout), lambda g: (g, 0, 0)),
        ],
        out_specs=(pl.BlockSpec((n_modes, b, cout), lambda g: (g, 0, 0)),
                   pl.BlockSpec((n_modes, b, cout), lambda g: (g, 0, 0))),
        compiler_params=pltpu.CompilerParams(
            dimension_semantics=("parallel",)),
    )(xr, xi, wr, wi, ws)


# ----------------------------------------------------------------------------
# FNO2d forward
# ----------------------------------------------------------------------------
def spectral_conv2d(h_nhwc, wr, wi, ws, modes1, modes2):
    """SpectralConv2d.forward in NHWC: rfft2(axes=1,2) -> Pallas mix -> irfft2."""
    B, H, W, _ = h_nhwc.shape
    cout = wr.shape[-1]
    wf = W // 2 + 1
    x_ft = jnp.fft.rfft2(h_nhwc, axes=(1, 2))          # (B, H, Wf, Cin) c64
    lo = x_ft[:, :modes1, :modes2, :]
    hi = x_ft[:, H - modes1:, :modes2, :]
    xs = jnp.concatenate([lo, hi], axis=1)              # (B, 2*m1, m2, Cin)
    xs = jnp.transpose(xs, (1, 2, 0, 3)).reshape(2 * modes1 * modes2, B, -1)
    out_r, out_i = spectral_mul(jnp.real(xs), jnp.imag(xs), wr, wi, ws,
                                n_modes=modes1 * modes2)
    out = jax.lax.complex(out_r, out_i)                  # (2*m1*m2, B, Cout)
    out = out.reshape(2, modes1, modes2, B, cout)
    out = jnp.transpose(out, (0, 3, 1, 2, 4))            # (2, B, m1, m2, Cout)
    out_ft = jnp.zeros((B, H, wf, cout), dtype=jnp.complex64)
    out_ft = out_ft.at[:, :modes1, :modes2, :].set(out[0])
    out_ft = out_ft.at[:, H - modes1:, :modes2, :].set(out[1])
    return jnp.fft.irfft2(out_ft, s=(H, W), axes=(1, 2))  # (B, H, W, Cout) f32


def fno2d_forward(x, params, modes1, modes2):
    """x: (B, H, W, 3) float32 -> (B, H, W, 1) float32."""
    B, H, W, _ = x.shape
    width = params["fc1_w"].shape[0]
    p = params["w0_w"].shape[0] // width       # lane-pack factor
    N = B * H * W
    assert N % p == 0, "B*H*W must be divisible by the lane-pack factor p"
    n_rows = N // p

    # fc0: lift 3 -> width.  Input channels padded 3 -> 8, packed lane-dense.
    x_flat = jnp.pad(x.reshape(N, 3), ((0, 0), (0, 5)))        # (N, 8)
    x_packed = x_flat.reshape(n_rows, 8 * p)
    h = pointwise_linear(x_packed, params["fc0_w"], params["fc0_b"])  # (Np, p*width)

    for l in range(4):
        # spectral branch: NHWC view is a free reshape of the packed layout
        h_nhwc = h.reshape(B, H, W, width)
        x1 = spectral_conv2d(h_nhwc, params[f"conv{l}_wr"],
                             params[f"conv{l}_wi"], params[f"conv{l}_ws"],
                             modes1, modes2)
        # 1x1 conv branch fused with residual add (+ relu), lane-dense blocks
        h = pointwise_linear(h, params[f"w{l}_w"], params[f"w{l}_b"],
                             residual=x1.reshape(n_rows, p * width),
                             relu=(l < 3))

    # fused fc1 (relu) + fc2: intermediate (tile, 128) never hits HBM
    out = head_fused(h, params["fc1_w"], params["fc1_b"],
                     params["fc2_w"], params["fc2_b"], p, width)  # (Np, p)
    return out.reshape(B, H, W, 1)


# ----------------------------------------------------------------------------
# Deterministic parameter construction, pre-packed for the kernels (one-time)
# ----------------------------------------------------------------------------
def init_params(key, width, modes1, modes2):
    p = 128 // width if 128 % width == 0 else 1
    params = {}
    keys = iter(jax.random.split(key, 64))

    def unif(shape, scale=0.1):
        return scale * jax.random.uniform(next(keys), shape, dtype=jnp.float32)

    eye_p = jnp.eye(p, dtype=jnp.float32)

    # fc0: Linear(3, width) -> pad Cin 3->8, block-diag pack (p copies)
    fc0_w = jnp.pad(unif((3, width)), ((0, 5), (0, 0)))      # (8, width)
    params["fc0_w"] = jnp.kron(eye_p, fc0_w)                 # (8p, p*width)
    params["fc0_b"] = jnp.tile(unif((width,)), p)            # (p*width,)

    scale = 1.0 / (width * width)
    for l in range(4):
        # SpectralConv2d weights: complex (Cin, Cout, m1, m2); pre-transpose
        # to (2*m1*m2, Cin, Cout) real / imag / (real+imag) form here, once.
        blocks_r, blocks_i = [], []
        for _ in range(2):      # weights1 (low modes), weights2 (high modes)
            re = scale * jax.random.uniform(
                next(keys), (width, width, modes1, modes2), dtype=jnp.float32)
            im = scale * jax.random.uniform(
                next(keys), (width, width, modes1, modes2), dtype=jnp.float32)
            blocks_r.append(jnp.transpose(re, (2, 3, 0, 1)).reshape(-1, width, width))
            blocks_i.append(jnp.transpose(im, (2, 3, 0, 1)).reshape(-1, width, width))
        wr = jnp.concatenate(blocks_r, axis=0)
        wi = jnp.concatenate(blocks_i, axis=0)
        params[f"conv{l}_wr"] = wr
        params[f"conv{l}_wi"] = wi
        params[f"conv{l}_ws"] = wr + wi
        # Conv1d(width, width, 1) -> block-diagonal packed matmul
        params[f"w{l}_w"] = jnp.kron(eye_p, unif((width, width)))  # (p*w, p*w)
        params[f"w{l}_b"] = jnp.tile(unif((width,)), p)

    params["fc1_w"] = unif((width, 128))
    params["fc1_b"] = unif((128,))
    params["fc2_w"] = unif((128, 1))
    params["fc2_b"] = unif((1,))
    return params


# ----------------------------------------------------------------------------
if __name__ == "__main__":
    B, S = 2, 16          # batch, spatial size (H = W = S)
    width = 32            # channel width (module default global is 64; small here)
    modes1 = modes2 = 4

    root = jax.random.PRNGKey(0)
    k_params, k_x = jax.random.split(root)
    params = init_params(k_params, width, modes1, modes2)
    x = jax.random.normal(k_x, (B, S, S, 3), dtype=jnp.float32)

    fwd = jax.jit(fno2d_forward, static_argnums=(2, 3))
    out = jax.block_until_ready(fwd(x, params, modes1, modes2))

    assert out.shape == (B, S, S, 1)
    assert bool(jnp.all(jnp.isfinite(out)))
    print("KERNEL_OK")
</pallas_src>

<mosaic_0001>
module attributes {stable_mosaic.version = 11 : i64} {
  func.func @_mm_kernel(%arg0: i32, %arg1: memref<128x32xf32, #tpu.memory_space<vmem>>, %arg2: memref<32x128xf32, #tpu.memory_space<vmem>>, %arg3: memref<1x128xf32, #tpu.memory_space<vmem>>, %arg4: memref<128x128xf32, #tpu.memory_space<vmem>>) attributes {dimension_semantics = [#tpu.dimension_semantics<parallel>], iteration_bounds = array<i64: 1>, scalar_prefetch = 0 : i64, scratch_operands = 0 : i64, tpu.core_type = #tpu.core_type<tc>, window_params = [{transform_indices = @transform_0, window_bounds = array<i64: 128, 32>}, {pipeline_mode = #tpu.pipeline_mode<synchronous>, transform_indices = @transform_1, window_bounds = array<i64: 32, 128>}, {pipeline_mode = #tpu.pipeline_mode<synchronous>, transform_indices = @transform_2, window_bounds = array<i64: 1, 128>}, {transform_indices = @transform_3, window_bounds = array<i64: 128, 128>}]} {
    %c0 = arith.constant 0 : index
    %c0_0 = arith.constant 0 : index
    %0 = vector.load %arg1[%c0, %c0_0] : memref<128x32xf32, #tpu.memory_space<vmem>>, vector<128x32xf32>
    %c0_1 = arith.constant 0 : index
    %c0_2 = arith.constant 0 : index
    %1 = vector.load %arg2[%c0_1, %c0_2] : memref<32x128xf32, #tpu.memory_space<vmem>>, vector<32x128xf32>
    %cst = arith.constant dense<0.000000e+00> : vector<128x128xf32>
    %2 = tpu.matmul %0, %1, %cst {dimension_numbers = #tpu.dot_dimension_numbers<[1], [0], [0], [1], [0, 0, 1, 1], [], []>} : vector<128x32xf32>, vector<32x128xf32>, vector<128x128xf32> -> vector<128x128xf32>
    %c0_3 = arith.constant 0 : index
    %c0_4 = arith.constant 0 : index
    %3 = vector.load %arg3[%c0_3, %c0_4] : memref<1x128xf32, #tpu.memory_space<vmem>>, vector<1x128xf32>
    %4 = vector.broadcast %3 : vector<1x128xf32> to vector<128x128xf32>
    %5 = arith.addf %2, %4 : vector<128x128xf32>
    %c0_5 = arith.constant 0 : index
    %c0_6 = arith.constant 0 : index
    %6 = vector.load %arg4[%c0_5, %c0_6] : memref<128x128xf32, #tpu.memory_space<vmem>>, vector<128x128xf32>
    tpu.vector_store %arg4[%c0_5, %c0_6], %5 {strides = array<i32>} : memref<128x128xf32, #tpu.memory_space<vmem>>, vector<128x128xf32>,
    return
  }
  func.func @transform_0(%arg0: i32) -> (i32, i32) {
    %c0_i32 = arith.constant 0 : i32
    %c0_i32_0 = arith.constant 0 : i32
    return %arg0, %c0_i32 : i32, i32
  }
  func.func @transform_1(%arg0: i32) -> (i32, i32) {
    %c0_i32 = arith.constant 0 : i32
    %c0_i32_0 = arith.constant 0 : i32
    %c0_i32_1 = arith.constant 0 : i32
    return %c0_i32, %c0_i32_0 : i32, i32
  }
  func.func @transform_2(%arg0: i32) -> (i32, i32) {
    %c0_i32 = arith.constant 0 : i32
    %c0_i32_0 = arith.constant 0 : i32
    %c0_i32_1 = arith.constant 0 : i32
    return %c0_i32, %c0_i32_0 : i32, i32
  }
  func.func @transform_3(%arg0: i32) -> (i32, i32) {
    %c0_i32 = arith.constant 0 : i32
    %c0_i32_0 = arith.constant 0 : i32
    return %arg0, %c0_i32 : i32, i32
  }
}

module attributes {stable_mosaic.version = 11 : i64} {
  func.func @_spectral_kernel(%arg0: i32, %arg1: memref<16x2x32xf32, #tpu.memory_space<vmem>>, %arg2: memref<16x2x32xf32, #tpu.memory_space<vmem>>, %arg3: memref<16x32x32xf32, #tpu.memory_space<vmem>>, %arg4: memref<16x32x32xf32, #tpu.memory_space<vmem>>, %arg5: memref<16x32x32xf32, #tpu.memory_space<vmem>>, %arg6: memref<16x2x32xf32, #tpu.memory_space<vmem>>, %arg7: memref<16x2x32xf32, #tpu.memory_space<vmem>>) attributes {dimension_semantics = [#tpu.dimension_semantics<parallel>], iteration_bounds = array<i64: 2>, scalar_prefetch = 0 : i64, scratch_operands = 0 : i64, tpu.core_type = #tpu.core_type<tc>, window_params = [{transform_indices = @transform_0, window_bounds = array<i64: 16, 2, 32>}, {transform_indices = @transform_1, window_bounds = array<i64: 16, 2, 32>}, {transform_indices = @transform_2, window_bounds = array<i64: 16, 32, 32>}, {transform_indices = @transform_3, window_bounds = array<i64: 16, 32, 32>}, {transform_indices = @transform_4, window_bounds = array<i64: 16, 32, 32>}, {transform_indices = @transform_5, window_bounds = array<i64: 16, 2, 32>}, {transform_indices = @transform_6, window_bounds = array<i64: 16, 2, 32>}]} {
    %c0 = arith.constant 0 : index
    %c0_0 = arith.constant 0 : index
    %c0_1 = arith.constant 0 : index
    %0 = vector.load %arg1[%c0, %c0_0, %c0_1] : memref<16x2x32xf32, #tpu.memory_space<vmem>>, vector<1x2x32xf32>
    %1 = vector.shape_cast %0 : vector<1x2x32xf32> to vector<2x32xf32>
    %c0_2 = arith.constant 0 : index
    %c0_3 = arith.constant 0 : index
    %c0_4 = arith.constant 0 : index
    %2 = vector.load %arg2[%c0_2, %c0_3, %c0_4] : memref<16x2x32xf32, #tpu.memory_space<vmem>>, vector<1x2x32xf32>
    %3 = vector.shape_cast %2 : vector<1x2x32xf32> to vector<2x32xf32>
    %c0_5 = arith.constant 0 : index
    %c0_6 = arith.constant 0 : index
    %c0_7 = arith.constant 0 : index
    %4 = vector.load %arg3[%c0_5, %c0_6, %c0_7] : memref<16x32x32xf32, #tpu.memory_space<vmem>>, vector<1x32x32xf32>
    %5 = vector.shape_cast %4 : vector<1x32x32xf32> to vector<32x32xf32>
    %cst = arith.constant dense<0.000000e+00> : vector<2x32xf32>
    %6 = tpu.matmul %1, %5, %cst {dimension_numbers = #tpu.dot_dimension_numbers<[1], [0], [0], [1], [0, 0, 1, 1], [], []>} : vector<2x32xf32>, vector<32x32xf32>, vector<2x32xf32> -> vector<2x32xf32>
    %c0_8 = arith.constant 0 : index
    %c0_9 = arith.constant 0 : index
    %c0_10 = arith.constant 0 : index
    %7 = vector.load %arg4[%c0_8, %c0_9, %c0_10] : memref<16x32x32xf32, #tpu.memory_space<vmem>>, vector<1x32x32xf32>
    %8 = vector.shape_cast %7 : vector<1x32x32xf32> to vector<32x32xf32>
    %cst_11 = arith.constant dense<0.000000e+00> : vector<2x32xf32>
    %9 = tpu.matmul %3, %8, %cst_11 {dimension_numbers = #tpu.dot_dimension_numbers<[1], [0], [0], [1], [0, 0, 1, 1], [], []>} : vector<2x32xf32>, vector<32x32xf32>, vector<2x32xf32> -> vector<2x32xf32>
    %10 = arith.addf %1, %3 : vector<2x32xf32>
    %c0_12 = arith.constant 0 : index
    %c0_13 = arith.constant 0 : index
    %c0_14 = arith.constant 0 : index
    %11 = vector.load %arg5[%c0_12, %c0_13, %c0_14] : memref<16x32x32xf32, #tpu.memory_space<vmem>>, vector<1x32x32xf32>
    %12 = vector.shape_cast %11 : vector<1x32x32xf32> to vector<32x32xf32>
    %cst_15 = arith.constant dense<0.000000e+00> : vector<2x32xf32>
    %13 = tpu.matmul %10, %12, %cst_15 {dimension_numbers = #tpu.dot_dimension_numbers<[1], [0], [0], [1], [0, 0, 1, 1], [], []>} : vector<2x32xf32>, vector<32x32xf32>, vector<2x32xf32> -> vector<2x32xf32>
    %14 = arith.subf %6, %9 : vector<2x32xf32>
    %c0_16 = arith.constant 0 : index
    %c0_17 = arith.constant 0 : index
    %c0_18 = arith.constant 0 : index
    %15 = vector.load %arg6[%c0_16, %c0_17, %c0_18] : memref<16x2x32xf32, #tpu.memory_space<vmem>>, vector<1x2x32xf32>
    %16 = vector.shape_cast %15 : vector<1x2x32xf32> to vector<2x32xf32>
    %17 = vector.shape_cast %14 : vector<2x32xf32> to vector<1x2x32xf32>
    tpu.vector_store %arg6[%c0_16, %c0_17, %c0_18], %17 {strides = array<i32>} : memref<16x2x32xf32, #tpu.memory_space<vmem>>, vector<1x2x32xf32>,
    %18 = arith.subf %13, %6 : vector<2x32xf32>
    %19 = arith.subf %18, %9 : vector<2x32xf32>
    %c0_19 = arith.constant 0 : index
    %c0_20 = arith.constant 0 : index
    %c0_21 = arith.constant 0 : index
    %20 = vector.load %arg7[%c0_19, %c0_20, %c0_21] : memref<16x2x32xf32, #tpu.memory_space<vmem>>, vector<1x2x32xf32>
    %21 = vector.shape_cast %20 : vector<1x2x32xf32> to vector<2x32xf32>
    %22 = vector.shape_cast %19 : vector<2x32xf32> to vector<1x2x32xf32>
    tpu.vector_store %arg7[%c0_19, %c0_20, %c0_21], %22 {strides = array<i32>} : memref<16x2x32xf32, #tpu.memory_space<vmem>>, vector<1x2x32xf32>,
    %c1 = arith.constant 1 : index
    %c0_22 = arith.constant 0 : index
    %c0_23 = arith.constant 0 : index
    %23 = vector.load %arg1[%c1, %c0_22, %c0_23] : memref<16x2x32xf32, #tpu.memory_space<vmem>>, vector<1x2x32xf32>
    %24 = vector.shape_cast %23 : vector<1x2x32xf32> to vector<2x32xf32>
    %c1_24 = arith.constant 1 : index
    %c0_25 = arith.constant 0 : index
    %c0_26 = arith.constant 0 : index
    %25 = vector.load %arg2[%c1_24, %c0_25, %c0_26] : memref<16x2x32xf32, #tpu.memory_space<vmem>>, vector<1x2x32xf32>
    %26 = vector.shape_cast %25 : vector<1x2x32xf32> to vector<2x32xf32>
    %c1_27 = arith.constant 1 : index
    %c0_28 = arith.constant 0 : index
    %c0_29 = arith.constant 0 : index
    %27 = vector.load %arg3[%c1_27, %c0_28, %c0_29] : memref<16x32x32xf32, #tpu.memory_space<vmem>>, vector<1x32x32xf32>
    %28 = vector.shape_cast %27 : vector<1x32x32xf32> to vector<32x32xf32>
    %cst_30 = arith.constant dense<0.000000e+00> : vector<2x32xf32>
    %29 = tpu.matmul %24, %28, %cst_30 {dimension_numbers = #tpu.dot_dimension_numbers<[1], [0], [0], [1], [0, 0, 1, 1], [], []>} : vector<2x32xf32>, vector<32x32xf32>, vector<2x32xf32> -> vector<2x32xf32>
    %c1_31 = arith.constant 1 : index
    %c0_32 = arith.constant 0 : index
    %c0_33 = arith.constant 0 : index
    %30 = vector.load %arg4[%c1_31, %c0_32, %c0_33] : memref<16x32x32xf32, #tpu.memory_space<vmem>>, vector<1x32x32xf32>
    %31 = vector.shape_cast %30 : vector<1x32x32xf32> to vector<32x32xf32>
    %cst_34 = arith.constant dense<0.000000e+00> : vector<2x32xf32>
    %32 = tpu.matmul %26, %31, %cst_34 {dimension_numbers = #tpu.dot_dimension_numbers<[1], [0], [0], [1], [0, 0, 1, 1], [], []>} : vector<2x32xf32>, vector<32x32xf32>, vector<2x32xf32> -> vector<2x32xf32>
    %33 = arith.addf %24, %26 : vector<2x32xf32>
    %c1_35 = arith.constant 1 : index
    %c0_36 = arith.constant 0 : index
    %c0_37 = arith.constant 0 : index
    %34 = vector.load %arg5[%c1_35, %c0_36, %c0_37] : memref<16x32x32xf32, #tpu.memory_space<vmem>>, vector<1x32x32xf32>
    %35 = vector.shape_cast %34 : vector<1x32x32xf32> to vector<32x32xf32>
    %cst_38 = arith.constant dense<0.000000e+00> : vector<2x32xf32>
    %36 = tpu.matmul %33, %35, %cst_38 {dimension_numbers = #tpu.dot_dimension_numbers<[1], [0], [0], [1], [0, 0, 1, 1], [], []>} : vector<2x32xf32>, vector<32x32xf32>, vector<2x32xf32> -> vector<2x32xf32>
    %37 = arith.subf %29, %32 : vector<2x32xf32>
    %c1_39 = arith.constant 1 : index
    %c0_40 = arith.constant 0 : index
    %c0_41 = arith.constant 0 : index
    %38 = vector.load %arg6[%c1_39, %c0_40, %c0_41] : memref<16x2x32xf32, #tpu.memory_space<vmem>>, vector<1x2x32xf32>
    %39 = vector.shape_cast %38 : vector<1x2x32xf32> to vector<2x32xf32>
    %40 = vector.shape_cast %37 : vector<2x32xf32> to vector<1x2x32xf32>
    tpu.vector_store %arg6[%c1_39, %c0_40, %c0_41], %40 {strides = array<i32>} : memref<16x2x32xf32, #tpu.memory_space<vmem>>, vector<1x2x32xf32>,
    %41 = arith.subf %36, %29 : vector<2x32xf32>
    %42 = arith.subf %41, %32 : vector<2x32xf32>
    %c1_42 = arith.constant 1 : index
    %c0_43 = arith.constant 0 : index
    %c0_44 = arith.constant 0 : index
    %43 = vector.load %arg7[%c1_42, %c0_43, %c0_44] : memref<16x2x32xf32, #tpu.memory_space<vmem>>, vector<1x2x32xf32>
    %44 = vector.shape_cast %43 : vector<1x2x32xf32> to vector<2x32xf32>
    %45 = vector.shape_cast %42 : vector<2x32xf32> to vector<1x2x32xf32>
    tpu.vector_store %arg7[%c1_42, %c0_43, %c0_44], %45 {strides = array<i32>} : memref<16x2x32xf32, #tpu.memory_space<vmem>>, vector<1x2x32xf32>,
    %c2 = arith.constant 2 : index
    %c0_45 = arith.constant 0 : index
    %c0_46 = arith.constant 0 : index
    %46 = vector.load %arg1[%c2, %c0_45, %c0_46] : memref<16x2x32xf32, #tpu.memory_space<vmem>>, vector<1x2x32xf32>
    %47 = vector.shape_cast %46 : vector<1x2x32xf32> to vector<2x32xf32>
    %c2_47 = arith.constant 2 : index
    %c0_48 = arith.constant 0 : index
    %c0_49 = arith.constant 0 : index
    %48 = vector.load %arg2[%c2_47, %c0_48, %c0_49] : memref<16x2x32xf32, #tpu.memory_space<vmem>>, vector<1x2x32xf32>
    %49 = vector.shape_cast %48 : vector<1x2x32xf32> to vector<2x32xf32>
    %c2_50 = arith.constant 2 : index
    %c0_51 = arith.constant 0 : index
    %c0_52 = arith.constant 0 : index
    %50 = vector.load %arg3[%c2_50, %c0_51, %c0_52] : memref<16x32x32xf32, #tpu.memory_space<vmem>>, vector<1x32x32xf32>
    %51 = vector.shape_cast %50 : vector<1x32x32xf32> to vector<32x32xf32>
    %cst_53 = arith.constant dense<0.000000e+00> : vector<2x32xf32>
    %52 = tpu.matmul %47, %51, %cst_53 {dimension_numbers = #tpu.dot_dimension_numbers<[1], [0], [0], [1], [0, 0, 1, 1], [], []>} : vector<2x32xf32>, vector<32x32xf32>, vector<2x32xf32> -> vector<2x32xf32>
    %c2_54 = arith.constant 2 : index
    %c0_55 = arith.constant 0 : index
    %c0_56 = arith.constant 0 : index
    %53 = vector.load %arg4[%c2_54, %c0_55, %c0_56] : memref<16x32x32xf32, #tpu.memory_space<vmem>>, vector<1x32x32xf32>
    %54 = vector.shape_cast %53 : vector<1x32x32xf32> to vector<32x32xf32>
    %cst_57 = arith.constant dense<0.000000e+00> : vector<2x32xf32>
    %55 = tpu.matmul %49, %54, %cst_57 {dimension_numbers = #tpu.dot_dimension_numbers<[1], [0], [0], [1], [0, 0, 1, 1], [], []>} : vector<2x32xf32>, vector<32x32xf32>, vector<2x32xf32> -> vector<2x32xf32>
    %56 = arith.addf %47, %49 : vector<2x32xf32>
    %c2_58 = arith.constant 2 : index
    %c0_59 = arith.constant 0 : index
    %c0_60 = arith.constant 0 : index
    %57 = vector.load %arg5[%c2_58, %c0_59, %c0_60] : memref<16x32x32xf32, #tpu.memory_space<vmem>>, vector<1x32x32xf32>
    %58 = vector.shape_cast %57 : vector<1x32x32xf32> to vector<32x32xf32>
    %cst_61 = arith.constant dense<0.000000e+00> : vector<2x32xf32>
    %59 = tpu.matmul %56, %58, %cst_61 {dimension_numbers = #tpu.dot_dimension_numbers<[1], [0], [0], [1], [0, 0, 1, 1], [], []>} : vector<2x32xf32>, vector<32x32xf32>, vector<2x32xf32> -> vector<2x32xf32>
    %60 = arith.subf %52, %55 : vector<2x32xf32>
    %c2_62 = arith.constant 2 : index
    %c0_63 = arith.constant 0 : index
    %c0_64 = arith.constant 0 : index
    %61 = vector.load %arg6[%c2_62, %c0_63, %c0_64] : memref<16x2x32xf32, #tpu.memory_space<vmem>>, vector<1x2x32xf32>
    %62 = vector.shape_cast %61 : vector<1x2x32xf32> to vector<2x32xf32>
    %63 = vector.shape_cast %60 : vector<2x32xf32> to vector<1x2x32xf32>
    tpu.vector_store %arg6[%c2_62, %c0_63, %c0_64], %63 {strides = array<i32>} : memref<16x2x32xf32, #tpu.memory_space<vmem>>, vector<1x2x32xf32>,
    %64 = arith.subf %59, %52 : vector<2x32xf32>
    %65 = arith.subf %64, %55 : vector<2x32xf32>
    %c2_65 = arith.constant 2 : index
    %c0_66 = arith.constant 0 : index
    %c0_67 = arith.constant 0 : index
    %66 = vector.load %arg7[%c2_65, %c0_66, %c0_67] : memref<16x2x32xf32, #tpu.memory_space<vmem>>, vector<1x2x32xf32>
    %67 = vector.shape_cast %66 : vector<1x2x32xf32> to vector<2x32xf32>
    %68 = vector.shape_cast %65 : vector<2x32xf32> to vector<1x2x32xf32>
    tpu.vector_store %arg7[%c2_65, %c0_66, %c0_67], %68 {strides = array<i32>} : memref<16x2x32xf32, #tpu.memory_space<vmem>>, vector<1x2x32xf32>,
    %c3 = arith.constant 3 : index
    %c0_68 = arith.constant 0 : index
    %c0_69 = arith.constant 0 : index
    %69 = vector.load %arg1[%c3, %c0_68, %c0_69] : memref<16x2x32xf32, #tpu.memory_space<vmem>>, vector<1x2x32xf32>
    %70 = vector.shape_cast %69 : vector<1x2x32xf32> to vector<2x32xf32>
    %c3_70 = arith.constant 3 : index
    %c0_71 = arith.constant 0 : index
    %c0_72 = arith.constant 0 : index
    %71 = vector.load %arg2[%c3_70, %c0_71, %c0_72] : memref<16x2x32xf32, #tpu.memory_space<vmem>>, vector<1x2x32xf32>
    %72 = vector.shape_cast %71 : vector<1x2x32xf32> to vector<2x32xf32>
    %c3_73 = arith.constant 3 : index
    %c0_74 = arith.constant 0 : index
    %c0_75 = arith.constant 0 : index
    %73 = vector.load %arg3[%c3_73, %c0_74, %c0_75] : memref<16x32x32xf32, #tpu.memory_space<vmem>>, vector<1x32x32xf32>
    %74 = vector.shape_cast %73 : vector<1x32x32xf32> to vector<32x32xf32>
    %cst_76 = arith.constant dense<0.000000e+00> : vector<2x32xf32>
    %75 = tpu.matmul %70, %74, %cst_76 {dimension_numbers = #tpu.dot_dimension_numbers<[1], [0], [0], [1], [0, 0, 1, 1], [], []>} : vector<2x32xf32>, vector<32x32xf32>, vector<2x32xf32> -> vector<2x32xf32>
    %c3_77 = arith.constant 3 : index
    %c0_78 = arith.constant 0 : index
    %c0_79 = arith.constant 0 : index
    %76 = vector.load %arg4[%c3_77, %c0_78, %c0_79] : memref<16x32x32xf32, #tpu.memory_space<vmem>>, vector<1x32x32xf32>
    %77 = vector.shape_cast %76 : vector<1x32x32xf32> to vector<32x32xf32>
    %cst_80 = arith.constant dense<0.000000e+00> : vector<2x32xf32>
    %78 = tpu.matmul %72, %77, %cst_80 {dimension_numbers = #tpu.dot_dimension_numbers<[1], [0], [0], [1], [0, 0, 1, 1], [], []>} : vector<2x32xf32>, vector<32x32xf32>, vector<2x32xf32> -> vector<2x32xf32>
    %79 = arith.addf %70, %72 : vector<2x32xf32>
    %c3_81 = arith.constant 3 : index
    %c0_82 = arith.constant 0 : index
    %c0_83 = arith.constant 0 : index
    %80 = vector.load %arg5[%c3_81, %c0_82, %c0_83] : memref<16x32x32xf32, #tpu.memory_space<vmem>>, vector<1x32x32xf32>
    %81 = vector.shape_cast %80 : vector<1x32x32xf32> to vector<32x32xf32>
    %cst_84 = arith.constant dense<0.000000e+00> : vector<2x32xf32>
    %82 = tpu.matmul %79, %81, %cst_84 {dimension_numbers = #tpu.dot_dimension_numbers<[1], [0], [0], [1], [0, 0, 1, 1], [], []>} : vector<2x32xf32>, vector<32x32xf32>, vector<2x32xf32> -> vector<2x32xf32>
    %83 = arith.subf %75, %78 : vector<2x32xf32>
    %c3_85 = arith.constant 3 : index
    %c0_86 = arith.constant 0 : index
    %c0_87 = arith.constant 0 : index
    %84 = vector.load %arg6[%c3_85, %c0_86, %c0_87] : memref<16x2x32xf32, #tpu.memory_space<vmem>>, vector<1x2x32xf32>
    %85 = vector.shape_cast %84 : vector<1x2x32xf32> to vector<2x32xf32>
    %86 = vector.shape_cast %83 : vector<2x32xf32> to vector<1x2x32xf32>
    tpu.vector_store %arg6[%c3_85, %c0_86, %c0_87], %86 {strides = array<i32>} : memref<16x2x32xf32, #tpu.memory_space<vmem>>, vector<1x2x32xf32>,
    %87 = arith.subf %82, %75 : vector<2x32xf32>
    %88 = arith.subf %87, %78 : vector<2x32xf32>
    %c3_88 = arith.constant 3 : index
    %c0_89 = arith.constant 0 : index
    %c0_90 = arith.constant 0 : index
    %89 = vector.load %arg7[%c3_88, %c0_89, %c0_90] : memref<16x2x32xf32, #tpu.memory_space<vmem>>, vector<1x2x32xf32>
    %90 = vector.shape_cast %89 : vector<1x2x32xf32> to vector<2x32xf32>
    %91 = vector.shape_cast %88 : vector<2x32xf32> to vector<1x2x32xf32>
    tpu.vector_store %arg7[%c3_88, %c0_89, %c0_90], %91 {strides = array<i32>} : memref<16x2x32xf32, #tpu.memory_space<vmem>>, vector<1x2x32xf32>,
    %c4 = arith.constant 4 : index
    %c0_91 = arith.constant 0 : index
    %c0_92 = arith.constant 0 : index
    %92 = vector.load %arg1[%c4, %c0_91, %c0_92] : memref<16x2x32xf32, #tpu.memory_space<vmem>>, vector<1x2x32xf32>
    %93 = vector.shape_cast %92 : vector<1x2x32xf32> to vector<2x32xf32>
    %c4_93 = arith.constant 4 : index
    %c0_94 = arith.constant 0 : index
    %c0_95 = arith.constant 0 : index
    %94 = vector.load %arg2[%c4_93, %c0_94, %c0_95] : memref<16x2x32xf32, #tpu.memory_space<vmem>>, vector<1x2x32xf32>
    %95 = vector.shape_cast %94 : vector<1x2x32xf32> to vector<2x32xf32>
    %c4_96 = arith.constant 4 : index
    %c0_97 = arith.constant 0 : index
    %c0_98 = arith.constant 0 : index
    %96 = vector.load %arg3[%c4_96, %c0_97, %c0_98] : memref<16x32x32xf32, #tpu.memory_space<vmem>>, vector<1x32x32xf32>
    %97 = vector.shape_cast %96 : vector<1x32x32xf32> to vector<32x32xf32>
    %cst_99 = arith.constant dense<0.000000e+00> : vector<2x32xf32>
    %98 = tpu.matmul %93, %97, %cst_99 {dimension_numbers = #tpu.dot_dimension_numbers<[1], [0], [0], [1], [0, 0, 1, 1], [], []>} : vector<2x32xf32>, vector<32x32xf32>, vector<2x32xf32> -> vector<2x32xf32>
    %c4_100 = arith.constant 4 : index
    %c0_101 = arith.constant 0 : index
    %c0_102 = arith.constant 0 : index
    %99 = vector.load %arg4[%c4_100, %c0_101, %c0_102] : memref<16x32x32xf32, #tpu.memory_space<vmem>>, vector<1x32x32xf32>
    %100 = vector.shape_cast %99 : vector<1x32x32xf32> to vector<32x32xf32>
    %cst_103 = arith.constant dense<0.000000e+00> : vector<2x32xf32>
    %101 = tpu.matmul %95, %100, %cst_103 {dimension_numbers = #tpu.dot_dimension_numbers<[1], [0], [0], [1], [0, 0, 1, 1], [], []>} : vector<2x32xf32>, vector<32x32xf32>, vector<2x32xf32> -> vector<2x32xf32>
    %102 = arith.addf %93, %95 : vector<2x32xf32>
    %c4_104 = arith.constant 4 : index
    %c0_105 = arith.constant 0 : index
    %c0_106 = arith.constant 0 : index
    %103 = vector.load %arg5[%c4_104, %c0_105, %c0_106] : memref<16x32x32xf32, #tpu.memory_space<vmem>>, vector<1x32x32xf32>
    %104 = vector.shape_cast %103 : vector<1x32x32xf32> to vector<32x32xf32>
    %cst_107 = arith.constant dense<0.000000e+00> : vector<2x32xf32>
    %105 = tpu.matmul %102, %104, %cst_107 {dimension_numbers = #tpu.dot_dimension_numbers<[1], [0], [0], [1], [0, 0, 1, 1], [], []>} : vector<2x32xf32>, vector<32x32xf32>, vector<2x32xf32> -> vector<2x32xf32>
    %106 = arith.subf %98, %101 : vector<2x32xf32>
    %c4_108 = arith.constant 4 : index
    %c0_109 = arith.constant 0 : index
    %c0_110 = arith.constant 0 : index
    %107 = vector.load %arg6[%c4_108, %c0_109, %c0_110] : memref<16x2x32xf32, #tpu.memory_space<vmem>>, vector<1x2x32xf32>
    %108 = vector.shape_cast %107 : vector<1x2x32xf32> to vector<2x32xf32>
    %109 = vector.shape_cast %106 : vector<2x32xf32> to vector<1x2x32xf32>
    tpu.vector_store %arg6[%c4_108, %c0_109, %c0_110], %109 {strides = array<i32>} : memref<16x2x32xf32, #tpu.memory_space<vmem>>, vector<1x2x32xf32>,
    %110 = arith.subf %105, %98 : vector<2x32xf32>
    %111 = arith.subf %110, %101 : vector<2x32xf32>
    %c4_111 = arith.constant 4 : index
    %c0_112 = arith.constant 0 : index
    %c0_113 = arith.constant 0 : index
    %112 = vector.load %arg7[%c4_111, %c0_112, %c0_113] : memref<16x2x32xf32, #tpu.memory_space<vmem>>, vector<1x2x32xf32>
    %113 = vector.shape_cast %112 : vector<1x2x32xf32> to vector<2x32xf32>
    %114 = vector.shape_cast %111 : vector<2x32xf32> to vector<1x2x32xf32>
    tpu.vector_store %arg7[%c4_111, %c0_112, %c0_113], %114 {strides = array<i32>} : memref<16x2x32xf32, #tpu.memory_space<vmem>>, vector<1x2x32xf32>,
    %c5 = arith.constant 5 : index
    %c0_114 = arith.constant 0 : index
    %c0_115 = arith.constant 0 : index
    %115 = vector.load %arg1[%c5, %c0_114, %c0_115] : memref<16x2x32xf32, #tpu.memory_space<vmem>>, vector<1x2x32xf32>
    %116 = vector.shape_cast %115 : vector<1x2x32xf32> to vector<2x32xf32>
    %c5_116 = arith.constant 5 : index
    %c0_117 = arith.constant 0 : index
    %c0_118 = arith.constant 0 : index
    %117 = vector.load %arg2[%c5_116, %c0_117, %c0_118] : memref<16x2x32xf32, #tpu.memory_space<vmem>>, vector<1x2x32xf32>
    %118 = vector.shape_cast %117 : vector<1x2x32xf32> to vector<2x32xf32>
    %c5_119 = arith.constant 5 : index
    %c0_120 = arith.constant 0 : index
    %c0_121 = arith.constant 0 : index
    %119 = vector.load %arg3[%c5_119, %c0_120, %c0_121] : memref<16x32x32xf32, #tpu.memory_space<vmem>>, vector<1x32x32xf32>
    %120 = vector.shape_cast %119 : vector<1x32x32xf32> to vector<32x32xf32>
    %cst_122 = arith.constant dense<0.000000e+00> : vector<2x32xf32>
    %121 = tpu.matmul %116, %120, %cst_122 {dimension_numbers = #tpu.dot_dimension_numbers<[1], [0], [0], [1], [0, 0, 1, 1], [], []>} : vector<2x32xf32>, vector<32x32xf32>, vector<2x32xf32> -> vector<2x32xf32>
    %c5_123 = arith.constant 5 : index
    %c0_124 = arith.constant 0 : index
    %c0_125 = arith.constant 0 : index
    %122 = vector.load %arg4[%c5_123, %c0_124, %c0_125] : memref<16x32x32xf32, #tpu.memory_space<vmem>>, vector<1x32x32xf32>
    %123 = vector.shape_cast %122 : vector<1x32x32xf32> to vector<32x32xf32>
    %cst_126 = arith.constant dense<0.000000e+00> : vector<2x32xf32>
    %124 = tpu.matmul %118, %123, %cst_126 {dimension_numbers = #tpu.dot_dimension_numbers<[1], [0], [0], [1], [0, 0, 1, 1], [], []>} : vector<2x32xf32>, vector<32x32xf32>, vector<2x32xf32> -> vector<2x32xf32>
    %125 = arith.addf %116, %118 : vector<2x32xf32>
    %c5_127 = arith.constant 5 : index
    %c0_128 = arith.constant 0 : index
    %c0_129 = arith.constant 0 : index
    %126 = vector.load %arg5[%c5_127, %c0_128, %c0_129] : memref<16x32x32xf32, #tpu.memory_space<vmem>>, vector<1x32x32xf32>
    %127 = vector.shape_cast %126 : vector<1x32x32xf32> to vector<32x32xf32>
    %cst_130 = arith.constant dense<0.000000e+00> : vector<2x32xf32>
    %128 = tpu.matmul %125, %127, %cst_130 {dimension_numbers = #tpu.dot_dimension_numbers<[1], [0], [0], [1], [0, 0, 1, 1], [], []>} : vector<2x32xf32>, vector<32x32xf32>, vector<2x32xf32> -> vector<2x32xf32>
    %129 = arith.subf %121, %124 : vector<2x32xf32>
    %c5_131 = arith.constant 5 : index
    %c0_132 = arith.constant 0 : index
    %c0_133 = arith.constant 0 : index
    %130 = vector.load %arg6[%c5_131, %c0_132, %c0_133] : memref<16x2x32xf32, #tpu.memory_space<vmem>>, vector<1x2x32xf32>
    %131 = vector.shape_cast %130 : vector<1x2x32xf32> to vector<2x32xf32>
    %132 = vector.shape_cast %129 : vector<2x32xf32> to vector<1x2x32xf32>
    tpu.vector_store %arg6[%c5_131, %c0_132, %c0_133], %132 {strides = array<i32>} : memref<16x2x32xf32, #tpu.memory_space<vmem>>, vector<1x2x32xf32>,
    %133 = arith.subf %128, %121 : vector<2x32xf32>
    %134 = arith.subf %133, %124 : vector<2x32xf32>
    %c5_134 = arith.constant 5 : index
    %c0_135 = arith.constant 0 : index
    %c0_136 = arith.constant 0 : index
    %135 = vector.load %arg7[%c5_134, %c0_135, %c0_136] : memref<16x2x32xf32, #tpu.memory_space<vmem>>, vector<1x2x32xf32>
    %136 = vector.shape_cast %135 : vector<1x2x32xf32> to vector<2x32xf32>
    %137 = vector.shape_cast %134 : vector<2x32xf32> to vector<1x2x32xf32>
    tpu.vector_store %arg7[%c5_134, %c0_135, %c0_136], %137 {strides = array<i32>} : memref<16x2x32xf32, #tpu.memory_space<vmem>>, vector<1x2x32xf32>,
    %c6 = arith.constant 6 : index
    %c0_137 = arith.constant 0 : index
    %c0_138 = arith.constant 0 : index
    %138 = vector.load %arg1[%c6, %c0_137, %c0_138] : memref<16x2x32xf32, #tpu.memory_space<vmem>>, vector<1x2x32xf32>
    %139 = vector.shape_cast %138 : vector<1x2x32xf32> to vector<2x32xf32>
    %c6_139 = arith.constant 6 : index
    %c0_140 = arith.constant 0 : index
    %c0_141 = arith.constant 0 : index
    %140 = vector.load %arg2[%c6_139, %c0_140, %c0_141] : memref<16x2x32xf32, #tpu.memory_space<vmem>>, vector<1x2x32xf32>
    %141 = vector.shape_cast %140 : vector<1x2x32xf32> to vector<2x32xf32>
    %c6_142 = arith.constant 6 : index
    %c0_143 = arith.constant 0 : index
    %c0_144 = arith.constant 0 : index
    %142 = vector.load %arg3[%c6_142, %c0_143, %c0_144] : memref<16x32x32xf32, #tpu.memory_space<vmem>>, vector<1x32x32xf32>
    %143 = vector.shape_cast %142 : vector<1x32x32xf32> to vector<32x32xf32>
    %cst_145 = arith.constant dense<0.000000e+00> : vector<2x32xf32>
    %144 = tpu.matmul %139, %143, %cst_145 {dimension_numbers = #tpu.dot_dimension_numbers<[1], [0], [0], [1], [0, 0, 1, 1], [], []>} : vector<2x32xf32>, vector<32x32xf32>, vector<2x32xf32> -> vector<2x32xf32>
    %c6_146 = arith.constant 6 : index
    %c0_147 = arith.constant 0 : index
    %c0_148 = arith.constant 0 : index
    %145 = vector.load %arg4[%c6_146, %c0_147, %c0_148] : memref<16x32x32xf32, #tpu.memory_space<vmem>>, vector<1x32x32xf32>
    %146 = vector.shape_cast %145 : vector<1x32x32xf32> to vector<32x32xf32>
    %cst_149 = arith.constant dense<0.000000e+00> : vector<2x32xf32>
    %147 = tpu.matmul %141, %146, %cst_149 {dimension_numbers = #tpu.dot_dimension_numbers<[1], [0], [0], [1], [0, 0, 1, 1], [], []>} : vector<2x32xf32>, vector<32x32xf32>, vector<2x32xf32> -> vector<2x32xf32>
    %148 = arith.addf %139, %141 : vector<2x32xf32>
    %c6_150 = arith.constant 6 : index
    %c0_151 = arith.constant 0 : index
    %c0_152 = arith.constant 0 : index
    %149 = vector.load %arg5[%c6_150, %c0_151, %c0_152] : memref<16x32x32xf32, #tpu.memory_space<vmem>>, vector<1x32x32xf32>
    %150 = vector.shape_cast %149 : vector<1x32x32xf32> to vector<32x32xf32>
    %cst_153 = arith.constant dense<0.000000e+00> : vector<2x32xf32>
    %151 = tpu.matmul %148, %150, %cst_153 {dimension_numbers = #tpu.dot_dimension_numbers<[1], [0], [0], [1], [0, 0, 1, 1], [], []>} : vector<2x32xf32>, vector<32x32xf32>, vector<2x32xf32> -> vector<2x32xf32>
    %152 = arith.subf %144, %147 : vector<2x32xf32>
    %c6_154 = arith.constant 6 : index
    %c0_155 = arith.constant 0 : index
    %c0_156 = arith.constant 0 : index
    %153 = vector.load %arg6[%c6_154, %c0_155, %c0_156] : memref<16x2x32xf32, #tpu.memory_space<vmem>>, vector<1x2x32xf32>
    %154 = vector.shape_cast %153 : vector<1x2x32xf32> to vector<2x32xf32>
    %155 = vector.shape_cast %152 : vector<2x32xf32> to vector<1x2x32xf32>
    tpu.vector_store %arg6[%c6_154, %c0_155, %c0_156], %155 {strides = array<i32>} : memref<16x2x32xf32, #tpu.memory_space<vmem>>, vector<1x2x32xf32>,
    %156 = arith.subf %151, %144 : vector<2x32xf32>
    %157 = arith.subf %156, %147 : vector<2x32xf32>
    %c6_157 = arith.constant 6 : index
    %c0_158 = arith.constant 0 : index
    %c0_159 = arith.constant 0 : index
    %158 = vector.load %arg7[%c6_157, %c0_158, %c0_159] : memref<16x2x32xf32, #tpu.memory_space<vmem>>, vector<1x2x32xf32>
    %159 = vector.shape_cast %158 : vector<1x2x32xf32> to vector<2x32xf32>
    %160 = vector.shape_cast %157 : vector<2x32xf32> to vector<1x2x32xf32>
    tpu.vector_store %arg7[%c6_157, %c0_158, %c0_159], %160 {strides = array<i32>} : memref<16x2x32xf32, #tpu.memory_space<vmem>>, vector<1x2x32xf32>,
    %c7 = arith.constant 7 : index
    %c0_160 = arith.constant 0 : index
    %c0_161 = arith.constant 0 : index
    %161 = vector.load %arg1[%c7, %c0_160, %c0_161] : memref<16x2x32xf32, #tpu.memory_space<vmem>>, vector<1x2x32xf32>
    %162 = vector.shape_cast %161 : vector<1x2x32xf32> to vector<2x32xf32>
    %c7_162 = arith.constant 7 : index
    %c0_163 = arith.constant 0 : index
    %c0_164 = arith.constant 0 : index
    %163 = vector.load %arg2[%c7_162, %c0_163, %c0_164] : memref<16x2x32xf32, #tpu.memory_space<vmem>>, vector<1x2x32xf32>
    %164 = vector.shape_cast %163 : vector<1x2x32xf32> to vector<2x32xf32>
    %c7_165 = arith.constant 7 : index
    %c0_166 = arith.constant 0 : index
    %c0_167 = arith.constant 0 : index
    %165 = vector.load %arg3[%c7_165, %c0_166, %c0_167] : memref<16x32x32xf32, #tpu.memory_space<vmem>>, vector<1x32x32xf32>
    %166 = vector.shape_cast %165 : vector<1x32x32xf32> to vector<32x32xf32>
    %cst_168 = arith.constant dense<0.000000e+00> : vector<2x32xf32>
    %167 = tpu.matmul %162, %166, %cst_168 {dimension_numbers = #tpu.dot_dimension_numbers<[1], [0], [0], [1], [0, 0, 1, 1], [], []>} : vector<2x32xf32>, vector<32x32xf32>, vector<2x32xf32> -> vector<2x32xf32>
    %c7_169 = arith.constant 7 : index
    %c0_170 = arith.constant 0 : index
    %c0_171 = arith.constant 0 : index
    %168 = vector.load %arg4[%c7_169, %c0_170, %c0_171] : memref<16x32x32xf32, #tpu.memory_space<vmem>>, vector<1x32x32xf32>
    %169 = vector.shape_cast %168 : vector<1x32x32xf32> to vector<32x32xf32>
    %cst_172 = arith.constant dense<0.000000e+00> : vector<2x32xf32>
    %170 = tpu.matmul %164, %169, %cst_172 {dimension_numbers = #tpu.dot_dimension_numbers<[1], [0], [0], [1], [0, 0, 1, 1], [], []>} : vector<2x32xf32>, vector<32x32xf32>, vector<2x32xf32> -> vector<2x32xf32>
    %171 = arith.addf %162, %164 : vector<2x32xf32>
    %c7_173 = arith.constant 7 : index
    %c0_174 = arith.constant 0 : index
    %c0_175 = arith.constant 0 : index
    %172 = vector.load %arg5[%c7_173, %c0_174, %c0_175] : memref<16x32x32xf32, #tpu.memory_space<vmem>>, vector<1x32x32xf32>
    %173 = vector.shape_cast %172 : vector<1x32x32xf32> to vector<32x32xf32>
    %cst_176 = arith.constant dense<0.000000e+00> : vector<2x32xf32>
    %174 = tpu.matmul %171, %173, %cst_176 {dimension_numbers = #tpu.dot_dimension_numbers<[1], [0], [0], [1], [0, 0, 1, 1], [], []>} : vector<2x32xf32>, vector<32x32xf32>, vector<2x32xf32> -> vector<2x32xf32>
    %175 = arith.subf %167, %170 : vector<2x32xf32>
    %c7_177 = arith.constant 7 : index
    %c0_178 = arith.constant 0 : index
    %c0_179 = arith.constant 0 : index
    %176 = vector.load %arg6[%c7_177, %c0_178, %c0_179] : memref<16x2x32xf32, #tpu.memory_space<vmem>>, vector<1x2x32xf32>
    %177 = vector.shape_cast %176 : vector<1x2x32xf32> to vector<2x32xf32>
    %178 = vector.shape_cast %175 : vector<2x32xf32> to vector<1x2x32xf32>
    tpu.vector_store %arg6[%c7_177, %c0_178, %c0_179], %178 {strides = array<i32>} : memref<16x2x32xf32, #tpu.memory_space<vmem>>, vector<1x2x32xf32>,
    %179 = arith.subf %174, %167 : vector<2x32xf32>
    %180 = arith.subf %179, %170 : vector<2x32xf32>
    %c7_180 = arith.constant 7 : index
    %c0_181 = arith.constant 0 : index
    %c0_182 = arith.constant 0 : index
    %181 = vector.load %arg7[%c7_180, %c0_181, %c0_182] : memref<16x2x32xf32, #tpu.memory_space<vmem>>, vector<1x2x32xf32>
    %182 = vector.shape_cast %181 : vector<1x2x32xf32> to vector<2x32xf32>
    %183 = vector.shape_cast %180 : vector<2x32xf32> to vector<1x2x32xf32>
    tpu.vector_store %arg7[%c7_180, %c0_181, %c0_182], %183 {strides = array<i32>} : memref<16x2x32xf32, #tpu.memory_space<vmem>>, vector<1x2x32xf32>,
    %c8 = arith.constant 8 : index
    %c0_183 = arith.constant 0 : index
    %c0_184 = arith.constant 0 : index
    %184 = vector.load %arg1[%c8, %c0_183, %c0_184] : memref<16x2x32xf32, #tpu.memory_space<vmem>>, vector<1x2x32xf32>
    %185 = vector.shape_cast %184 : vector<1x2x32xf32> to vector<2x32xf32>
    %c8_185 = arith.constant 8 : index
    %c0_186 = arith.constant 0 : index
    %c0_187 = arith.constant 0 : index
    %186 = vector.load %arg2[%c8_185, %c0_186, %c0_187] : memref<16x2x32xf32, #tpu.memory_space<vmem>>, vector<1x2x32xf32>
    %187 = vector.shape_cast %186 : vector<1x2x32xf32> to vector<2x32xf32>
    %c8_188 = arith.constant 8 : index
    %c0_189 = arith.constant 0 : index
    %c0_190 = arith.constant 0 : index
    %188 = vector.load %arg3[%c8_188, %c0_189, %c0_190] : memref<16x32x32xf32, #tpu.memory_space<vmem>>, vector<1x32x32xf32>
    %189 = vector.shape_cast %188 : vector<1x32x32xf32> to vector<32x32xf32>
    %cst_191 = arith.constant dense<0.000000e+00> : vector<2x32xf32>
    %190 = tpu.matmul %185, %189, %cst_191 {dimension_numbers = #tpu.dot_dimension_numbers<[1], [0], [0], [1], [0, 0, 1, 1], [], []>} : vector<2x32xf32>, vector<32x32xf32>, vector<2x32xf32> -> vector<2x32xf32>
    %c8_192 = arith.constant 8 : index
    %c0_193 = arith.constant 0 : index
    %c0_194 = arith.constant 0 : index
    %191 = vector.load %arg4[%c8_192, %c0_193, %c0_194] : memref<16x32x32xf32, #tpu.memory_space<vmem>>, vector<1x32x32xf32>
    %192 = vector.shape_cast %191 : vector<1x32x32xf32> to vector<32x32xf32>
    %cst_195 = arith.constant dense<0.000000e+00> : vector<2x32xf32>
    %193 = tpu.matmul %187, %192, %cst_195 {dimension_numbers = #tpu.dot_dimension_numbers<[1], [0], [0], [1], [0, 0, 1, 1], [], []>} : vector<2x32xf32>, vector<32x32xf32>, vector<2x32xf32> -> vector<2x32xf32>
    %194 = arith.addf %185, %187 : vector<2x32xf32>
    %c8_196 = arith.constant 8 : index
    %c0_197 = arith.constant 0 : index
    %c0_198 = arith.constant 0 : index
    %195 = vector.load %arg5[%c8_196, %c0_197, %c0_198] : memref<16x32x32xf32, #tpu.memory_space<vmem>>, vector<1x32x32xf32>
    %196 = vector.shape_cast %195 : vector<1x32x32xf32> to vector<32x32xf32>
    %cst_199 = arith.constant dense<0.000000e+00> : vector<2x32xf32>
    %197 = tpu.matmul %194, %196, %cst_199 {dimension_numbers = #tpu.dot_dimension_numbers<[1], [0], [0], [1], [0, 0, 1, 1], [], []>} : vector<2x32xf32>, vector<32x32xf32>, vector<2x32xf32> -> vector<2x32xf32>
    %198 = arith.subf %190, %193 : vector<2x32xf32>
    %c8_200 = arith.constant 8 : index
    %c0_201 = arith.constant 0 : index
    %c0_202 = arith.constant 0 : index
    %199 = vector.load %arg6[%c8_200, %c0_201, %c0_202] : memref<16x2x32xf32, #tpu.memory_space<vmem>>, vector<1x2x32xf32>
    %200 = vector.shape_cast %199 : vector<1x2x32xf32> to vector<2x32xf32>
    %201 = vector.shape_cast %198 : vector<2x32xf32> to vector<1x2x32xf32>
    tpu.vector_store %arg6[%c8_200, %c0_201, %c0_202], %201 {strides = array<i32>} : memref<16x2x32xf32, #tpu.memory_space<vmem>>, vector<1x2x32xf32>,
    %202 = arith.subf %197, %190 : vector<2x32xf32>
    %203 = arith.subf %202, %193 : vector<2x32xf32>
    %c8_203 = arith.constant 8 : index
    %c0_204 = arith.constant 0 : index
    %c0_205 = arith.constant 0 : index
    %204 = vector.load %arg7[%c8_203, %c0_204, %c0_205] : memref<16x2x32xf32, #tpu.memory_space<vmem>>, vector<1x2x32xf32>
    %205 = vector.shape_cast %204 : vector<1x2x32xf32> to vector<2x32xf32>
    %206 = vector.shape_cast %203 : vector<2x32xf32> to vector<1x2x32xf32>
    tpu.vector_store %arg7[%c8_203, %c0_204, %c0_205], %206 {strides = array<i32>} : memref<16x2x32xf32, #tpu.memory_space<vmem>>, vector<1x2x32xf32>,
    %c9 = arith.constant 9 : index
    %c0_206 = arith.constant 0 : index
    %c0_207 = arith.constant 0 : index
    %207 = vector.load %arg1[%c9, %c0_206, %c0_207] : memref<16x2x32xf32, #tpu.memory_space<vmem>>, vector<1x2x32xf32>
    %208 = vector.shape_cast %207 : vector<1x2x32xf32> to vector<2x32xf32>
    %c9_208 = arith.constant 9 : index
    %c0_209 = arith.constant 0 : index
    %c0_210 = arith.constant 0 : index
    %209 = vector.load %arg2[%c9_208, %c0_209, %c0_210] : memref<16x2x32xf32, #tpu.memory_space<vmem>>, vector<1x2x32xf32>
    %210 = vector.shape_cast %209 : vector<1x2x32xf32> to vector<2x32xf32>
    %c9_211 = arith.constant 9 : index
    %c0_212 = arith.constant 0 : index
    %c0_213 = arith.constant 0 : index
    %211 = vector.load %arg3[%c9_211, %c0_212, %c0_213] : memref<16x32x32xf32, #tpu.memory_space<vmem>>, vector<1x32x32xf32>
    %212 = vector.shape_cast %211 : vector<1x32x32xf32> to vector<32x32xf32>
    %cst_214 = arith.constant dense<0.000000e+00> : vector<2x32xf32>
    %213 = tpu.matmul %208, %212, %cst_214 {dimension_numbers = #tpu.dot_dimension_numbers<[1], [0], [0], [1], [0, 0, 1, 1], [], []>} : vector<2x32xf32>, vector<32x32xf32>, vector<2x32xf32> -> vector<2x32xf32>
    %c9_215 = arith.constant 9 : index
    %c0_216 = arith.constant 0 : index
    %c0_217 = arith.constant 0 : index
    %214 = vector.load %arg4[%c9_215, %c0_216, %c0_217] : memref<16x32x32xf32, #tpu.memory_space<vmem>>, vector<1x32x32xf32>
    %215 = vector.shape_cast %214 : vector<1x32x32xf32> to vector<32x32xf32>
    %cst_218 = arith.constant dense<0.000000e+00> : vector<2x32xf32>
    %216 = tpu.matmul %210, %215, %cst_218 {dimension_numbers = #tpu.dot_dimension_numbers<[1], [0], [0], [1], [0, 0, 1, 1], [], []>} : vector<2x32xf32>, vector<32x32xf32>, vector<2x32xf32> -> vector<2x32xf32>
    %217 = arith.addf %208, %210 : vector<2x32xf32>
    %c9_219 = arith.constant 9 : index
    %c0_220 = arith.constant 0 : index
    %c0_221 = arith.constant 0 : index
    %218 = vector.load %arg5[%c9_219, %c0_220, %c0_221] : memref<16x32x32xf32, #tpu.memory_space<vmem>>, vector<1x32x32xf32>
    %219 = vector.shape_cast %218 : vector<1x32x32xf32> to vector<32x32xf32>
    %cst_222 = arith.constant dense<0.000000e+00> : vector<2x32xf32>
    %220 = tpu.matmul %217, %219, %cst_222 {dimension_numbers = #tpu.dot_dimension_numbers<[1], [0], [0], [1], [0, 0, 1, 1], [], []>} : vector<2x32xf32>, vector<32x32xf32>, vector<2x32xf32> -> vector<2x32xf32>
    %221 = arith.subf %213, %216 : vector<2x32xf32>
    %c9_223 = arith.constant 9 : index
    %c0_224 = arith.constant 0 : index
    %c0_225 = arith.constant 0 : index
    %222 = vector.load %arg6[%c9_223, %c0_224, %c0_225] : memref<16x2x32xf32, #tpu.memory_space<vmem>>, vector<1x2x32xf32>
    %223 = vector.shape_cast %222 : vector<1x2x32xf32> to vector<2x32xf32>
    %224 = vector.shape_cast %221 : vector<2x32xf32> to vector<1x2x32xf32>
    tpu.vector_store %arg6[%c9_223, %c0_224, %c0_225], %224 {strides = array<i32>} : memref<16x2x32xf32, #tpu.memory_space<vmem>>, vector<1x2x32xf32>,
    %225 = arith.subf %220, %213 : vector<2x32xf32>
    %226 = arith.subf %225, %216 : vector<2x32xf32>
    %c9_226 = arith.constant 9 : index
    %c0_227 = arith.constant 0 : index
    %c0_228 = arith.constant 0 : index
    %227 = vector.load %arg7[%c9_226, %c0_227, %c0_228] : memref<16x2x32xf32, #tpu.memory_space<vmem>>, vector<1x2x32xf32>
    %228 = vector.shape_cast %227 : vector<1x2x32xf32> to vector<2x32xf32>
    %229 = vector.shape_cast %226 : vector<2x32xf32> to vector<1x2x32xf32>
    tpu.vector_store %arg7[%c9_226, %c0_227, %c0_228], %229 {strides = array<i32>} : memref<16x2x32xf32, #tpu.memory_space<vmem>>, vector<1x2x32xf32>,
    %c10 = arith.constant 10 : index
    %c0_229 = arith.constant 0 : index
    %c0_230 = arith.constant 0 : index
    %230 = vector.load %arg1[%c10, %c0_229, %c0_230] : memref<16x2x32xf32, #tpu.memory_space<vmem>>, vector<1x2x32xf32>
    %231 = vector.shape_cast %230 : vector<1x2x32xf32> to vector<2x32xf32>
    %c10_231 = arith.constant 10 : index
    %c0_232 = arith.constant 0 : index
    %c0_233 = arith.constant 0 : index
    %232 = vector.load %arg2[%c10_231, %c0_232, %c0_233] : memref<16x2x32xf32, #tpu.memory_space<vmem>>, vector<1x2x32xf32>
    %233 = vector.shape_cast %232 : vector<1x2x32xf32> to vector<2x32xf32>
    %c10_234 = arith.constant 10 : index
    %c0_235 = arith.constant 0 : index
    %c0_236 = arith.constant 0 : index
    %234 = vector.load %arg3[%c10_234, %c0_235, %c0_236] : memref<16x32x32xf32, #tpu.memory_space<vmem>>, vector<1x32x32xf32>
    %235 = vector.shape_cast %234 : vector<1x32x32xf32> to vector<32x32xf32>
    %cst_237 = arith.constant dense<0.000000e+00> : vector<2x32xf32>
    %236 = tpu.matmul %231, %235, %cst_237 {dimension_numbers = #tpu.dot_dimension_numbers<[1], [0], [0], [1], [0, 0, 1, 1], [], []>} : vector<2x32xf32>, vector<32x32xf32>, vector<2x32xf32> -> vector<2x32xf32>
    %c10_238 = arith.constant 10 : index
    %c0_239 = arith.constant 0 : index
    %c0_240 = arith.constant 0 : index
    %237 = vector.load %arg4[%c10_238, %c0_239, %c0_240] : memref<16x32x32xf32, #tpu.memory_space<vmem>>, vector<1x32x32xf32>
    %238 = vector.shape_cast %237 : vector<1x32x32xf32> to vector<32x32xf32>
    %cst_241 = arith.constant dense<0.000000e+00> : vector<2x32xf32>
    %239 = tpu.matmul %233, %238, %cst_241 {dimension_numbers = #tpu.dot_dimension_numbers<[1], [0], [0], [1], [0, 0, 1, 1], [], []>} : vector<2x32xf32>, vector<32x32xf32>, vector<2x32xf32> -> vector<2x32xf32>
    %240 = arith.addf %231, %233 : vector<2x32xf32>
    %c10_242 = arith.constant 10 : index
    %c0_243 = arith.constant 0 : index
    %c0_244 = arith.constant 0 : index
    %241 = vector.load %arg5[%c10_242, %c0_243, %c0_244] : memref<16x32x32xf32, #tpu.memory_space<vmem>>, vector<1x32x32xf32>
    %242 = vector.shape_cast %241 : vector<1x32x32xf32> to vector<32x32xf32>
    %cst_245 = arith.constant dense<0.000000e+00> : vector<2x32xf32>
    %243 = tpu.matmul %240, %242, %cst_245 {dimension_numbers = #tpu.dot_dimension_numbers<[1], [0], [0], [1], [0, 0, 1, 1], [], []>} : vector<2x32xf32>, vector<32x32xf32>, vector<2x32xf32> -> vector<2x32xf32>
    %244 = arith.subf %236, %239 : vector<2x32xf32>
    %c10_246 = arith.constant 10 : index
    %c0_247 = arith.constant 0 : index
    %c0_248 = arith.constant 0 : index
    %245 = vector.load %arg6[%c10_246, %c0_247, %c0_248] : memref<16x2x32xf32, #tpu.memory_space<vmem>>, vector<1x2x32xf32>
    %246 = vector.shape_cast %245 : vector<1x2x32xf32> to vector<2x32xf32>
    %247 = vector.shape_cast %244 : vector<2x32xf32> to vector<1x2x32xf32>
    tpu.vector_store %arg6[%c10_246, %c0_247, %c0_248], %247 {strides = array<i32>} : memref<16x2x32xf32, #tpu.memory_space<vmem>>, vector<1x2x32xf32>,
    %248 = arith.subf %243, %236 : vector<2x32xf32>
    %249 = arith.subf %248, %239 : vector<2x32xf32>
    %c10_249 = arith.constant 10 : index
    %c0_250 = arith.constant 0 : index
    %c0_251 = arith.constant 0 : index
    %250 = vector.load %arg7[%c10_249, %c0_250, %c0_251] : memref<16x2x32xf32, #tpu.memory_space<vmem>>, vector<1x2x32xf32>
    %251 = vector.shape_cast %250 : vector<1x2x32xf32> to vector<2x32xf32>
    %252 = vector.shape_cast %249 : vector<2x32xf32> to vector<1x2x32xf32>
    tpu.vector_store %arg7[%c10_249, %c0_250, %c0_251], %252 {strides = array<i32>} : memref<16x2x32xf32, #tpu.memory_space<vmem>>, vector<1x2x32xf32>,
    %c11 = arith.constant 11 : index
    %c0_252 = arith.constant 0 : index
    %c0_253 = arith.constant 0 : index
    %253 = vector.load %arg1[%c11, %c0_252, %c0_253] : memref<16x2x32xf32, #tpu.memory_space<vmem>>, vector<1x2x32xf32>
    %254 = vector.shape_cast %253 : vector<1x2x32xf32> to vector<2x32xf32>
    %c11_254 = arith.constant 11 : index
    %c0_255 = arith.constant 0 : index
    %c0_256 = arith.constant 0 : index
    %255 = vector.load %arg2[%c11_254, %c0_255, %c0_256] : memref<16x2x32xf32, #tpu.memory_space<vmem>>, vector<1x2x32xf32>
    %256 = vector.shape_cast %255 : vector<1x2x32xf32> to vector<2x32xf32>
    %c11_257 = arith.constant 11 : index
    %c0_258 = arith.constant 0 : index
    %c0_259 = arith.constant 0 : index
    %257 = vector.load %arg3[%c11_257, %c0_258, %c0_259] : memref<16x32x32xf32, #tpu.memory_space<vmem>>, vector<1x32x32xf32>
    %258 = vector.shape_cast %257 : vector<1x32x32xf32> to vector<32x32xf32>
    %cst_260 = arith.constant dense<0.000000e+00> : vector<2x32xf32>
    %259 = tpu.matmul %254, %258, %cst_260 {dimension_numbers = #tpu.dot_dimension_numbers<[1], [0], [0], [1], [0, 0, 1, 1], [], []>} : vector<2x32xf32>, vector<32x32xf32>, vector<2x32xf32> -> vector<2x32xf32>
    %c11_261 = arith.constant 11 : index
    %c0_262 = arith.constant 0 : index
    %c0_263 = arith.constant 0 : index
    %260 = vector.load %arg4[%c11_261, %c0_262, %c0_263] : memref<16x32x32xf32, #tpu.memory_space<vmem>>, vector<1x32x32xf32>
    %261 = vector.shape_cast %260 : vector<1x32x32xf32> to vector<32x32xf32>
    %cst_264 = arith.constant dense<0.000000e+00> : vector<2x32xf32>
    %262 = tpu.matmul %256, %261, %cst_264 {dimension_numbers = #tpu.dot_dimension_numbers<[1], [0], [0], [1], [0, 0, 1, 1], [], []>} : vector<2x32xf32>, vector<32x32xf32>, vector<2x32xf32> -> vector<2x32xf32>
    %263 = arith.addf %254, %256 : vector<2x32xf32>
    %c11_265 = arith.constant 11 : index
    %c0_266 = arith.constant 0 : index
    %c0_267 = arith.constant 0 : index
    %264 = vector.load %arg5[%c11_265, %c0_266, %c0_267] : memref<16x32x32xf32, #tpu.memory_space<vmem>>, vector<1x32x32xf32>
    %265 = vector.shape_cast %264 : vector<1x32x32xf32> to vector<32x32xf32>
    %cst_268 = arith.constant dense<0.000000e+00> : vector<2x32xf32>
    %266 = tpu.matmul %263, %265, %cst_268 {dimension_numbers = #tpu.dot_dimension_numbers<[1], [0], [0], [1], [0, 0, 1, 1], [], []>} : vector<2x32xf32>, vector<32x32xf32>, vector<2x32xf32> -> vector<2x32xf32>
    %267 = arith.subf %259, %262 : vector<2x32xf32>
    %c11_269 = arith.constant 11 : index
    %c0_270 = arith.constant 0 : index
    %c0_271 = arith.constant 0 : index
    %268 = vector.load %arg6[%c11_269, %c0_270, %c0_271] : memref<16x2x32xf32, #tpu.memory_space<vmem>>, vector<1x2x32xf32>
    %269 = vector.shape_cast %268 : vector<1x2x32xf32> to vector<2x32xf32>
    %270 = vector.shape_cast %267 : vector<2x32xf32> to vector<1x2x32xf32>
    tpu.vector_store %arg6[%c11_269, %c0_270, %c0_271], %270 {strides = array<i32>} : memref<16x2x32xf32, #tpu.memory_space<vmem>>, vector<1x2x32xf32>,
    %271 = arith.subf %266, %259 : vector<2x32xf32>
    %272 = arith.subf %271, %262 : vector<2x32xf32>
    %c11_272 = arith.constant 11 : index
    %c0_273 = arith.constant 0 : index
    %c0_274 = arith.constant 0 : index
    %273 = vector.load %arg7[%c11_272, %c0_273, %c0_274] : memref<16x2x32xf32, #tpu.memory_space<vmem>>, vector<1x2x32xf32>
    %274 = vector.shape_cast %273 : vector<1x2x32xf32> to vector<2x32xf32>
    %275 = vector.shape_cast %272 : vector<2x32xf32> to vector<1x2x32xf32>
    tpu.vector_store %arg7[%c11_272, %c0_273, %c0_274], %275 {strides = array<i32>} : memref<16x2x32xf32, #tpu.memory_space<vmem>>, vector<1x2x32xf32>,
    %c12 = arith.constant 12 : index
    %c0_275 = arith.constant 0 : index
    %c0_276 = arith.constant 0 : index
    %276 = vector.load %arg1[%c12, %c0_275, %c0_276] : memref<16x2x32xf32, #tpu.memory_space<vmem>>, vector<1x2x32xf32>
    %277 = vector.shape_cast %276 : vector<1x2x32xf32> to vector<2x32xf32>
    %c12_277 = arith.constant 12 : index
    %c0_278 = arith.constant 0 : index
    %c0_279 = arith.constant 0 : index
    %278 = vector.load %arg2[%c12_277, %c0_278, %c0_279] : memref<16x2x32xf32, #tpu.memory_space<vmem>>, vector<1x2x32xf32>
    %279 = vector.shape_cast %278 : vector<1x2x32xf32> to vector<2x32xf32>
    %c12_280 = arith.constant 12 : index
    %c0_281 = arith.constant 0 : index
    %c0_282 = arith.constant 0 : index
    %280 = vector.load %arg3[%c12_280, %c0_281, %c0_282] : memref<16x32x32xf32, #tpu.memory_space<vmem>>, vector<1x32x32xf32>
    %281 = vector.shape_cast %280 : vector<1x32x32xf32> to vector<32x32xf32>
    %cst_283 = arith.constant dense<0.000000e+00> : vector<2x32xf32>
    %282 = tpu.matmul %277, %281, %cst_283 {dimension_numbers = #tpu.dot_dimension_numbers<[1], [0], [0], [1], [0, 0, 1, 1], [], []>} : vector<2x32xf32>, vector<32x32xf32>, vector<2x32xf32> -> vector<2x32xf32>
    %c12_284 = arith.constant 12 : index
    %c0_285 = arith.constant 0 : index
    %c0_286 = arith.constant 0 : index
    %283 = vector.load %arg4[%c12_284, %c0_285, %c0_286] : memref<16x32x32xf32, #tpu.memory_space<vmem>>, vector<1x32x32xf32>
    %284 = vector.shape_cast %283 : vector<1x32x32xf32> to vector<32x32xf32>
    %cst_287 = arith.constant dense<0.000000e+00> : vector<2x32xf32>
    %285 = tpu.matmul %279, %284, %cst_287 {dimension_numbers = #tpu.dot_dimension_numbers<[1], [0], [0], [1], [0, 0, 1, 1], [], []>} : vector<2x32xf32>, vector<32x32xf32>, vector<2x32xf32> -> vector<2x32xf32>
    %286 = arith.addf %277, %279 : vector<2x32xf32>
    %c12_288 = arith.constant 12 : index
    %c0_289 = arith.constant 0 : index
    %c0_290 = arith.constant 0 : index
    %287 = vector.load %arg5[%c12_288, %c0_289, %c0_290] : memref<16x32x32xf32, #tpu.memory_space<vmem>>, vector<1x32x32xf32>
    %288 = vector.shape_cast %287 : vector<1x32x32xf32> to vector<32x32xf32>
    %cst_291 = arith.constant dense<0.000000e+00> : vector<2x32xf32>
    %289 = tpu.matmul %286, %288, %cst_291 {dimension_numbers = #tpu.dot_dimension_numbers<[1], [0], [0], [1], [0, 0, 1, 1], [], []>} : vector<2x32xf32>, vector<32x32xf32>, vector<2x32xf32> -> vector<2x32xf32>
    %290 = arith.subf %282, %285 : vector<2x32xf32>
    %c12_292 = arith.constant 12 : index
    %c0_293 = arith.constant 0 : index
    %c0_294 = arith.constant 0 : index
    %291 = vector.load %arg6[%c12_292, %c0_293, %c0_294] : memref<16x2x32xf32, #tpu.memory_space<vmem>>, vector<1x2x32xf32>
    %292 = vector.shape_cast %291 : vector<1x2x32xf32> to vector<2x32xf32>
    %293 = vector.shape_cast %290 : vector<2x32xf32> to vector<1x2x32xf32>
    tpu.vector_store %arg6[%c12_292, %c0_293, %c0_294], %293 {strides = array<i32>} : memref<16x2x32xf32, #tpu.memory_space<vmem>>, vector<1x2x32xf32>,
    %294 = arith.subf %289, %282 : vector<2x32xf32>
    %295 = arith.subf %294, %285 : vector<2x32xf32>
    %c12_295 = arith.constant 12 : index
    %c0_296 = arith.constant 0 : index
    %c0_297 = arith.constant 0 : index
    %296 = vector.load %arg7[%c12_295, %c0_296, %c0_297] : memref<16x2x32xf32, #tpu.memory_space<vmem>>, vector<1x2x32xf32>
    %297 = vector.shape_cast %296 : vector<1x2x32xf32> to vector<2x32xf32>
    %298 = vector.shape_cast %295 : vector<2x32xf32> to vector<1x2x32xf32>
    tpu.vector_store %arg7[%c12_295, %c0_296, %c0_297], %298 {strides = array<i32>} : memref<16x2x32xf32, #tpu.memory_space<vmem>>, vector<1x2x32xf32>,
    %c13 = arith.constant 13 : index
    %c0_298 = arith.constant 0 : index
    %c0_299 = arith.constant 0 : index
    %299 = vector.load %arg1[%c13, %c0_298, %c0_299] : memref<16x2x32xf32, #tpu.memory_space<vmem>>, vector<1x2x32xf32>
    %300 = vector.shape_cast %299 : vector<1x2x32xf32> to vector<2x32xf32>
    %c13_300 = arith.constant 13 : index
    %c0_301 = arith.constant 0 : index
    %c0_302 = arith.constant 0 : index
    %301 = vector.load %arg2[%c13_300, %c0_301, %c0_302] : memref<16x2x32xf32, #tpu.memory_space<vmem>>, vector<1x2x32xf32>
    %302 = vector.shape_cast %301 : vector<1x2x32xf32> to vector<2x32xf32>
    %c13_303 = arith.constant 13 : index
    %c0_304 = arith.constant 0 : index
    %c0_305 = arith.constant 0 : index
    %303 = vector.load %arg3[%c13_303, %c0_304, %c0_305] : memref<16x32x32xf32, #tpu.memory_space<vmem>>, vector<1x32x32xf32>
    %304 = vector.shape_cast %303 : vector<1x32x32xf32> to vector<32x32xf32>
    %cst_306 = arith.constant dense<0.000000e+00> : vector<2x32xf32>
    %305 = tpu.matmul %300, %304, %cst_306 {dimension_numbers = #tpu.dot_dimension_numbers<[1], [0], [0], [1], [0, 0, 1, 1], [], []>} : vector<2x32xf32>, vector<32x32xf32>, vector<2x32xf32> -> vector<2x32xf32>
    %c13_307 = arith.constant 13 : index
    %c0_308 = arith.constant 0 : index
    %c0_309 = arith.constant 0 : index
    %306 = vector.load %arg4[%c13_307, %c0_308, %c0_309] : memref<16x32x32xf32, #tpu.memory_space<vmem>>, vector<1x32x32xf32>
    %307 = vector.shape_cast %306 : vector<1x32x32xf32> to vector<32x32xf32>
    %cst_310 = arith.constant dense<0.000000e+00> : vector<2x32xf32>
    %308 = tpu.matmul %302, %307, %cst_310 {dimension_numbers = #tpu.dot_dimension_numbers<[1], [0], [0], [1], [0, 0, 1, 1], [], []>} : vector<2x32xf32>, vector<32x32xf32>, vector<2x32xf32> -> vector<2x32xf32>
    %309 = arith.addf %300, %302 : vector<2x32xf32>
    %c13_311 = arith.constant 13 : index
    %c0_312 = arith.constant 0 : index
    %c0_313 = arith.constant 0 : index
    %310 = vector.load %arg5[%c13_311, %c0_312, %c0_313] : memref<16x32x32xf32, #tpu.memory_space<vmem>>, vector<1x32x32xf32>
    %311 = vector.shape_cast %310 : vector<1x32x32xf32> to vector<32x32xf32>
    %cst_314 = arith.constant dense<0.000000e+00> : vector<2x32xf32>
    %312 = tpu.matmul %309, %311, %cst_314 {dimension_numbers = #tpu.dot_dimension_numbers<[1], [0], [0], [1], [0, 0, 1, 1], [], []>} : vector<2x32xf32>, vector<32x32xf32>, vector<2x32xf32> -> vector<2x32xf32>
    %313 = arith.subf %305, %308 : vector<2x32xf32>
    %c13_315 = arith.constant 13 : index
    %c0_316 = arith.constant 0 : index
    %c0_317 = arith.constant 0 : index
    %314 = vector.load %arg6[%c13_315, %c0_316, %c0_317] : memref<16x2x32xf32, #tpu.memory_space<vmem>>, vector<1x2x32xf32>
    %315 = vector.shape_cast %314 : vector<1x2x32xf32> to vector<2x32xf32>
    %316 = vector.shape_cast %313 : vector<2x32xf32> to vector<1x2x32xf32>
    tpu.vector_store %arg6[%c13_315, %c0_316, %c0_317], %316 {strides = array<i32>} : memref<16x2x32xf32, #tpu.memory_space<vmem>>, vector<1x2x32xf32>,
    %317 = arith.subf %312, %305 : vector<2x32xf32>
    %318 = arith.subf %317, %308 : vector<2x32xf32>
    %c13_318 = arith.constant 13 : index
    %c0_319 = arith.constant 0 : index
    %c0_320 = arith.constant 0 : index
    %319 = vector.load %arg7[%c13_318, %c0_319, %c0_320] : memref<16x2x32xf32, #tpu.memory_space<vmem>>, vector<1x2x32xf32>
    %320 = vector.shape_cast %319 : vector<1x2x32xf32> to vector<2x32xf32>
    %321 = vector.shape_cast %318 : vector<2x32xf32> to vector<1x2x32xf32>
    tpu.vector_store %arg7[%c13_318, %c0_319, %c0_320], %321 {strides = array<i32>} : memref<16x2x32xf32, #tpu.memory_space<vmem>>, vector<1x2x32xf32>,
    %c14 = arith.constant 14 : index
    %c0_321 = arith.constant 0 : index
    %c0_322 = arith.constant 0 : index
    %322 = vector.load %arg1[%c14, %c0_321, %c0_322] : memref<16x2x32xf32, #tpu.memory_space<vmem>>, vector<1x2x32xf32>
    %323 = vector.shape_cast %322 : vector<1x2x32xf32> to vector<2x32xf32>
    %c14_323 = arith.constant 14 : index
    %c0_324 = arith.constant 0 : index
    %c0_325 = arith.constant 0 : index
    %324 = vector.load %arg2[%c14_323, %c0_324, %c0_325] : memref<16x2x32xf32, #tpu.memory_space<vmem>>, vector<1x2x32xf32>
    %325 = vector.shape_cast %324 : vector<1x2x32xf32> to vector<2x32xf32>
    %c14_326 = arith.constant 14 : index
    %c0_327 = arith.constant 0 : index
    %c0_328 = arith.constant 0 : index
    %326 = vector.load %arg3[%c14_326, %c0_327, %c0_328] : memref<16x32x32xf32, #tpu.memory_space<vmem>>, vector<1x32x32xf32>
    %327 = vector.shape_cast %326 : vector<1x32x32xf32> to vector<32x32xf32>
    %cst_329 = arith.constant dense<0.000000e+00> : vector<2x32xf32>
    %328 = tpu.matmul %323, %327, %cst_329 {dimension_numbers = #tpu.dot_dimension_numbers<[1], [0], [0], [1], [0, 0, 1, 1], [], []>} : vector<2x32xf32>, vector<32x32xf32>, vector<2x32xf32> -> vector<2x32xf32>
    %c14_330 = arith.constant 14 : index
    %c0_331 = arith.constant 0 : index
    %c0_332 = arith.constant 0 : index
    %329 = vector.load %arg4[%c14_330, %c0_331, %c0_332] : memref<16x32x32xf32, #tpu.memory_space<vmem>>, vector<1x32x32xf32>
    %330 = vector.shape_cast %329 : vector<1x32x32xf32> to vector<32x32xf32>
    %cst_333 = arith.constant dense<0.000000e+00> : vector<2x32xf32>
    %331 = tpu.matmul %325, %330, %cst_333 {dimension_numbers = #tpu.dot_dimension_numbers<[1], [0], [0], [1], [0, 0, 1, 1], [], []>} : vector<2x32xf32>, vector<32x32xf32>, vector<2x32xf32> -> vector<2x32xf32>
    %332 = arith.addf %323, %325 : vector<2x32xf32>
    %c14_334 = arith.constant 14 : index
    %c0_335 = arith.constant 0 : index
    %c0_336 = arith.constant 0 : index
    %333 = vector.load %arg5[%c14_334, %c0_335, %c0_336] : memref<16x32x32xf32, #tpu.memory_space<vmem>>, vector<1x32x32xf32>
    %334 = vector.shape_cast %333 : vector<1x32x32xf32> to vector<32x32xf32>
    %cst_337 = arith.constant dense<0.000000e+00> : vector<2x32xf32>
    %335 = tpu.matmul %332, %334, %cst_337 {dimension_numbers = #tpu.dot_dimension_numbers<[1], [0], [0], [1], [0, 0, 1, 1], [], []>} : vector<2x32xf32>, vector<32x32xf32>, vector<2x32xf32> -> vector<2x32xf32>
    %336 = arith.subf %328, %331 : vector<2x32xf32>
    %c14_338 = arith.constant 14 : index
    %c0_339 = arith.constant 0 : index
    %c0_340 = arith.constant 0 : index
    %337 = vector.load %arg6[%c14_338, %c0_339, %c0_340] : memref<16x2x32xf32, #tpu.memory_space<vmem>>, vector<1x2x32xf32>
    %338 = vector.shape_cast %337 : vector<1x2x32xf32> to vector<2x32xf32>
    %339 = vector.shape_cast %336 : vector<2x32xf32> to vector<1x2x32xf32>
    tpu.vector_store %arg6[%c14_338, %c0_339, %c0_340], %339 {strides = array<i32>} : memref<16x2x32xf32, #tpu.memory_space<vmem>>, vector<1x2x32xf32>,
    %340 = arith.subf %335, %328 : vector<2x32xf32>
    %341 = arith.subf %340, %331 : vector<2x32xf32>
    %c14_341 = arith.constant 14 : index
    %c0_342 = arith.constant 0 : index
    %c0_343 = arith.constant 0 : index
    %342 = vector.load %arg7[%c14_341, %c0_342, %c0_343] : memref<16x2x32xf32, #tpu.memory_space<vmem>>, vector<1x2x32xf32>
    %343 = vector.shape_cast %342 : vector<1x2x32xf32> to vector<2x32xf32>
    %344 = vector.shape_cast %341 : vector<2x32xf32> to vector<1x2x32xf32>
    tpu.vector_store %arg7[%c14_341, %c0_342, %c0_343], %344 {strides = array<i32>} : memref<16x2x32xf32, #tpu.memory_space<vmem>>, vector<1x2x32xf32>,
    %c15 = arith.constant 15 : index
    %c0_344 = arith.constant 0 : index
    %c0_345 = arith.constant 0 : index
    %345 = vector.load %arg1[%c15, %c0_344, %c0_345] : memref<16x2x32xf32, #tpu.memory_space<vmem>>, vector<1x2x32xf32>
    %346 = vector.shape_cast %345 : vector<1x2x32xf32> to vector<2x32xf32>
    %c15_346 = arith.constant 15 : index
    %c0_347 = arith.constant 0 : index
    %c0_348 = arith.constant 0 : index
    %347 = vector.load %arg2[%c15_346, %c0_347, %c0_348] : memref<16x2x32xf32, #tpu.memory_space<vmem>>, vector<1x2x32xf32>
    %348 = vector.shape_cast %347 : vector<1x2x32xf32> to vector<2x32xf32>
    %c15_349 = arith.constant 15 : index
    %c0_350 = arith.constant 0 : index
    %c0_351 = arith.constant 0 : index
    %349 = vector.load %arg3[%c15_349, %c0_350, %c0_351] : memref<16x32x32xf32, #tpu.memory_space<vmem>>, vector<1x32x32xf32>
    %350 = vector.shape_cast %349 : vector<1x32x32xf32> to vector<32x32xf32>
    %cst_352 = arith.constant dense<0.000000e+00> : vector<2x32xf32>
    %351 = tpu.matmul %346, %350, %cst_352 {dimension_numbers = #tpu.dot_dimension_numbers<[1], [0], [0], [1], [0, 0, 1, 1], [], []>} : vector<2x32xf32>, vector<32x32xf32>, vector<2x32xf32> -> vector<2x32xf32>
    %c15_353 = arith.constant 15 : index
    %c0_354 = arith.constant 0 : index
    %c0_355 = arith.constant 0 : index
    %352 = vector.load %arg4[%c15_353, %c0_354, %c0_355] : memref<16x32x32xf32, #tpu.memory_space<vmem>>, vector<1x32x32xf32>
    %353 = vector.shape_cast %352 : vector<1x32x32xf32> to vector<32x32xf32>
    %cst_356 = arith.constant dense<0.000000e+00> : vector<2x32xf32>
    %354 = tpu.matmul %348, %353, %cst_356 {dimension_numbers = #tpu.dot_dimension_numbers<[1], [0], [0], [1], [0, 0, 1, 1], [], []>} : vector<2x32xf32>, vector<32x32xf32>, vector<2x32xf32> -> vector<2x32xf32>
    %355 = arith.addf %346, %348 : vector<2x32xf32>
    %c15_357 = arith.constant 15 : index
    %c0_358 = arith.constant 0 : index
    %c0_359 = arith.constant 0 : index
    %356 = vector.load %arg5[%c15_357, %c0_358, %c0_359] : memref<16x32x32xf32, #tpu.memory_space<vmem>>, vector<1x32x32xf32>
    %357 = vector.shape_cast %356 : vector<1x32x32xf32> to vector<32x32xf32>
    %cst_360 = arith.constant dense<0.000000e+00> : vector<2x32xf32>
    %358 = tpu.matmul %355, %357, %cst_360 {dimension_numbers = #tpu.dot_dimension_numbers<[1], [0], [0], [1], [0, 0, 1, 1], [], []>} : vector<2x32xf32>, vector<32x32xf32>, vector<2x32xf32> -> vector<2x32xf32>
    %359 = arith.subf %351, %354 : vector<2x32xf32>
    %c15_361 = arith.constant 15 : index
    %c0_362 = arith.constant 0 : index
    %c0_363 = arith.constant 0 : index
    %360 = vector.load %arg6[%c15_361, %c0_362, %c0_363] : memref<16x2x32xf32, #tpu.memory_space<vmem>>, vector<1x2x32xf32>
    %361 = vector.shape_cast %360 : vector<1x2x32xf32> to vector<2x32xf32>
    %362 = vector.shape_cast %359 : vector<2x32xf32> to vector<1x2x32xf32>
    tpu.vector_store %arg6[%c15_361, %c0_362, %c0_363], %362 {strides = array<i32>} : memref<16x2x32xf32, #tpu.memory_space<vmem>>, vector<1x2x32xf32>,
    %363 = arith.subf %358, %351 : vector<2x32xf32>
    %364 = arith.subf %363, %354 : vector<2x32xf32>
    %c15_364 = arith.constant 15 : index
    %c0_365 = arith.constant 0 : index
    %c0_366 = arith.constant 0 : index
    %365 = vector.load %arg7[%c15_364, %c0_365, %c0_366] : memref<16x2x32xf32, #tpu.memory_space<vmem>>, vector<1x2x32xf32>
    %366 = vector.shape_cast %365 : vector<1x2x32xf32> to vector<2x32xf32>
    %367 = vector.shape_cast %364 : vector<2x32xf32> to vector<1x2x32xf32>
    tpu.vector_store %arg7[%c15_364, %c0_365, %c0_366], %367 {strides = array<i32>} : memref<16x2x32xf32, #tpu.memory_space<vmem>>, vector<1x2x32xf32>,
    return
  }
  func.func @transform_0(%arg0: i32) -> (i32, i32, i32) {
    %c0_i32 = arith.constant 0 : i32
    %c0_i32_0 = arith.constant 0 : i32
    %c0_i32_1 = arith.constant 0 : i32
    return %arg0, %c0_i32, %c0_i32_0 : i32, i32, i32
  }
  func.func @transform_1(%arg0: i32) -> (i32, i32, i32) {
    %c0_i32 = arith.constant 0 : i32
    %c0_i32_0 = arith.constant 0 : i32
    %c0_i32_1 = arith.constant 0 : i32
    return %arg0, %c0_i32, %c0_i32_0 : i32, i32, i32
  }
  func.func @transform_2(%arg0: i32) -> (i32, i32, i32) {
    %c0_i32 = arith.constant 0 : i32
    %c0_i32_0 = arith.constant 0 : i32
    %c0_i32_1 = arith.constant 0 : i32
    return %arg0, %c0_i32, %c0_i32_0 : i32, i32, i32
  }
  func.func @transform_3(%arg0: i32) -> (i32, i32, i32) {
    %c0_i32 = arith.constant 0 : i32
    %c0_i32_0 = arith.constant 0 : i32
    %c0_i32_1 = arith.constant 0 : i32
    return %arg0, %c0_i32, %c0_i32_0 : i32, i32, i32
  }
  func.func @transform_4(%arg0: i32) -> (i32, i32, i32) {
    %c0_i32 = arith.constant 0 : i32
    %c0_i32_0 = arith.constant 0 : i32
    %c0_i32_1 = arith.constant 0 : i32
    return %arg0, %c0_i32, %c0_i32_0 : i32, i32, i32
  }
  func.func @transform_5(%arg0: i32) -> (i32, i32, i32) {
    %c0_i32 = arith.constant 0 : i32
    %c0_i32_0 = arith.constant 0 : i32
    %c0_i32_1 = arith.constant 0 : i32
    return %arg0, %c0_i32, %c0_i32_0 : i32, i32, i32
  }
  func.func @transform_6(%arg0: i32) -> (i32, i32, i32) {
    %c0_i32 = arith.constant 0 : i32
    %c0_i32_0 = arith.constant 0 : i32
    %c0_i32_1 = arith.constant 0 : i32
    return %arg0, %c0_i32, %c0_i32_0 : i32, i32, i32
  }
}

module attributes {stable_mosaic.version = 11 : i64} {
  func.func @_mm_kernel(%arg0: i32, %arg1: memref<128x128xf32, #tpu.memory_space<vmem>>, %arg2: memref<128x128xf32, #tpu.memory_space<vmem>>, %arg3: memref<1x128xf32, #tpu.memory_space<vmem>>, %arg4: memref<128x128xf32, #tpu.memory_space<vmem>>, %arg5: memref<128x128xf32, #tpu.memory_space<vmem>>) attributes {dimension_semantics = [#tpu.dimension_semantics<parallel>], iteration_bounds = array<i64: 1>, scalar_prefetch = 0 : i64, scratch_operands = 0 : i64, tpu.core_type = #tpu.core_type<tc>, window_params = [{transform_indices = @transform_0, window_bounds = array<i64: 128, 128>}, {pipeline_mode = #tpu.pipeline_mode<synchronous>, transform_indices = @transform_1, window_bounds = array<i64: 128, 128>}, {pipeline_mode = #tpu.pipeline_mode<synchronous>, transform_indices = @transform_2, window_bounds = array<i64: 1, 128>}, {transform_indices = @transform_3, window_bounds = array<i64: 128, 128>}, {transform_indices = @transform_4, window_bounds = array<i64: 128, 128>}]} {
    %c0 = arith.constant 0 : index
    %c0_0 = arith.constant 0 : index
    %0 = vector.load %arg1[%c0, %c0_0] : memref<128x128xf32, #tpu.memory_space<vmem>>, vector<128x128xf32>
    %c0_1 = arith.constant 0 : index
    %c0_2 = arith.constant 0 : index
    %1 = vector.load %arg2[%c0_1, %c0_2] : memref<128x128xf32, #tpu.memory_space<vmem>>, vector<128x128xf32>
    %cst = arith.constant dense<0.000000e+00> : vector<128x128xf32>
    %2 = tpu.matmul %0, %1, %cst {dimension_numbers = #tpu.dot_dimension_numbers<[1], [0], [0], [1], [0, 0, 1, 1], [], []>} : vector<128x128xf32>, vector<128x128xf32>, vector<128x128xf32> -> vector<128x128xf32>
    %c0_3 = arith.constant 0 : index
    %c0_4 = arith.constant 0 : index
    %3 = vector.load %arg3[%c0_3, %c0_4] : memref<1x128xf32, #tpu.memory_space<vmem>>, vector<1x128xf32>
    %4 = vector.broadcast %3 : vector<1x128xf32> to vector<128x128xf32>
    %5 = arith.addf %2, %4 : vector<128x128xf32>
    %c0_5 = arith.constant 0 : index
    %c0_6 = arith.constant 0 : index
    %6 = vector.load %arg4[%c0_5, %c0_6] : memref<128x128xf32, #tpu.memory_space<vmem>>, vector<128x128xf32>
    %7 = arith.addf %5, %6 : vector<128x128xf32>
    %cst_7 = arith.constant 0.000000e+00 : f32
    %8 = vector.broadcast %cst_7 : f32 to vector<128x128xf32>
    %9 = arith.maximumf %7, %8 : vector<128x128xf32>
    %c0_8 = arith.constant 0 : index
    %c0_9 = arith.constant 0 : index
    %10 = vector.load %arg5[%c0_8, %c0_9] : memref<128x128xf32, #tpu.memory_space<vmem>>, vector<128x128xf32>
    tpu.vector_store %arg5[%c0_8, %c0_9], %9 {strides = array<i32>} : memref<128x128xf32, #tpu.memory_space<vmem>>, vector<128x128xf32>,
    return
  }
  func.func @transform_0(%arg0: i32) -> (i32, i32) {
    %c0_i32 = arith.constant 0 : i32
    %c0_i32_0 = arith.constant 0 : i32
    return %arg0, %c0_i32 : i32, i32
  }
  func.func @transform_1(%arg0: i32) -> (i32, i32) {
    %c0_i32 = arith.constant 0 : i32
    %c0_i32_0 = arith.constant 0 : i32
    %c0_i32_1 = arith.constant 0 : i32
    return %c0_i32, %c0_i32_0 : i32, i32
  }
  func.func @transform_2(%arg0: i32) -> (i32, i32) {
    %c0_i32 = arith.constant 0 : i32
    %c0_i32_0 = arith.constant 0 : i32
    %c0_i32_1 = arith.constant 0 : i32
    return %c0_i32, %c0_i32_0 : i32, i32
  }
  func.func @transform_3(%arg0: i32) -> (i32, i32) {
    %c0_i32 = arith.constant 0 : i32
    %c0_i32_0 = arith.constant 0 : i32
    return %arg0, %c0_i32 : i32, i32
  }
  func.func @transform_4(%arg0: i32) -> (i32, i32) {
    %c0_i32 = arith.constant 0 : i32
    %c0_i32_0 = arith.constant 0 : i32
    return %arg0, %c0_i32 : i32, i32
  }
}

module attributes {stable_mosaic.version = 11 : i64} {
  func.func @_mm_kernel(%arg0: i32, %arg1: memref<128x128xf32, #tpu.memory_space<vmem>>, %arg2: memref<128x128xf32, #tpu.memory_space<vmem>>, %arg3: memref<1x128xf32, #tpu.memory_space<vmem>>, %arg4: memref<128x128xf32, #tpu.memory_space<vmem>>, %arg5: memref<128x128xf32, #tpu.memory_space<vmem>>) attributes {dimension_semantics = [#tpu.dimension_semantics<parallel>], iteration_bounds = array<i64: 1>, scalar_prefetch = 0 : i64, scratch_operands = 0 : i64, tpu.core_type = #tpu.core_type<tc>, window_params = [{transform_indices = @transform_0, window_bounds = array<i64: 128, 128>}, {pipeline_mode = #tpu.pipeline_mode<synchronous>, transform_indices = @transform_1, window_bounds = array<i64: 128, 128>}, {pipeline_mode = #tpu.pipeline_mode<synchronous>, transform_indices = @transform_2, window_bounds = array<i64: 1, 128>}, {transform_indices = @transform_3, window_bounds = array<i64: 128, 128>}, {transform_indices = @transform_4, window_bounds = array<i64: 128, 128>}]} {
    %c0 = arith.constant 0 : index
    %c0_0 = arith.constant 0 : index
    %0 = vector.load %arg1[%c0, %c0_0] : memref<128x128xf32, #tpu.memory_space<vmem>>, vector<128x128xf32>
    %c0_1 = arith.constant 0 : index
    %c0_2 = arith.constant 0 : index
    %1 = vector.load %arg2[%c0_1, %c0_2] : memref<128x128xf32, #tpu.memory_space<vmem>>, vector<128x128xf32>
    %cst = arith.constant dense<0.000000e+00> : vector<128x128xf32>
    %2 = tpu.matmul %0, %1, %cst {dimension_numbers = #tpu.dot_dimension_numbers<[1], [0], [0], [1], [0, 0, 1, 1], [], []>} : vector<128x128xf32>, vector<128x128xf32>, vector<128x128xf32> -> vector<128x128xf32>
    %c0_3 = arith.constant 0 : index
    %c0_4 = arith.constant 0 : index
    %3 = vector.load %arg3[%c0_3, %c0_4] : memref<1x128xf32, #tpu.memory_space<vmem>>, vector<1x128xf32>
    %4 = vector.broadcast %3 : vector<1x128xf32> to vector<128x128xf32>
    %5 = arith.addf %2, %4 : vector<128x128xf32>
    %c0_5 = arith.constant 0 : index
    %c0_6 = arith.constant 0 : index
    %6 = vector.load %arg4[%c0_5, %c0_6] : memref<128x128xf32, #tpu.memory_space<vmem>>, vector<128x128xf32>
    %7 = arith.addf %5, %6 : vector<128x128xf32>
    %c0_7 = arith.constant 0 : index
    %c0_8 = arith.constant 0 : index
    %8 = vector.load %arg5[%c0_7, %c0_8] : memref<128x128xf32, #tpu.memory_space<vmem>>, vector<128x128xf32>
    tpu.vector_store %arg5[%c0_7, %c0_8], %7 {strides = array<i32>} : memref<128x128xf32, #tpu.memory_space<vmem>>, vector<128x128xf32>,
    return
  }
  func.func @transform_0(%arg0: i32) -> (i32, i32) {
    %c0_i32 = arith.constant 0 : i32
    %c0_i32_0 = arith.constant 0 : i32
    return %arg0, %c0_i32 : i32, i32
  }
  func.func @transform_1(%arg0: i32) -> (i32, i32) {
    %c0_i32 = arith.constant 0 : i32
    %c0_i32_0 = arith.constant 0 : i32
    %c0_i32_1 = arith.constant 0 : i32
    return %c0_i32, %c0_i32_0 : i32, i32
  }
  func.func @transform_2(%arg0: i32) -> (i32, i32) {
    %c0_i32 = arith.constant 0 : i32
    %c0_i32_0 = arith.constant 0 : i32
    %c0_i32_1 = arith.constant 0 : i32
    return %c0_i32, %c0_i32_0 : i32, i32
  }
  func.func @transform_3(%arg0: i32) -> (i32, i32) {
    %c0_i32 = arith.constant 0 : i32
    %c0_i32_0 = arith.constant 0 : i32
    return %arg0, %c0_i32 : i32, i32
  }
  func.func @transform_4(%arg0: i32) -> (i32, i32) {
    %c0_i32 = arith.constant 0 : i32
    %c0_i32_0 = arith.constant 0 : i32
    return %arg0, %c0_i32 : i32, i32
  }
}

module attributes {stable_mosaic.version = 11 : i64} {
  func.func @_head_kernel(%arg0: i32, %arg1: memref<128x128xf32, #tpu.memory_space<vmem>>, %arg2: memref<32x128xf32, #tpu.memory_space<vmem>>, %arg3: memref<1x128xf32, #tpu.memory_space<vmem>>, %arg4: memref<128x1xf32, #tpu.memory_space<vmem>>, %arg5: memref<1x1xf32, #tpu.memory_space<vmem>>, %arg6: memref<128x4xf32, #tpu.memory_space<vmem>>) attributes {dimension_semantics = [#tpu.dimension_semantics<parallel>], iteration_bounds = array<i64: 1>, scalar_prefetch = 0 : i64, scratch_operands = 0 : i64, tpu.core_type = #tpu.core_type<tc>, window_params = [{transform_indices = @transform_0, window_bounds = array<i64: 128, 128>}, {pipeline_mode = #tpu.pipeline_mode<synchronous>, transform_indices = @transform_1, window_bounds = array<i64: 32, 128>}, {pipeline_mode = #tpu.pipeline_mode<synchronous>, transform_indices = @transform_2, window_bounds = array<i64: 1, 128>}, {pipeline_mode = #tpu.pipeline_mode<synchronous>, transform_indices = @transform_3, window_bounds = array<i64: 128, 1>}, {pipeline_mode = #tpu.pipeline_mode<synchronous>, transform_indices = @transform_4, window_bounds = array<i64: 1, 1>}, {transform_indices = @transform_5, window_bounds = array<i64: 128, 4>}]} {
    %c0 = arith.constant 0 : index
    %c0_0 = arith.constant 0 : index
    %0 = vector.load %arg1[%c0, %c0_0] : memref<128x128xf32, #tpu.memory_space<vmem>>, vector<128x128xf32>
    %c0_1 = arith.constant 0 : index
    %c0_2 = arith.constant 0 : index
    %1 = vector.load %arg2[%c0_1, %c0_2] : memref<32x128xf32, #tpu.memory_space<vmem>>, vector<32x128xf32>
    %c0_3 = arith.constant 0 : index
    %c0_4 = arith.constant 0 : index
    %2 = vector.load %arg3[%c0_3, %c0_4] : memref<1x128xf32, #tpu.memory_space<vmem>>, vector<1x128xf32>
    %c0_5 = arith.constant 0 : index
    %c0_6 = arith.constant 0 : index
    %3 = vector.load %arg4[%c0_5, %c0_6] : memref<128x1xf32, #tpu.memory_space<vmem>>, vector<128x1xf32>
    %c0_7 = arith.constant 0 : index
    %c0_8 = arith.constant 0 : index
    %4 = vector.load %arg5[%c0_7, %c0_8] : memref<1x1xf32, #tpu.memory_space<vmem>>, vector<1x1xf32>
    %5 = vector.extract_strided_slice %0 {offsets = [0, 0], sizes = [128, 32], strides = [1, 1]} : vector<128x128xf32> to vector<128x32xf32>
    %cst = arith.constant dense<0.000000e+00> : vector<128x128xf32>
    %6 = tpu.matmul %5, %1, %cst {dimension_numbers = #tpu.dot_dimension_numbers<[1], [0], [0], [1], [0, 0, 1, 1], [], []>} : vector<128x32xf32>, vector<32x128xf32>, vector<128x128xf32> -> vector<128x128xf32>
    %7 = vector.broadcast %2 : vector<1x128xf32> to vector<128x128xf32>
    %8 = arith.addf %6, %7 : vector<128x128xf32>
    %cst_9 = arith.constant 0.000000e+00 : f32
    %9 = vector.broadcast %cst_9 : f32 to vector<128x128xf32>
    %10 = arith.maximumf %8, %9 : vector<128x128xf32>
    %cst_10 = arith.constant dense<0.000000e+00> : vector<128x1xf32>
    %11 = tpu.matmul %10, %3, %cst_10 {dimension_numbers = #tpu.dot_dimension_numbers<[1], [0], [0], [1], [0, 0, 1, 1], [], []>} : vector<128x128xf32>, vector<128x1xf32>, vector<128x1xf32> -> vector<128x1xf32>
    %12 = vector.broadcast %4 : vector<1x1xf32> to vector<128x1xf32>
    %13 = arith.addf %11, %12 : vector<128x1xf32>
    %14 = vector.extract_strided_slice %0 {offsets = [0, 32], sizes = [128, 32], strides = [1, 1]} : vector<128x128xf32> to vector<128x32xf32>
    %cst_11 = arith.constant dense<0.000000e+00> : vector<128x128xf32>
    %15 = tpu.matmul %14, %1, %cst_11 {dimension_numbers = #tpu.dot_dimension_numbers<[1], [0], [0], [1], [0, 0, 1, 1], [], []>} : vector<128x32xf32>, vector<32x128xf32>, vector<128x128xf32> -> vector<128x128xf32>
    %16 = vector.broadcast %2 : vector<1x128xf32> to vector<128x128xf32>
    %17 = arith.addf %15, %16 : vector<128x128xf32>
    %cst_12 = arith.constant 0.000000e+00 : f32
    %18 = vector.broadcast %cst_12 : f32 to vector<128x128xf32>
    %19 = arith.maximumf %17, %18 : vector<128x128xf32>
    %cst_13 = arith.constant dense<0.000000e+00> : vector<128x1xf32>
    %20 = tpu.matmul %19, %3, %cst_13 {dimension_numbers = #tpu.dot_dimension_numbers<[1], [0], [0], [1], [0, 0, 1, 1], [], []>} : vector<128x128xf32>, vector<128x1xf32>, vector<128x1xf32> -> vector<128x1xf32>
    %21 = vector.broadcast %4 : vector<1x1xf32> to vector<128x1xf32>
    %22 = arith.addf %20, %21 : vector<128x1xf32>
    %23 = vector.extract_strided_slice %0 {offsets = [0, 64], sizes = [128, 32], strides = [1, 1]} : vector<128x128xf32> to vector<128x32xf32>
    %cst_14 = arith.constant dense<0.000000e+00> : vector<128x128xf32>
    %24 = tpu.matmul %23, %1, %cst_14 {dimension_numbers = #tpu.dot_dimension_numbers<[1], [0], [0], [1], [0, 0, 1, 1], [], []>} : vector<128x32xf32>, vector<32x128xf32>, vector<128x128xf32> -> vector<128x128xf32>
    %25 = vector.broadcast %2 : vector<1x128xf32> to vector<128x128xf32>
    %26 = arith.addf %24, %25 : vector<128x128xf32>
    %cst_15 = arith.constant 0.000000e+00 : f32
    %27 = vector.broadcast %cst_15 : f32 to vector<128x128xf32>
    %28 = arith.maximumf %26, %27 : vector<128x128xf32>
    %cst_16 = arith.constant dense<0.000000e+00> : vector<128x1xf32>
    %29 = tpu.matmul %28, %3, %cst_16 {dimension_numbers = #tpu.dot_dimension_numbers<[1], [0], [0], [1], [0, 0, 1, 1], [], []>} : vector<128x128xf32>, vector<128x1xf32>, vector<128x1xf32> -> vector<128x1xf32>
    %30 = vector.broadcast %4 : vector<1x1xf32> to vector<128x1xf32>
    %31 = arith.addf %29, %30 : vector<128x1xf32>
    %32 = vector.extract_strided_slice %0 {offsets = [0, 96], sizes = [128, 32], strides = [1, 1]} : vector<128x128xf32> to vector<128x32xf32>
    %cst_17 = arith.constant dense<0.000000e+00> : vector<128x128xf32>
    %33 = tpu.matmul %32, %1, %cst_17 {dimension_numbers = #tpu.dot_dimension_numbers<[1], [0], [0], [1], [0, 0, 1, 1], [], []>} : vector<128x32xf32>, vector<32x128xf32>, vector<128x128xf32> -> vector<128x128xf32>
    %34 = vector.broadcast %2 : vector<1x128xf32> to vector<128x128xf32>
    %35 = arith.addf %33, %34 : vector<128x128xf32>
    %cst_18 = arith.constant 0.000000e+00 : f32
    %36 = vector.broadcast %cst_18 : f32 to vector<128x128xf32>
    %37 = arith.maximumf %35, %36 : vector<128x128xf32>
    %cst_19 = arith.constant dense<0.000000e+00> : vector<128x1xf32>
    %38 = tpu.matmul %37, %3, %cst_19 {dimension_numbers = #tpu.dot_dimension_numbers<[1], [0], [0], [1], [0, 0, 1, 1], [], []>} : vector<128x128xf32>, vector<128x1xf32>, vector<128x1xf32> -> vector<128x1xf32>
    %39 = vector.broadcast %4 : vector<1x1xf32> to vector<128x1xf32>
    %40 = arith.addf %38, %39 : vector<128x1xf32>
    %41 = tpu.concatenate %13, %22, %31, %40 in 1 : vector<128x1xf32>, vector<128x1xf32>, vector<128x1xf32>, vector<128x1xf32> -> vector<128x4xf32>
    %c0_20 = arith.constant 0 : index
    %c0_21 = arith.constant 0 : index
    %42 = vector.load %arg6[%c0_20, %c0_21] : memref<128x4xf32, #tpu.memory_space<vmem>>, vector<128x4xf32>
    tpu.vector_store %arg6[%c0_20, %c0_21], %41 {strides = array<i32>} : memref<128x4xf32, #tpu.memory_space<vmem>>, vector<128x4xf32>,
    return
  }
  func.func @transform_0(%arg0: i32) -> (i32, i32) {
    %c0_i32 = arith.constant 0 : i32
    %c0_i32_0 = arith.constant 0 : i32
    return %arg0, %c0_i32 : i32, i32
  }
  func.func @transform_1(%arg0: i32) -> (i32, i32) {
    %c0_i32 = arith.constant 0 : i32
    %c0_i32_0 = arith.constant 0 : i32
    %c0_i32_1 = arith.constant 0 : i32
    return %c0_i32, %c0_i32_0 : i32, i32
  }
  func.func @transform_2(%arg0: i32) -> (i32, i32) {
    %c0_i32 = arith.constant 0 : i32
    %c0_i32_0 = arith.constant 0 : i32
    %c0_i32_1 = arith.constant 0 : i32
    return %c0_i32, %c0_i32_0 : i32, i32
  }
  func.func @transform_3(%arg0: i32) -> (i32, i32) {
    %c0_i32 = arith.constant 0 : i32
    %c0_i32_0 = arith.constant 0 : i32
    %c0_i32_1 = arith.constant 0 : i32
    return %c0_i32, %c0_i32_0 : i32, i32
  }
  func.func @transform_4(%arg0: i32) -> (i32, i32) {
    %c0_i32 = arith.constant 0 : i32
    %c0_i32_0 = arith.constant 0 : i32
    %c0_i32_1 = arith.constant 0 : i32
    return %c0_i32, %c0_i32_0 : i32, i32
  }
  func.func @transform_5(%arg0: i32) -> (i32, i32) {
    %c0_i32 = arith.constant 0 : i32
    %c0_i32_0 = arith.constant 0 : i32
    return %arg0, %c0_i32 : i32, i32
  }
}

</mosaic_0001>

<bundles_post_ra>
// kernel: fno2d_forward.10
= control target key start
LH: loop header
LB: loop body
LE: loop exit
PB: predicated region body
PF: predicated region fallthrough
CT: control target
= control target key end

     0   :  { %vm41_vm0 = vcmask 261120   ;;  %s483_s1 = inlined_call_operand.vmem [shape: f32[32,128], index: 1, kind: input, shape index: {}]   ;;  %s484_s0 = inlined_call_operand.vmem [shape: f32[128,32], index: 0, kind: input, shape index: {}]   ;;  %s485_s2 = inlined_call_operand.vmem [shape: f32[1,128], index: 2, kind: input, shape index: {}]   ;;  %s486_s3 = inlined_call_operand.vmem [shape: f32[128,128], index: 3, kind: output, shape index: {}]  }
   0x1   :  { %v30_v0 = vld [vmem:[%s483_s1] sm:$0xff]  ;;  %v31_v1 = vld [vmem:[%s483_s1 + $0x8] sm:$0xff]  ;;  %v32_v2 = vld [vmem:[%s483_s1 + $0x10] sm:$0xff] }
   0x2   :  { %v324_v3 = vpack.c.bf16 %v31_v1, %v30_v0  ;;  %v33_v4 = vld [vmem:[%s483_s1 + $0x18] sm:$0xff]  ;;  %v14_v5 = vld [vmem:[%s484_s0] sm:$0xff]  ;;  %v15_v8 = vld [vmem:[%s484_s0 + $0x8] sm:$0xff] }
   0x3   :  { %v22_v6 = vld [vmem:[%s484_s0 + $0x40] sm:$0xff]  ;;  %v328_v7 = vpack.c.bf16 %v33_v4, %v32_v2  ;;  %300 = vmatprep.mubr.msk.f32.mxu0 %vm41_vm0, %v14_v5  ;;  %v23_v9 = vld [vmem:[%s484_s0 + $0x48] sm:$0xff]  ;;  %v16_v10 = vld [vmem:[%s484_s0 + $0x10] sm:$0xff] }
   0x4   :  { %312 = vmatprep.mubr.msk.f32.mxu1 %vm41_vm0, %v22_v6  ;;  %325 = vmatprep.subr.bf16.mxu0 %v324_v3  ;;  %v24_v11 = vld [vmem:[%s484_s0 + $0x50] sm:$0xff]  ;;  %v17_v12 = vld [vmem:[%s484_s0 + $0x18] sm:$0xff]  ;;  %v18_v14 = vld [vmem:[%s484_s0 + $0x20] sm:$0xff] }
   0x5   :  { %332 = vmatprep.subr.bf16.mxu1 %v324_v3  ;;  %327 = vmatpush3.bf16.msra.mxu0 %v324_v3  ;;  %v25_v13 = vld [vmem:[%s484_s0 + $0x58] sm:$0xff]  ;;  %v26_v15 = vld [vmem:[%s484_s0 + $0x60] sm:$0xff]  ;;  %v19_v16 = vld [vmem:[%s484_s0 + $0x28] sm:$0xff] }
   0x6   :  { %334 = vmatpush3.bf16.msra.mxu1 %v324_v3  ;;  %329 = vmatprep.subr.bf16.mxu0 %v328_v7  ;;  %v27_v17 = vld [vmem:[%s484_s0 + $0x68] sm:$0xff]  ;;  %v20_v18 = vld [vmem:[%s484_s0 + $0x30] sm:$0xff]  ;;  %v21_v20 = vld [vmem:[%s484_s0 + $0x38] sm:$0xff] }
   0x7   :  { %333 = vmatprep.subr.bf16.mxu1 %v328_v7  ;;  %v28_v19 = vld [vmem:[%s484_s0 + $0x70] sm:$0xff]  ;;  %v29_v21 = vld [vmem:[%s484_s0 + $0x78] sm:$0xff]  ;;  %v255_v22 = vld [vmem:[%s485_s2] ss:$0 sm:$0xff] }
   0x9   :  { %331 = vmatpush3.bf16.msra.mxu0 %v328_v7 }
   0xa   :  { %335 = vmatpush3.bf16.msra.mxu1 %v328_v7 }
   0xc   :  { %301 = vmatmul.mubr.msk.f32.vlgmr.msra.gmra.mrb[0].mxu0 %vm41_vm0, %v15_v8 }
   0xd   :  { %313 = vmatmul.mubr.msk.f32.vlgmr.msra.gmra.mrb[0].mxu1 %vm41_vm0, %v23_v9  ;;  %303 = vmatprep.mubr.msk.f32.mxu0 %vm41_vm0, %v16_v10 }
   0xe   :  { %315 = vmatprep.mubr.msk.f32.mxu1 %vm41_vm0, %v24_v11 }
  0x10   :  { %304 = vmatmul.mubr.msk.f32.gmra.mrb[2].mxu0 %vm41_vm0, %v17_v12 }
  0x11   :  { %316 = vmatmul.mubr.msk.f32.gmra.mrb[2].mxu1 %vm41_vm0, %v25_v13  ;;  %306 = vmatprep.mubr.msk.f32.mxu0 %vm41_vm0, %v18_v14 }
  0x12   :  { %318 = vmatprep.mubr.msk.f32.mxu1 %vm41_vm0, %v26_v15 }
  0x14   :  { %307 = vmatmul.mubr.msk.f32.gmra.mrb[4].mxu0 %vm41_vm0, %v19_v16 }
  0x15   :  { %319 = vmatmul.mubr.msk.f32.gmra.mrb[4].mxu1 %vm41_vm0, %v27_v17  ;;  %309 = vmatprep.mubr.msk.f32.mxu0 %vm41_vm0, %v20_v18 }
  0x16   :  { %321 = vmatprep.mubr.msk.f32.mxu1 %vm41_vm0, %v28_v19 }
  0x18   :  { %310 = vmatmul.mubr.msk.f32.gmra.mrb[6].mxu0 %vm41_vm0, %v21_v20 }
  0x19   :  { %322 = vmatmul.mubr.msk.f32.gmra.mrb[6].mxu1 %vm41_vm0, %v29_v21 }
  0xdf   :  { %v302_v23 = vpop.f32.mrb[0].mxu0 }
  0xe0   :  { %v314_v24 = vpop.f32.mrb[0].mxu1  ;;  %v162_v25 = vadd.f32 %v302_v23, %v255_v22  ;;  %v156_v27 = vpop.f32.mrb[1].mxu0 }
  0xe1   :  { %v202_v26 = vadd.f32 %v314_v24, %v255_v22  ;;  %v196_v28 = vpop.f32.mrb[1].mxu1  ;;  %v157_v29 = vadd.f32 %v255_v22, %v156_v27 }
  0xe2   :  { %v197_v30 = vadd.f32 %v255_v22, %v196_v28  ;;  %236 = vst [vmem:[%s486_s3 + $0x8] sm:$0xff] %v162_v25 }
  0xe3   :  { %244 = vst [vmem:[%s486_s3 + $0x48] sm:$0xff] %v202_v26  ;;  %235 = vst [vmem:[%s486_s3] sm:$0xff] %v157_v29  ;;  %v305_v31 = vpop.f32.mrb[2].mxu0 }
  0xe4   :  { %243 = vst [vmem:[%s486_s3 + $0x40] sm:$0xff] %v197_v30  ;;  %v317_v32 = vpop.f32.mrb[2].mxu1  ;;  %v172_v33 = vadd.f32 %v305_v31, %v255_v22  ;;  %v166_v35 = vpop.f32.mrb[3].mxu0 }
  0xe5   :  { %v212_v34 = vadd.f32 %v317_v32, %v255_v22  ;;  %v206_v36 = vpop.f32.mrb[3].mxu1  ;;  %v167_v37 = vadd.f32 %v255_v22, %v166_v35 }
  0xe6   :  { %v207_v38 = vadd.f32 %v255_v22, %v206_v36  ;;  %238 = vst [vmem:[%s486_s3 + $0x18] sm:$0xff] %v172_v33 }
  0xe7   :  { %246 = vst [vmem:[%s486_s3 + $0x58] sm:$0xff] %v212_v34  ;;  %237 = vst [vmem:[%s486_s3 + $0x10] sm:$0xff] %v167_v37  ;;  %v308_v39 = vpop.f32.mrb[4].mxu0 }
  0xe8   :  { %245 = vst [vmem:[%s486_s3 + $0x50] sm:$0xff] %v207_v38  ;;  %v320_v40 = vpop.f32.mrb[4].mxu1  ;;  %v182_v41 = vadd.f32 %v308_v39, %v255_v22  ;;  %v176_v43 = vpop.f32.mrb[5].mxu0 }
  0xe9   :  { %v222_v42 = vadd.f32 %v320_v40, %v255_v22  ;;  %v216_v44 = vpop.f32.mrb[5].mxu1  ;;  %v177_v45 = vadd.f32 %v255_v22, %v176_v43 }
  0xea   :  { %v217_v46 = vadd.f32 %v255_v22, %v216_v44  ;;  %240 = vst [vmem:[%s486_s3 + $0x28] sm:$0xff] %v182_v41 }
  0xeb   :  { %248 = vst [vmem:[%s486_s3 + $0x68] sm:$0xff] %v222_v42  ;;  %239 = vst [vmem:[%s486_s3 + $0x20] sm:$0xff] %v177_v45  ;;  %v311_v47 = vpop.f32.mrb[6].mxu0 }
  0xec   :  { %247 = vst [vmem:[%s486_s3 + $0x60] sm:$0xff] %v217_v46  ;;  %v323_v48 = vpop.f32.mrb[6].mxu1  ;;  %v192_v49 = vadd.f32 %v311_v47, %v255_v22  ;;  %v186_v51 = vpop.f32.mrb[7].mxu0 }
  0xed   :  { %v232_v50 = vadd.f32 %v323_v48, %v255_v22  ;;  %v226_v52 = vpop.f32.mrb[7].mxu1  ;;  %v187_v53 = vadd.f32 %v255_v22, %v186_v51 }
  0xee   :  { %v227_v54 = vadd.f32 %v255_v22, %v226_v52  ;;  %242 = vst [vmem:[%s486_s3 + $0x38] sm:$0xff] %v192_v49 }
  0xef   :  { %250 = vst [vmem:[%s486_s3 + $0x78] sm:$0xff] %v232_v50  ;;  %241 = vst [vmem:[%s486_s3 + $0x30] sm:$0xff] %v187_v53 }
  0xf0   :  { %249 = vst [vmem:[%s486_s3 + $0x70] sm:$0xff] %v227_v54 }

// kernel: reverse.8
= control target key start
LH: loop header
LB: loop body
LE: loop exit
PB: predicated region body
PF: predicated region fallthrough
CT: control target
= control target key end

     0   :  { %s344_s0 = inlined_call_operand.vmem [shape: f32[2,32,16,7], index: 0, kind: input, shape index: {}]   ;;  %s345_s1 = inlined_call_operand.vmem [shape: f32[2,32,16,7], index: 1, kind: output, shape index: {}]  }
   0x1   :  { %v112_v0 = vld [vmem:[%s344_s0 + $0x60] sm:$0xff]  ;;  %v113_v1 = vld [vmem:[%s344_s0 + $0xd0] sm:$0xff]  ;;  %v138_v14 = vld [vmem:[%s344_s0 + $0x68] sm:$0xff] }
   0x2   :  { %v115_v2 = vld [vmem:[%s344_s0 + $0x50] sm:$0xff]  ;;  %4 = vst [vmem:[%s345_s1] sm:$0xff] %v112_v0  ;;  %114 = vst [vmem:[%s345_s1 + $0x70] sm:$0xff] %v113_v1  ;;  %v117_v3 = vld [vmem:[%s344_s0 + $0xc0] sm:$0xff] }
   0x3   :  { %116 = vst [vmem:[%s345_s1 + $0x10] sm:$0xff] %v115_v2  ;;  %v119_v4 = vld [vmem:[%s344_s0 + $0x40] sm:$0xff]  ;;  %v121_v5 = vld [vmem:[%s344_s0 + $0xb0] sm:$0xff]  ;;  %118 = vst [vmem:[%s345_s1 + $0x80] sm:$0xff] %v117_v3 }
   0x4   :  { %120 = vst [vmem:[%s345_s1 + $0x20] sm:$0xff] %v119_v4  ;;  %122 = vst [vmem:[%s345_s1 + $0x90] sm:$0xff] %v121_v5  ;;  %v123_v6 = vld [vmem:[%s344_s0 + $0x30] sm:$0xff]  ;;  %v125_v7 = vld [vmem:[%s344_s0 + $0xa0] sm:$0xff] }
   0x5   :  { %v127_v8 = vld [vmem:[%s344_s0 + $0x20] sm:$0xff]  ;;  %124 = vst [vmem:[%s345_s1 + $0x30] sm:$0xff] %v123_v6  ;;  %126 = vst [vmem:[%s345_s1 + $0xa0] sm:$0xff] %v125_v7  ;;  %v129_v9 = vld [vmem:[%s344_s0 + $0x90] sm:$0xff] }
   0x6   :  { %128 = vst [vmem:[%s345_s1 + $0x40] sm:$0xff] %v127_v8  ;;  %v131_v10 = vld [vmem:[%s344_s0 + $0x10] sm:$0xff]  ;;  %v133_v11 = vld [vmem:[%s344_s0 + $0x80] sm:$0xff]  ;;  %130 = vst [vmem:[%s345_s1 + $0xb0] sm:$0xff] %v129_v9 }
   0x7   :  { %132 = vst [vmem:[%s345_s1 + $0x50] sm:$0xff] %v131_v10  ;;  %134 = vst [vmem:[%s345_s1 + $0xc0] sm:$0xff] %v133_v11  ;;  %v49_v12 = vld [vmem:[%s344_s0] sm:$0xff]  ;;  %v136_v13 = vld [vmem:[%s344_s0 + $0x70] sm:$0xff] }
   0x8   :  { %135 = vst [vmem:[%s345_s1 + $0x60] sm:$0xff] %v49_v12  ;;  %137 = vst [vmem:[%s345_s1 + $0xd0] sm:$0xff] %v136_v13  ;;  %v140_v15 = vld [vmem:[%s344_s0 + $0xd8] sm:$0xff]  ;;  %v144_v17 = vld [vmem:[%s344_s0 + $0xc8] sm:$0xff] }
   0x9   :  { %139 = vst [vmem:[%s345_s1 + $0x8] sm:$0xff] %v138_v14  ;;  %v142_v16 = vld [vmem:[%s344_s0 + $0x58] sm:$0xff]  ;;  %141 = vst [vmem:[%s345_s1 + $0x78] sm:$0xff] %v140_v15  ;;  %v146_v18 = vld [vmem:[%s344_s0 + $0x48] sm:$0xff] }
   0xa   :  { %143 = vst [vmem:[%s345_s1 + $0x18] sm:$0xff] %v142_v16  ;;  %145 = vst [vmem:[%s345_s1 + $0x88] sm:$0xff] %v144_v17  ;;  %v148_v19 = vld [vmem:[%s344_s0 + $0xb8] sm:$0xff]  ;;  %v152_v21 = vld [vmem:[%s344_s0 + $0xa8] sm:$0xff] }
   0xb   :  { %v150_v20 = vld [vmem:[%s344_s0 + $0x38] sm:$0xff]  ;;  %147 = vst [vmem:[%s345_s1 + $0x28] sm:$0xff] %v146_v18  ;;  %149 = vst [vmem:[%s345_s1 + $0x98] sm:$0xff] %v148_v19  ;;  %v154_v22 = vld [vmem:[%s344_s0 + $0x28] sm:$0xff] }
   0xc   :  { %151 = vst [vmem:[%s345_s1 + $0x38] sm:$0xff] %v150_v20  ;;  %v156_v23 = vld [vmem:[%s344_s0 + $0x98] sm:$0xff]  ;;  %153 = vst [vmem:[%s345_s1 + $0xa8] sm:$0xff] %v152_v21  ;;  %v160_v25 = vld [vmem:[%s344_s0 + $0x88] sm:$0xff] }
   0xd   :  { %155 = vst [vmem:[%s345_s1 + $0x48] sm:$0xff] %v154_v22  ;;  %157 = vst [vmem:[%s345_s1 + $0xb8] sm:$0xff] %v156_v23  ;;  %v158_v24 = vld [vmem:[%s344_s0 + $0x18] sm:$0xff]  ;;  %v162_v26 = vld [vmem:[%s344_s0 + $0x8] sm:$0xff] }
   0xe   :  { %159 = vst [vmem:[%s345_s1 + $0x58] sm:$0xff] %v158_v24  ;;  %161 = vst [vmem:[%s345_s1 + $0xc8] sm:$0xff] %v160_v25  ;;  %v164_v27 = vld [vmem:[%s344_s0 + $0x78] sm:$0xff] }
   0xf   :  { %163 = vst [vmem:[%s345_s1 + $0x68] sm:$0xff] %v162_v26  ;;  %165 = vst [vmem:[%s345_s1 + $0xd8] sm:$0xff] %v164_v27 }

// kernel: fno2d_forward.11
= control target key start
LH: loop header
LB: loop body
LE: loop exit
PB: predicated region body
PF: predicated region fallthrough
CT: control target
= control target key end

     0   :  { %s5863_s21 = smov 0   ;;  %s6443_s0 = inlined_call_operand.vmem [shape: f32[32,2,32], index: 0, kind: input, shape index: {}]   ;;  %s6444_s1 = inlined_call_operand.vmem [shape: f32[32,2,32], index: 1, kind: input, shape index: {}]   ;;  %s6445_s2 = inlined_call_operand.vmem [shape: f32[32,32,32], index: 2, kind: input, shape index: {}]   ;;  %s6446_s3 = inlined_call_operand.vmem [shape: f32[32,32,32], index: 3, kind: input, shape index: {}]   ;;  %s6447_s4 = inlined_call_operand.vmem [shape: f32[32,32,32], index: 4, kind: input, shape index: {}]   ;;  %s6448_s5 = inlined_call_operand.vmem [shape: f32[32,2,32], index: 5, kind: output, shape index: {0}]   ;;  %s6449_s6 = inlined_call_operand.vmem [shape: f32[32,2,32], index: 6, kind: output, shape index: {1}]  }
   0x1 LB: > { %s4435_s22 = sadd.s32 4294967295, %s5823_s21   ;;  %p4439_p0 = scmp.ge.s32.totalorder %s5823_s21, 1  ;;  %s5823_s21 = sphi %s5863_s21, %s17_s21  }
   0x2   : > { %p263_p1 = scmp.lt.s32.totalorder %s5823_s21, 3 }
   0x4   : > { %p264_p2 = pnand %p4439_p0, %p263_p1 }
   0x5   : > { %s4440_s23 = sshll.u32 (!%p264_p2), %s4435_s22, 4  ;;  %v5825_v0 = vmov (!%p264_p2), 0.0|0.0   ;;  %vm5826_vm0 = vmmov (!%p264_p2), 0   ;;  %v5827_v1 = vmov (!%p264_p2), 0.0   ;;  %vm372_vm1 = vcmask (!%p264_p2), 261120  }
   0x6   : > { %267 = sbr.rel (%p264_p2) target bundleno = 428 (0x1ac), region = 40  ;;  %5518 = vmatprep.subr.bf16.mxu0 (!%p264_p2), %v5825_v0  ;;  %5524 = vmatprep.subr.bf16.mxu1 (!%p264_p2), %v5825_v0  ;;  %p322_p3 = scmp.lt.s32.totalorder (!%p264_p2), %s4440_s23, 31  ;;  %vm602_vm2 = vcmask (!%p264_p2), 254976  }
   0x7   : > { %5009 = vmatprep.mubr.msk.f32.mxu1 (!%p264_p2), %vm5826_vm0, %v5827_v1  ;;  %4998 = vmatprep.mubr.msk.f32.mxu0 (!%p264_p2), %vm5826_vm0, %v5827_v1 }
   0xd   : > { %s6451_s23 = smov (!%p322_p3, %s4440_s23), 31 }
   0xe   : > { %s4747_s24 = sshll.u32 %s6451_s23, 5  ;;  %s5898_s10 = sshll.u32 %s6451_s23, 1 }
   0xf   : > { %s5880_s27 = scalar_lea.vmem %s6445_s2, %s4747_s24  ;;  %s5887_s30 = scalar_lea.vmem %s6446_s3, %s4747_s24 }
  0x10   : > { %v368_v2 = vld [vmem:[%s5880_s27] sm:$0xff]  ;;  %v369_v3 = vld [vmem:[%s5880_s27 + $0x8] sm:$0xff]  ;;  %v370_v4 = vld [vmem:[%s5880_s27 + $0x10] sm:$0xff]  ;;  %s5893_s9 = scalar_lea.vmem %s6447_s4, %s4747_s24  ;;  %s5907_s13 = scalar_lea.vmem %s6443_s0, %s5898_s10 }
  0x11   : > { %v5519_v5 = vpack.c.bf16 %v369_v3, %v368_v2  ;;  %v446_v6 = vld [vmem:[%s5887_s30] sm:$0xff]  ;;  %v447_v7 = vld [vmem:[%s5887_s30 + $0x8] sm:$0xff]  ;;  %v371_v8 = vld [vmem:[%s5880_s27 + $0x18] sm:$0xff]  ;;  %s5916_s16 = scalar_lea.vmem %s6444_s1, %s5898_s10  ;;  %s6368_s19 = scalar_lea.vmem %s6448_s5, %s5898_s10 }
  0x12   : > { %v5525_v9 = vpack.c.bf16 %v447_v7, %v446_v6  ;;  %v448_v10 = vld [vmem:[%s5887_s30 + $0x10] sm:$0xff]  ;;  %v449_v11 = vld [vmem:[%s5887_s30 + $0x18] sm:$0xff]  ;;  %v5522_v12 = vpack.c.bf16 %v371_v8, %v370_v4  ;;  %v524_v14 = vld [vmem:[%s5893_s9] sm:$0xff]  ;;  %s6376_s23 = scalar_lea.vmem %s6449_s6, %s5898_s10 }
  0x13   : > { %5520 = vmatpush3.bf16.msra.mxu0 %v5519_v5  ;;  %v5528_v13 = vpack.c.bf16 %v449_v11, %v448_v10  ;;  %v525_v15 = vld [vmem:[%s5893_s9 + $0x8] sm:$0xff]  ;;  %v4462_v16 = vld [vmem:[%s5880_s27 + $0x20] sm:$0xff]  ;;  %v526_v22 = vld [vmem:[%s5893_s9 + $0x10] sm:$0xff] }
  0x14   : > { %5526 = vmatpush3.bf16.msra.mxu1 %v5525_v9  ;;  %5521 = vmatprep.subr.bf16.mxu0 %v5825_v0  ;;  %v4463_v17 = vld [vmem:[%s5880_s27 + $0x28] sm:$0xff]  ;;  %v366_v18 = vld [vmem:[%s5907_s13] sm:$0x3]  ;;  %v5531_v19 = vpack.c.bf16 %v525_v15, %v524_v14  ;;  %v527_v23 = vld [vmem:[%s5893_s9 + $0x18] sm:$0xff] }
  0x15   : > { %5527 = vmatprep.subr.bf16.mxu1 %v5825_v0  ;;  %v367_v20 = vld [vmem:[%s5916_s16] sm:$0x3]  ;;  %v5537_v21 = vpack.c.bf16 %v4463_v17, %v4462_v16  ;;  %v4464_v24 = vld [vmem:[%s5880_s27 + $0x30] sm:$0xff]  ;;  %v4465_v25 = vld [vmem:[%s5880_s27 + $0x38] sm:$0xff]  ;;  %v5534_v26 = vpack.c.bf16 %v527_v23, %v526_v22 }
  0x16   : > { %v5540_v27 = vpack.c.bf16 %v4465_v25, %v4464_v24  ;;  %v4467_v28 = vld [vmem:[%s5887_s30 + $0x20] sm:$0xff]  ;;  %v4468_v29 = vld [vmem:[%s5887_s30 + $0x28] sm:$0xff]  ;;  %v523_v32 = vadd.f32 %v367_v20, %v366_v18  ;;  %v4469_v36 = vld [vmem:[%s5887_s30 + $0x30] sm:$0xff] }
  0x17   : > { %5523 = vmatpush3.bf16.msra.mxu0 %v5522_v12  ;;  %v4472_v30 = vld [vmem:[%s5893_s9 + $0x20] sm:$0xff]  ;;  %v4473_v31 = vld [vmem:[%s5893_s9 + $0x28] sm:$0xff]  ;;  %v5543_v33 = vpack.c.bf16 %v4468_v29, %v4467_v28  ;;  %v4470_v37 = vld [vmem:[%s5887_s30 + $0x38] sm:$0xff] }
  0x18   : > { %5529 = vmatpush3.bf16.msra.mxu1 %v5528_v13  ;;  %5530 = vmatprep.subr.bf16.mxu0 %v5825_v0  ;;  %v4460_v34 = vld [vmem:[%s5907_s13 + $0x2] sm:$0x3]  ;;  %v5549_v35 = vpack.c.bf16 %v4473_v31, %v4472_v30  ;;  %v4474_v38 = vld [vmem:[%s5893_s9 + $0x30] sm:$0xff]  ;;  %v4475_v39 = vld [vmem:[%s5893_s9 + $0x38] sm:$0xff]  ;;  %v5546_v40 = vpack.c.bf16 %v4470_v37, %v4469_v36 }
  0x19   : > { %5536 = vmatprep.subr.bf16.mxu1 %v5825_v0  ;;  %v5552_v41 = vpack.c.bf16 %v4475_v39, %v4474_v38  ;;  %v4461_v42 = vld [vmem:[%s5916_s16 + $0x2] sm:$0x3]  ;;  %v4482_v44 = vld [vmem:[%s5880_s27 + $0x48] sm:$0xff]  ;;  %v4483_v50 = vld [vmem:[%s5880_s27 + $0x50] sm:$0xff] }
  0x1a   : > { %4999 = vmatmul.mubr.msk.f32.vlgmr.msra.gmra.mrb[0].mxu0 %vm372_vm1, %v366_v18  ;;  %v4481_v43 = vld [vmem:[%s5880_s27 + $0x40] sm:$0xff]  ;;  %v4487_v46 = vld [vmem:[%s5887_s30 + $0x48] sm:$0xff]  ;;  %v767_v47 = vadd.f32 %v4461_v42, %v4460_v34  ;;  %v4484_v51 = vld [vmem:[%s5880_s27 + $0x58] sm:$0xff] }
  0x1b   : > { %5010 = vmatmul.mubr.msk.f32.vlgmr.msra.gmra.mrb[0].mxu1 %vm372_vm1, %v367_v20  ;;  %5532 = vmatpush3.bf16.msra.mxu0 %v5531_v19  ;;  %v4486_v45 = vld [vmem:[%s5887_s30 + $0x40] sm:$0xff]  ;;  %v5555_v48 = vpack.c.bf16 %v4482_v44, %v4481_v43  ;;  %v4488_v52 = vld [vmem:[%s5887_s30 + $0x50] sm:$0xff]  ;;  %v4489_v53 = vld [vmem:[%s5887_s30 + $0x58] sm:$0xff]  ;;  %v5558_v54 = vpack.c.bf16 %v4484_v51, %v4483_v50 }
  0x1c   : > { %5538 = vmatpush3.bf16.msra.mxu1 %v5537_v21  ;;  %5533 = vmatprep.subr.bf16.mxu0 %v5825_v0  ;;  %v5561_v49 = vpack.c.bf16 %v4487_v46, %v4486_v45  ;;  %v5564_v55 = vpack.c.bf16 %v4489_v53, %v4488_v52  ;;  %v4491_v56 = vld [vmem:[%s5893_s9 + $0x40] sm:$0xff]  ;;  %v4492_v57 = vld [vmem:[%s5893_s9 + $0x48] sm:$0xff]  ;;  %v4493_v2 = vld [vmem:[%s5893_s9 + $0x50] sm:$0xff] }
  0x1d   : > { %5539 = vmatprep.subr.bf16.mxu1 %v5825_v0  ;;  %5020 = vmatprep.mubr.msk.f32.mxu0 %vm5826_vm0, %v5827_v1  ;;  %v4500_v58 = vld [vmem:[%s5880_s27 + $0x60] sm:$0xff]  ;;  %v4501_v59 = vld [vmem:[%s5880_s27 + $0x68] sm:$0xff]  ;;  %v5567_v61 = vpack.c.bf16 %v4492_v57, %v4491_v56  ;;  %v4494_v3 = vld [vmem:[%s5893_s9 + $0x58] sm:$0xff] }
  0x1e   : > { %5031 = vmatprep.mubr.msk.f32.mxu1 %vm5826_vm0, %v5827_v1  ;;  %v4479_v60 = vld [vmem:[%s5907_s13 + $0x4] sm:$0x3]  ;;  %v5573_v63 = vpack.c.bf16 %v4501_v59, %v4500_v58  ;;  %v4502_v4 = vld [vmem:[%s5880_s27 + $0x70] sm:$0xff]  ;;  %v4503_v5 = vld [vmem:[%s5880_s27 + $0x78] sm:$0xff]  ;;  %v5570_v6 = vpack.c.bf16 %v4494_v3, %v4493_v2 }
  0x1f   : > { %5535 = vmatpush3.bf16.msra.mxu0 %v5534_v26  ;;  %v4480_v62 = vld [vmem:[%s5916_s16 + $0x4] sm:$0x3]  ;;  %v5576_v7 = vpack.c.bf16 %v4503_v5, %v4502_v4  ;;  %v4506_v9 = vld [vmem:[%s5887_s30 + $0x68] sm:$0xff]  ;;  %v4498_v14 = vld [vmem:[%s5907_s13 + $0x6] sm:$0x3] }
  0x20   : > { %5541 = vmatpush3.bf16.msra.mxu1 %v5540_v27  ;;  %5542 = vmatprep.subr.bf16.mxu0 %v5825_v0  ;;  %v4505_v8 = vld [vmem:[%s5887_s30 + $0x60] sm:$0xff]  ;;  %v4511_v11 = vld [vmem:[%s5893_s9 + $0x68] sm:$0xff]  ;;  %v1013_v12 = vadd.f32 %v4480_v62, %v4479_v60  ;;  %v4507_v16 = vld [vmem:[%s5887_s30 + $0x70] sm:$0xff] }
  0x21   : > { %5548 = vmatprep.subr.bf16.mxu1 %v5825_v0  ;;  %v4510_v10 = vld [vmem:[%s5893_s9 + $0x60] sm:$0xff]  ;;  %v5579_v13 = vpack.c.bf16 %v4506_v9, %v4505_v8  ;;  %v4508_v17 = vld [vmem:[%s5887_s30 + $0x78] sm:$0xff]  ;;  %v4512_v18 = vld [vmem:[%s5893_s9 + $0x70] sm:$0xff] }
  0x22   : > { %5021 = vmatmul.mubr.msk.f32.vlgmr.msra.gmra.mrb[2].mxu0 %vm372_vm1, %v523_v32  ;;  %v5585_v15 = vpack.c.bf16 %v4511_v11, %v4510_v10  ;;  %v4513_v19 = vld [vmem:[%s5893_s9 + $0x78] sm:$0xff]  ;;  %v5582_v20 = vpack.c.bf16 %v4508_v17, %v4507_v16  ;;  %v4499_v22 = vld [vmem:[%s5916_s16 + $0x6] sm:$0x3]  ;;  %v4520_v24 = vld [vmem:[%s5880_s27 + $0x88] sm:$0xff] }
  0x23   : > { %5032 = vmatmul.mubr.msk.f32.vlgmr.msra.gmra.mrb[2].mxu1 %vm372_vm1, %v4460_v34  ;;  %5544 = vmatpush3.bf16.msra.mxu0 %v5543_v33  ;;  %v5588_v21 = vpack.c.bf16 %v4513_v19, %v4512_v18  ;;  %v4519_v23 = vld [vmem:[%s5880_s27 + $0x80] sm:$0xff]  ;;  %v4525_v26 = vld [vmem:[%s5887_s30 + $0x88] sm:$0xff]  ;;  %v1259_v27 = vadd.f32 %v4499_v22, %v4498_v14  ;;  %v4521_v30 = vld [vmem:[%s5880_s27 + $0x90] sm:$0xff] }
  0x24   : > { %5550 = vmatpush3.bf16.msra.mxu1 %v5549_v35  ;;  %5545 = vmatprep.subr.bf16.mxu0 %v5825_v0  ;;  %v4524_v25 = vld [vmem:[%s5887_s30 + $0x80] sm:$0xff]  ;;  %v5591_v28 = vpack.c.bf16 %v4520_v24, %v4519_v23  ;;  %v4522_v31 = vld [vmem:[%s5880_s27 + $0x98] sm:$0xff]  ;;  %v4526_v32 = vld [vmem:[%s5887_s30 + $0x90] sm:$0xff] }
  0x25   : > { %5551 = vmatprep.subr.bf16.mxu1 %v5825_v0  ;;  %5042 = vmatprep.mubr.msk.f32.mxu0 %vm5826_vm0, %v5827_v1  ;;  %v5597_v29 = vpack.c.bf16 %v4525_v26, %v4524_v25  ;;  %v4527_v33 = vld [vmem:[%s5887_s30 + $0x98] sm:$0xff]  ;;  %v5594_v34 = vpack.c.bf16 %v4522_v31, %v4521_v30  ;;  %v4529_v36 = vld [vmem:[%s5893_s9 + $0x80] sm:$0xff]  ;;  %v4530_v37 = vld [vmem:[%s5893_s9 + $0x88] sm:$0xff] }
  0x26   : > { %5053 = vmatprep.mubr.msk.f32.mxu1 %vm5826_vm0, %v5827_v1  ;;  %v5600_v35 = vpack.c.bf16 %v4527_v33, %v4526_v32  ;;  %v4538_v38 = vld [vmem:[%s5880_s27 + $0xa0] sm:$0xff]  ;;  %v4539_v39 = vld [vmem:[%s5880_s27 + $0xa8] sm:$0xff]  ;;  %v4531_v44 = vld [vmem:[%s5893_s9 + $0x90] sm:$0xff] }
  0x27   : > { %5547 = vmatpush3.bf16.msra.mxu0 %v5546_v40  ;;  %v4517_v40 = vld [vmem:[%s5907_s13 + $0x8] sm:$0x3]  ;;  %v5609_v43 = vpack.c.bf16 %v4539_v39, %v4538_v38  ;;  %v4532_v45 = vld [vmem:[%s5893_s9 + $0x98] sm:$0xff]  ;;  %v4540_v46 = vld [vmem:[%s5880_s27 + $0xb0] sm:$0xff] }
  0x28   : > { %5553 = vmatpush3.bf16.msra.mxu1 %v5552_v41  ;;  %5554 = vmatprep.subr.bf16.mxu0 %v5825_v0  ;;  %v5603_v41 = vpack.c.bf16 %v4530_v37, %v4529_v36  ;;  %v4543_v50 = vld [vmem:[%s5887_s30 + $0xa0] sm:$0xff]  ;;  %v4544_v51 = vld [vmem:[%s5887_s30 + $0xa8] sm:$0xff]  ;;  %v4545_v58 = vld [vmem:[%s5887_s30 + $0xb0] sm:$0xff] }
  0x29   : > { %5560 = vmatprep.subr.bf16.mxu1 %v5825_v0  ;;  %v4548_v52 = vld [vmem:[%s5893_s9 + $0xa0] sm:$0xff]  ;;  %v4549_v53 = vld [vmem:[%s5893_s9 + $0xa8] sm:$0xff]  ;;  %v4546_v59 = vld [vmem:[%s5887_s30 + $0xb8] sm:$0xff] }
  0x2a   : > { %5043 = vmatmul.mubr.msk.f32.vlgmr.msra.gmra.mrb[4].mxu0 %vm372_vm1, %v4461_v42  ;;  %v4518_v42 = vld [vmem:[%s5916_s16 + $0x8] sm:$0x3]  ;;  %v4536_v56 = vld [vmem:[%s5907_s13 + $0xa] sm:$0x3]  ;;  %v5621_v57 = vpack.c.bf16 %v4549_v53, %v4548_v52  ;;  %v4557_v3 = vld [vmem:[%s5880_s27 + $0xc0] sm:$0xff] }
  0x2b   : > { %5054 = vmatmul.mubr.msk.f32.vlgmr.msra.gmra.mrb[4].mxu1 %vm372_vm1, %v767_v47  ;;  %5556 = vmatpush3.bf16.msra.mxu0 %v5555_v48  ;;  %v4541_v47 = vld [vmem:[%s5880_s27 + $0xb8] sm:$0xff]  ;;  %v5606_v48 = vpack.c.bf16 %v4532_v45, %v4531_v44  ;;  %v4537_v2 = vld [vmem:[%s5916_s16 + $0xa] sm:$0x3]  ;;  %v4562_v5 = vld [vmem:[%s5887_s30 + $0xc0] sm:$0xff] }
  0x2c   : > { %5562 = vmatpush3.bf16.msra.mxu1 %v5561_v49  ;;  %5557 = vmatprep.subr.bf16.mxu0 %v5825_v0  ;;  %v5612_v49 = vpack.c.bf16 %v4541_v47, %v4540_v46  ;;  %v4558_v4 = vld [vmem:[%s5880_s27 + $0xc8] sm:$0xff]  ;;  %v4559_v10 = vld [vmem:[%s5880_s27 + $0xd0] sm:$0xff]  ;;  %v4560_v11 = vld [vmem:[%s5880_s27 + $0xd8] sm:$0xff] }
  0x2d   : > { %5563 = vmatprep.subr.bf16.mxu1 %v5825_v0  ;;  %5075 = vmatprep.mubr.msk.f32.mxu1 %vm5826_vm0, %v5827_v1  ;;  %v5627_v8 = vpack.c.bf16 %v4558_v4, %v4557_v3  ;;  %v4567_v16 = vld [vmem:[%s5893_s9 + $0xc0] sm:$0xff]  ;;  %v4568_v17 = vld [vmem:[%s5893_s9 + $0xc8] sm:$0xff]  ;;  %v4569_v24 = vld [vmem:[%s5893_s9 + $0xd0] sm:$0xff] }
  0x2e   : > { %5064 = vmatprep.mubr.msk.f32.mxu0 %vm5826_vm0, %v5827_v1  ;;  %v4576_v18 = vld [vmem:[%s5880_s27 + $0xe0] sm:$0xff]  ;;  %v4577_v19 = vld [vmem:[%s5880_s27 + $0xe8] sm:$0xff]  ;;  %v4570_v25 = vld [vmem:[%s5893_s9 + $0xd8] sm:$0xff] }
  0x2f   : > { %5559 = vmatpush3.bf16.msra.mxu0 %v5558_v54  ;;  %v1505_v54 = vadd.f32 %v4518_v42, %v4517_v40  ;;  %v5645_v23 = vpack.c.bf16 %v4577_v19, %v4576_v18  ;;  %v4578_v26 = vld [vmem:[%s5880_s27 + $0xf0] sm:$0xff]  ;;  %v4581_v30 = vld [vmem:[%s5887_s30 + $0xe0] sm:$0xff]  ;;  %v4582_v31 = vld [vmem:[%s5887_s30 + $0xe8] sm:$0xff] }
  0x30   : > { %5565 = vmatpush3.bf16.msra.mxu1 %v5564_v55  ;;  %5566 = vmatprep.subr.bf16.mxu0 %v5825_v0  ;;  %v5615_v55 = vpack.c.bf16 %v4544_v51, %v4543_v50  ;;  %v4586_v32 = vld [vmem:[%s5893_s9 + $0xe0] sm:$0xff]  ;;  %v4587_v33 = vld [vmem:[%s5893_s9 + $0xe8] sm:$0xff]  ;;  %v4583_v38 = vld [vmem:[%s5887_s30 + $0xf0] sm:$0xff] }
  0x31   : > { %5572 = vmatprep.subr.bf16.mxu1 %v5825_v0  ;;  %v4574_v36 = vld [vmem:[%s5907_s13 + $0xe] sm:$0x3]  ;;  %v5657_v37 = vpack.c.bf16 %v4587_v33, %v4586_v32  ;;  %v4584_v39 = vld [vmem:[%s5887_s30 + $0xf8] sm:$0xff]  ;;  %v4595_v45 = vld [vmem:[%s5880_s27 + $0x100] sm:$0xff] }
  0x32   : > { %5065 = vmatmul.mubr.msk.f32.vlgmr.msra.gmra.mrb[6].mxu0 %vm372_vm1, %v4479_v60  ;;  %v4550_v60 = vld [vmem:[%s5893_s9 + $0xb0] sm:$0xff]  ;;  %v4575_v44 = vld [vmem:[%s5916_s16 + $0xe] sm:$0x3]  ;;  %v4600_v47 = vld [vmem:[%s5887_s30 + $0x100] sm:$0xff] }
  0x33   : > { %5076 = vmatmul.mubr.msk.f32.vlgmr.msra.gmra.mrb[6].mxu1 %vm372_vm1, %v4480_v62  ;;  %5568 = vmatpush3.bf16.msra.mxu0 %v5567_v61  ;;  %v4551_v61 = vld [vmem:[%s5893_s9 + $0xb8] sm:$0xff]  ;;  %v5618_v62 = vpack.c.bf16 %v4546_v59, %v4545_v58  ;;  %v4596_v46 = vld [vmem:[%s5880_s27 + $0x108] sm:$0xff]  ;;  %v4597_v52 = vld [vmem:[%s5880_s27 + $0x110] sm:$0xff] }
  0x34   : > { %5574 = vmatpush3.bf16.msra.mxu1 %v5573_v63  ;;  %5569 = vmatprep.subr.bf16.mxu0 %v5825_v0  ;;  %v5624_v63 = vpack.c.bf16 %v4551_v61, %v4550_v60  ;;  %v5663_v50 = vpack.c.bf16 %v4596_v46, %v4595_v45  ;;  %v4598_v53 = vld [vmem:[%s5880_s27 + $0x118] sm:$0xff]  ;;  %v4605_v58 = vld [vmem:[%s5893_s9 + $0x100] sm:$0xff]  ;;  %v4606_v59 = vld [vmem:[%s5893_s9 + $0x108] sm:$0xff] }
  0x35   : > { %5575 = vmatprep.subr.bf16.mxu1 %v5825_v0  ;;  %5086 = vmatprep.mubr.msk.f32.mxu0 %vm5826_vm0, %v5827_v1  ;;  %v4614_v60 = vld [vmem:[%s5880_s27 + $0x120] sm:$0xff]  ;;  %v4615_v61 = vld [vmem:[%s5880_s27 + $0x128] sm:$0xff]  ;;  %v4607_v4 = vld [vmem:[%s5893_s9 + $0x110] sm:$0xff] }
  0x36   : > { %5097 = vmatprep.mubr.msk.f32.mxu1 %vm5826_vm0, %v5827_v1  ;;  %v5681_v3 = vpack.c.bf16 %v4615_v61, %v4614_v60  ;;  %v4621_v18 = vld [vmem:[%s5887_s30 + $0x130] sm:$0xff]  ;;  %v4622_v19 = vld [vmem:[%s5887_s30 + $0x138] sm:$0xff] }
  0x37   : > { %5571 = vmatpush3.bf16.msra.mxu0 %v5570_v6  ;;  %v4563_v6 = vld [vmem:[%s5887_s30 + $0xc8] sm:$0xff]  ;;  %v4635_v32 = vld [vmem:[%s5880_s27 + $0x150] sm:$0xff]  ;;  %v4636_v33 = vld [vmem:[%s5880_s27 + $0x158] sm:$0xff] }
  0x38   : > { %5577 = vmatpush3.bf16.msra.mxu1 %v5576_v7  ;;  %5578 = vmatprep.subr.bf16.mxu0 %v5825_v0  ;;  %v1751_v7 = vadd.f32 %v4537_v2, %v4536_v56  ;;  %v5633_v9 = vpack.c.bf16 %v4563_v6, %v4562_v5  ;;  %v4608_v5 = vld [vmem:[%s5893_s9 + $0x118] sm:$0xff]  ;;  %v4616_v6 = vld [vmem:[%s5880_s27 + $0x130] sm:$0xff] }
  0x39   : > { %5584 = vmatprep.subr.bf16.mxu1 %v5825_v0  ;;  %v4645_v46 = vld [vmem:[%s5893_s9 + $0x150] sm:$0xff]  ;;  %v4660_v61 = vld [vmem:[%s5887_s30 + $0x178] sm:$0xff] }
  0x3a   : > { %5087 = vmatmul.mubr.msk.f32.vlgmr.msra.gmra.mrb[8].mxu0 %vm372_vm1, %v1013_v12  ;;  %v4564_v12 = vld [vmem:[%s5887_s30 + $0xd0] sm:$0xff] }
  0x3b   : > { %5098 = vmatmul.mubr.msk.f32.vlgmr.msra.gmra.mrb[8].mxu1 %vm372_vm1, %v4498_v14  ;;  %5580 = vmatpush3.bf16.msra.mxu0 %v5579_v13  ;;  %v4565_v13 = vld [vmem:[%s5887_s30 + $0xd8] sm:$0xff]  ;;  %v5630_v14 = vpack.c.bf16 %v4560_v11, %v4559_v10  ;;  %v4619_v10 = vld [vmem:[%s5887_s30 + $0x120] sm:$0xff]  ;;  %v4620_v11 = vld [vmem:[%s5887_s30 + $0x128] sm:$0xff] }
  0x3c   : > { %5586 = vmatpush3.bf16.msra.mxu1 %v5585_v15  ;;  %5581 = vmatprep.subr.bf16.mxu0 %v5825_v0  ;;  %v5636_v15 = vpack.c.bf16 %v4565_v13, %v4564_v12  ;;  %v4624_v12 = vld [vmem:[%s5893_s9 + $0x120] sm:$0xff]  ;;  %v4625_v13 = vld [vmem:[%s5893_s9 + $0x128] sm:$0xff]  ;;  %v4659_v60 = vld [vmem:[%s5887_s30 + $0x170] sm:$0xff] }
  0x3d   : > { %5587 = vmatprep.subr.bf16.mxu1 %v5825_v0  ;;  %5108 = vmatprep.mubr.msk.f32.mxu0 %vm5826_vm0, %v5827_v1 }
  0x3e   : > { %5119 = vmatprep.mubr.msk.f32.mxu1 %vm5826_vm0, %v5827_v1 }
  0x3f   : > { %5583 = vmatpush3.bf16.msra.mxu0 %v5582_v20  ;;  %v4555_v20 = vld [vmem:[%s5907_s13 + $0xc] sm:$0x3] }
  0x40   : > { %5589 = vmatpush3.bf16.msra.mxu1 %v5588_v21  ;;  %5590 = vmatprep.subr.bf16.mxu0 %v5825_v0  ;;  %v5639_v21 = vpack.c.bf16 %v4568_v17, %v4567_v16  ;;  %v4612_v16 = vld [vmem:[%s5907_s13 + $0x12] sm:$0x3]  ;;  %v5693_v17 = vpack.c.bf16 %v4625_v13, %v4624_v12  ;;  %v4674_v13 = vld [vmem:[%s5880_s27 + $0x198] sm:$0xff] }
  0x41   : > { %5596 = vmatprep.subr.bf16.mxu1 %v5825_v0  ;;  %v4673_v12 = vld [vmem:[%s5880_s27 + $0x190] sm:$0xff] }
  0x42   : > { %5109 = vmatmul.mubr.msk.f32.vlgmr.msra.gmra.mrb[10].mxu0 %vm372_vm1, %v4499_v22  ;;  %v4556_v22 = vld [vmem:[%s5916_s16 + $0xc] sm:$0x3] }
  0x43   : > { %5120 = vmatmul.mubr.msk.f32.vlgmr.msra.gmra.mrb[10].mxu1 %vm372_vm1, %v1259_v27  ;;  %5592 = vmatpush3.bf16.msra.mxu0 %v5591_v28  ;;  %v4579_v27 = vld [vmem:[%s5880_s27 + $0xf8] sm:$0xff]  ;;  %v5642_v28 = vpack.c.bf16 %v4570_v25, %v4569_v24  ;;  %v4613_v24 = vld [vmem:[%s5916_s16 + $0x12] sm:$0x3]  ;;  %v4633_v25 = vld [vmem:[%s5880_s27 + $0x140] sm:$0xff] }
  0x44   : > { %5598 = vmatpush3.bf16.msra.mxu1 %v5597_v29  ;;  %5593 = vmatprep.subr.bf16.mxu0 %v5825_v0  ;;  %v5648_v29 = vpack.c.bf16 %v4579_v27, %v4578_v26  ;;  %v4634_v26 = vld [vmem:[%s5880_s27 + $0x148] sm:$0xff]  ;;  %v4638_v27 = vld [vmem:[%s5887_s30 + $0x140] sm:$0xff] }
  0x45   : > { %5599 = vmatprep.subr.bf16.mxu1 %v5825_v0  ;;  %5141 = vmatprep.mubr.msk.f32.mxu1 %vm5826_vm0, %v5827_v1 }
  0x46   : > { %5130 = vmatprep.mubr.msk.f32.mxu0 %vm5826_vm0, %v5827_v1 }
  0x47   : > { %5595 = vmatpush3.bf16.msra.mxu0 %v5594_v34  ;;  %v1997_v34 = vadd.f32 %v4556_v22, %v4555_v20 }
  0x48   : > { %5601 = vmatpush3.bf16.msra.mxu1 %v5600_v35  ;;  %5602 = vmatprep.subr.bf16.mxu0 %v5825_v0  ;;  %v5651_v35 = vpack.c.bf16 %v4582_v31, %v4581_v30  ;;  %v5699_v30 = vpack.c.bf16 %v4634_v26, %v4633_v25  ;;  %v4683_v26 = vld [vmem:[%s5893_s9 + $0x190] sm:$0xff] }
  0x49   : > { %5608 = vmatprep.subr.bf16.mxu1 %v5825_v0 }
  0x4a   : > { %5131 = vmatmul.mubr.msk.f32.vlgmr.msra.gmra.mrb[12].mxu0 %vm372_vm1, %v4517_v40  ;;  %v4588_v40 = vld [vmem:[%s5893_s9 + $0xf0] sm:$0xff] }
  0x4b   : > { %5142 = vmatmul.mubr.msk.f32.vlgmr.msra.gmra.mrb[12].mxu1 %vm372_vm1, %v4518_v42  ;;  %5604 = vmatpush3.bf16.msra.mxu0 %v5603_v41  ;;  %v4589_v41 = vld [vmem:[%s5893_s9 + $0xf8] sm:$0xff]  ;;  %v5654_v42 = vpack.c.bf16 %v4584_v39, %v4583_v38  ;;  %v4643_v38 = vld [vmem:[%s5893_s9 + $0x140] sm:$0xff]  ;;  %v4644_v39 = vld [vmem:[%s5893_s9 + $0x148] sm:$0xff] }
  0x4c   : > { %5610 = vmatpush3.bf16.msra.mxu1 %v5609_v43  ;;  %5605 = vmatprep.subr.bf16.mxu0 %v5825_v0  ;;  %v5660_v43 = vpack.c.bf16 %v4589_v41, %v4588_v40  ;;  %v4652_v40 = vld [vmem:[%s5880_s27 + $0x160] sm:$0xff]  ;;  %v4653_v41 = vld [vmem:[%s5880_s27 + $0x168] sm:$0xff] }
  0x4d   : > { %5611 = vmatprep.subr.bf16.mxu1 %v5825_v0  ;;  %5152 = vmatprep.mubr.msk.f32.mxu0 %vm5826_vm0, %v5827_v1  ;;  %v5717_v45 = vpack.c.bf16 %v4653_v41, %v4652_v40  ;;  %v4697_v40 = vld [vmem:[%s5887_s30 + $0x1b0] sm:$0xff]  ;;  %v4698_v41 = vld [vmem:[%s5887_s30 + $0x1b8] sm:$0xff] }
  0x4e   : > { %5163 = vmatprep.mubr.msk.f32.mxu1 %vm5826_vm0, %v5827_v1 }
  0x4f   : > { %5607 = vmatpush3.bf16.msra.mxu0 %v5606_v48  ;;  %v4601_v48 = vld [vmem:[%s5887_s30 + $0x108] sm:$0xff] }
  0x50   : > { %5613 = vmatpush3.bf16.msra.mxu1 %v5612_v49  ;;  %5614 = vmatprep.subr.bf16.mxu0 %v5825_v0  ;;  %v2243_v49 = vadd.f32 %v4575_v44, %v4574_v36  ;;  %v5669_v51 = vpack.c.bf16 %v4601_v48, %v4600_v47  ;;  %v4646_v47 = vld [vmem:[%s5893_s9 + $0x158] sm:$0xff]  ;;  %v4654_v48 = vld [vmem:[%s5880_s27 + $0x170] sm:$0xff] }
  0x51   : > { %5620 = vmatprep.subr.bf16.mxu1 %v5825_v0 }
  0x52   : > { %5153 = vmatmul.mubr.msk.f32.vlgmr.msra.gmra.mrb[14].mxu0 %vm372_vm1, %v1505_v54  ;;  %v4602_v54 = vld [vmem:[%s5887_s30 + $0x110] sm:$0xff] }
  0x53   : > { %5164 = vmatmul.mubr.msk.f32.vlgmr.msra.gmra.mrb[14].mxu1 %vm372_vm1, %v4536_v56  ;;  %5616 = vmatpush3.bf16.msra.mxu0 %v5615_v55  ;;  %v4603_v55 = vld [vmem:[%s5887_s30 + $0x118] sm:$0xff]  ;;  %v5666_v56 = vpack.c.bf16 %v4598_v53, %v4597_v52  ;;  %v4657_v52 = vld [vmem:[%s5887_s30 + $0x160] sm:$0xff]  ;;  %v4658_v53 = vld [vmem:[%s5887_s30 + $0x168] sm:$0xff] }
  0x54   : > { %5622 = vmatpush3.bf16.msra.mxu1 %v5621_v57  ;;  %5617 = vmatprep.subr.bf16.mxu0 %v5825_v0  ;;  %v5672_v57 = vpack.c.bf16 %v4603_v55, %v4602_v54  ;;  %v4662_v54 = vld [vmem:[%s5893_s9 + $0x160] sm:$0xff]  ;;  %v4663_v55 = vld [vmem:[%s5893_s9 + $0x168] sm:$0xff] }
  0x55   : > { %5623 = vmatprep.subr.bf16.mxu1 %v5825_v0  ;;  %5174 = vmatprep.mubr.msk.f32.mxu0 %vm5826_vm0, %v5827_v1 }
  0x56   : > { %5185 = vmatprep.mubr.msk.f32.mxu1 %vm5826_vm0, %v5827_v1 }
  0x57   : > { %5619 = vmatpush3.bf16.msra.mxu0 %v5618_v62  ;;  %v4593_v62 = vld [vmem:[%s5907_s13 + $0x10] sm:$0x3] }
  0x58   : > { %5625 = vmatpush3.bf16.msra.mxu1 %v5624_v63  ;;  %5626 = vmatprep.subr.bf16.mxu0 %v5825_v0  ;;  %v5675_v63 = vpack.c.bf16 %v4606_v59, %v4605_v58  ;;  %v4650_v58 = vld [vmem:[%s5907_s13 + $0x16] sm:$0x3]  ;;  %v5729_v59 = vpack.c.bf16 %v4663_v55, %v4662_v54  ;;  %v4712_v55 = vld [vmem:[%s5880_s27 + $0x1d8] sm:$0xff] }
  0x59   : > { %5632 = vmatprep.subr.bf16.mxu1 %v5825_v0  ;;  %v4711_v54 = vld [vmem:[%s5880_s27 + $0x1d0] sm:$0xff] }
  0x5a   : > { %5175 = vmatmul.mubr.msk.f32.vlgmr.msra.gmra.mrb[16].mxu0 %vm372_vm1, %v4537_v2  ;;  %v4594_v2 = vld [vmem:[%s5916_s16 + $0x10] sm:$0x3] }
  0x5b   : > { %5186 = vmatmul.mubr.msk.f32.vlgmr.msra.gmra.mrb[16].mxu1 %vm372_vm1, %v1751_v7  ;;  %5628 = vmatpush3.bf16.msra.mxu0 %v5627_v8  ;;  %v4617_v7 = vld [vmem:[%s5880_s27 + $0x138] sm:$0xff]  ;;  %v5678_v8 = vpack.c.bf16 %v4608_v5, %v4607_v4  ;;  %v4651_v4 = vld [vmem:[%s5916_s16 + $0x16] sm:$0x3]  ;;  %v4671_v5 = vld [vmem:[%s5880_s27 + $0x180] sm:$0xff] }
  0x5c   : > { %5634 = vmatpush3.bf16.msra.mxu1 %v5633_v9  ;;  %5629 = vmatprep.subr.bf16.mxu0 %v5825_v0  ;;  %v5684_v9 = vpack.c.bf16 %v4617_v7, %v4616_v6  ;;  %v4672_v6 = vld [vmem:[%s5880_s27 + $0x188] sm:$0xff]  ;;  %v4676_v7 = vld [vmem:[%s5887_s30 + $0x180] sm:$0xff] }
  0x5d   : > { %5635 = vmatprep.subr.bf16.mxu1 %v5825_v0  ;;  %5207 = vmatprep.mubr.msk.f32.mxu1 %vm5826_vm0, %v5827_v1 }
  0x5e   : > { %5196 = vmatprep.mubr.msk.f32.mxu0 %vm5826_vm0, %v5827_v1 }
  0x5f   : > { %5631 = vmatpush3.bf16.msra.mxu0 %v5630_v14  ;;  %v2489_v14 = vadd.f32 %v4594_v2, %v4593_v62 }
  0x60   : > { %5637 = vmatpush3.bf16.msra.mxu1 %v5636_v15  ;;  %5638 = vmatprep.subr.bf16.mxu0 %v5825_v0  ;;  %v5687_v15 = vpack.c.bf16 %v4620_v11, %v4619_v10  ;;  %v5735_v10 = vpack.c.bf16 %v4672_v6, %v4671_v5  ;;  %v4721_v6 = vld [vmem:[%s5893_s9 + $0x1d0] sm:$0xff] }
  0x61   : > { %5644 = vmatprep.subr.bf16.mxu1 %v5825_v0 }
  0x62   : > { %5197 = vmatmul.mubr.msk.f32.vlgmr.msra.gmra.mrb[18].mxu0 %vm372_vm1, %v4555_v20  ;;  %v4626_v20 = vld [vmem:[%s5893_s9 + $0x130] sm:$0xff] }
  0x63   : > { %5208 = vmatmul.mubr.msk.f32.vlgmr.msra.gmra.mrb[18].mxu1 %vm372_vm1, %v4556_v22  ;;  %5640 = vmatpush3.bf16.msra.mxu0 %v5639_v21  ;;  %v4627_v21 = vld [vmem:[%s5893_s9 + $0x138] sm:$0xff]  ;;  %v5690_v22 = vpack.c.bf16 %v4622_v19, %v4621_v18  ;;  %v4681_v18 = vld [vmem:[%s5893_s9 + $0x180] sm:$0xff]  ;;  %v4682_v19 = vld [vmem:[%s5893_s9 + $0x188] sm:$0xff] }
  0x64   : > { %5646 = vmatpush3.bf16.msra.mxu1 %v5645_v23  ;;  %5641 = vmatprep.subr.bf16.mxu0 %v5825_v0  ;;  %v5696_v23 = vpack.c.bf16 %v4627_v21, %v4626_v20  ;;  %v4690_v20 = vld [vmem:[%s5880_s27 + $0x1a0] sm:$0xff]  ;;  %v4691_v21 = vld [vmem:[%s5880_s27 + $0x1a8] sm:$0xff] }
  0x65   : > { %5647 = vmatprep.subr.bf16.mxu1 %v5825_v0  ;;  %5218 = vmatprep.mubr.msk.f32.mxu0 %vm5826_vm0, %v5827_v1  ;;  %v5753_v25 = vpack.c.bf16 %v4691_v21, %v4690_v20  ;;  %v4735_v20 = vld [vmem:[%s5887_s30 + $0x1f0] sm:$0xff]  ;;  %v4736_v21 = vld [vmem:[%s5887_s30 + $0x1f8] sm:$0xff] }
  0x66   : > { %5229 = vmatprep.mubr.msk.f32.mxu1 %vm5826_vm0, %v5827_v1 }
  0x67   : > { %5643 = vmatpush3.bf16.msra.mxu0 %v5642_v28  ;;  %v4639_v28 = vld [vmem:[%s5887_s30 + $0x148] sm:$0xff] }
  0x68   : > { %5649 = vmatpush3.bf16.msra.mxu1 %v5648_v29  ;;  %5650 = vmatprep.subr.bf16.mxu0 %v5825_v0  ;;  %v2735_v29 = vadd.f32 %v4613_v24, %v4612_v16  ;;  %v5705_v31 = vpack.c.bf16 %v4639_v28, %v4638_v27  ;;  %v4684_v27 = vld [vmem:[%s5893_s9 + $0x198] sm:$0xff]  ;;  %v4692_v28 = vld [vmem:[%s5880_s27 + $0x1b0] sm:$0xff] }
  0x69   : > { %5656 = vmatprep.subr.bf16.mxu1 %v5825_v0 }
  0x6a   : > { %5219 = vmatmul.mubr.msk.f32.vlgmr.msra.gmra.mrb[20].mxu0 %vm372_vm1, %v1997_v34  ;;  %v4640_v34 = vld [vmem:[%s5887_s30 + $0x150] sm:$0xff] }
  0x6b   : > { %5230 = vmatmul.mubr.msk.f32.vlgmr.msra.gmra.mrb[20].mxu1 %vm372_vm1, %v4574_v36  ;;  %5652 = vmatpush3.bf16.msra.mxu0 %v5651_v35  ;;  %v4641_v35 = vld [vmem:[%s5887_s30 + $0x158] sm:$0xff]  ;;  %v5702_v36 = vpack.c.bf16 %v4636_v33, %v4635_v32  ;;  %v4695_v32 = vld [vmem:[%s5887_s30 + $0x1a0] sm:$0xff]  ;;  %v4696_v33 = vld [vmem:[%s5887_s30 + $0x1a8] sm:$0xff] }
  0x6c   : > { %5658 = vmatpush3.bf16.msra.mxu1 %v5657_v37  ;;  %5653 = vmatprep.subr.bf16.mxu0 %v5825_v0  ;;  %v5708_v37 = vpack.c.bf16 %v4641_v35, %v4640_v34  ;;  %v4700_v34 = vld [vmem:[%s5893_s9 + $0x1a0] sm:$0xff]  ;;  %v4701_v35 = vld [vmem:[%s5893_s9 + $0x1a8] sm:$0xff] }
  0x6d   : > { %5659 = vmatprep.subr.bf16.mxu1 %v5825_v0  ;;  %5240 = vmatprep.mubr.msk.f32.mxu0 %vm5826_vm0, %v5827_v1 }
  0x6e   : > { %5251 = vmatprep.mubr.msk.f32.mxu1 %vm5826_vm0, %v5827_v1 }
  0x6f   : > { %5655 = vmatpush3.bf16.msra.mxu0 %v5654_v42  ;;  %v4631_v42 = vld [vmem:[%s5907_s13 + $0x14] sm:$0x3] }
  0x70   : > { %5661 = vmatpush3.bf16.msra.mxu1 %v5660_v43  ;;  %5662 = vmatprep.subr.bf16.mxu0 %v5825_v0  ;;  %v5711_v43 = vpack.c.bf16 %v4644_v39, %v4643_v38  ;;  %v4688_v38 = vld [vmem:[%s5907_s13 + $0x1a] sm:$0x3]  ;;  %v5765_v39 = vpack.c.bf16 %v4701_v35, %v4700_v34 }
  0x71   : > { %5668 = vmatprep.subr.bf16.mxu1 %v5825_v0 }
  0x72   : > { %5241 = vmatmul.mubr.msk.f32.vlgmr.msra.gmra.mrb[22].mxu0 %vm372_vm1, %v4575_v44  ;;  %v4632_v44 = vld [vmem:[%s5916_s16 + $0x14] sm:$0x3] }
  0x73   : > { %5252 = vmatmul.mubr.msk.f32.vlgmr.msra.gmra.mrb[22].mxu1 %vm372_vm1, %v2243_v49  ;;  %5664 = vmatpush3.bf16.msra.mxu0 %v5663_v50  ;;  %v4655_v49 = vld [vmem:[%s5880_s27 + $0x178] sm:$0xff]  ;;  %v5714_v50 = vpack.c.bf16 %v4646_v47, %v4645_v46  ;;  %v4709_v47 = vld [vmem:[%s5880_s27 + $0x1c0] sm:$0xff] }
  0x74   : > { %5670 = vmatpush3.bf16.msra.mxu1 %v5669_v51  ;;  %5665 = vmatprep.subr.bf16.mxu0 %v5825_v0  ;;  %v5720_v51 = vpack.c.bf16 %v4655_v49, %v4654_v48  ;;  %v4689_v46 = vld [vmem:[%s5916_s16 + $0x1a] sm:$0x3]  ;;  %v4710_v48 = vld [vmem:[%s5880_s27 + $0x1c8] sm:$0xff]  ;;  %v4714_v49 = vld [vmem:[%s5887_s30 + $0x1c0] sm:$0xff] }
  0x75   : > { %5671 = vmatprep.subr.bf16.mxu1 %v5825_v0  ;;  %5273 = vmatprep.mubr.msk.f32.mxu1 %vm5826_vm0, %v5827_v1 }
  0x76   : > { %5262 = vmatprep.mubr.msk.f32.mxu0 %vm5826_vm0, %v5827_v1 }
  0x77   : > { %5667 = vmatpush3.bf16.msra.mxu0 %v5666_v56  ;;  %v2981_v56 = vadd.f32 %v4632_v44, %v4631_v42 }
  0x78   : > { %5673 = vmatpush3.bf16.msra.mxu1 %v5672_v57  ;;  %5674 = vmatprep.subr.bf16.mxu0 %v5825_v0  ;;  %v5723_v57 = vpack.c.bf16 %v4658_v53, %v4657_v52  ;;  %v5771_v52 = vpack.c.bf16 %v4710_v48, %v4709_v47 }
  0x79   : > { %5680 = vmatprep.subr.bf16.mxu1 %v5825_v0 }
  0x7a   : > { %5263 = vmatmul.mubr.msk.f32.vlgmr.msra.gmra.mrb[24].mxu0 %vm372_vm1, %v4593_v62  ;;  %v4664_v62 = vld [vmem:[%s5893_s9 + $0x170] sm:$0xff] }
  0x7b   : > { %5274 = vmatmul.mubr.msk.f32.vlgmr.msra.gmra.mrb[24].mxu1 %vm372_vm1, %v4594_v2  ;;  %5676 = vmatpush3.bf16.msra.mxu0 %v5675_v63  ;;  %v4665_v63 = vld [vmem:[%s5893_s9 + $0x178] sm:$0xff]  ;;  %v5726_v2 = vpack.c.bf16 %v4660_v61, %v4659_v60  ;;  %v4719_v60 = vld [vmem:[%s5893_s9 + $0x1c0] sm:$0xff]  ;;  %v4720_v61 = vld [vmem:[%s5893_s9 + $0x1c8] sm:$0xff] }
  0x7c   : > { %5682 = vmatpush3.bf16.msra.mxu1 %v5681_v3  ;;  %5677 = vmatprep.subr.bf16.mxu0 %v5825_v0  ;;  %v5732_v3 = vpack.c.bf16 %v4665_v63, %v4664_v62  ;;  %v4728_v62 = vld [vmem:[%s5880_s27 + $0x1e0] sm:$0xff]  ;;  %v4729_v63 = vld [vmem:[%s5880_s27 + $0x1e8] sm:$0xff] }
  0x7d   : > { %5683 = vmatprep.subr.bf16.mxu1 %v5825_v0  ;;  %5284 = vmatprep.mubr.msk.f32.mxu0 %vm5826_vm0, %v5827_v1  ;;  %v5789_v5 = vpack.c.bf16 %v4729_v63, %v4728_v62 }
  0x7e   : > { %5295 = vmatprep.mubr.msk.f32.mxu1 %vm5826_vm0, %v5827_v1 }
  0x7f   : > { %5679 = vmatpush3.bf16.msra.mxu0 %v5678_v8  ;;  %v4677_v8 = vld [vmem:[%s5887_s30 + $0x188] sm:$0xff] }
  0x80   : > { %5685 = vmatpush3.bf16.msra.mxu1 %v5684_v9  ;;  %5686 = vmatprep.subr.bf16.mxu0 %v5825_v0  ;;  %v3227_v9 = vadd.f32 %v4651_v4, %v4650_v58  ;;  %v5741_v11 = vpack.c.bf16 %v4677_v8, %v4676_v7  ;;  %v4722_v7 = vld [vmem:[%s5893_s9 + $0x1d8] sm:$0xff]  ;;  %v4730_v8 = vld [vmem:[%s5880_s27 + $0x1f0] sm:$0xff] }
  0x81   : > { %5692 = vmatprep.subr.bf16.mxu1 %v5825_v0 }
  0x82   : > { %5285 = vmatmul.mubr.msk.f32.vlgmr.msra.gmra.mrb[26].mxu0 %vm372_vm1, %v2489_v14  ;;  %v4678_v14 = vld [vmem:[%s5887_s30 + $0x190] sm:$0xff] }
  0x83   : > { %5296 = vmatmul.mubr.msk.f32.vlgmr.msra.gmra.mrb[26].mxu1 %vm372_vm1, %v4612_v16  ;;  %5688 = vmatpush3.bf16.msra.mxu0 %v5687_v15  ;;  %v4679_v15 = vld [vmem:[%s5887_s30 + $0x198] sm:$0xff]  ;;  %v5738_v16 = vpack.c.bf16 %v4674_v13, %v4673_v12  ;;  %v4733_v12 = vld [vmem:[%s5887_s30 + $0x1e0] sm:$0xff]  ;;  %v4734_v13 = vld [vmem:[%s5887_s30 + $0x1e8] sm:$0xff] }
  0x84   : > { %5694 = vmatpush3.bf16.msra.mxu1 %v5693_v17  ;;  %5689 = vmatprep.subr.bf16.mxu0 %v5825_v0  ;;  %v5744_v17 = vpack.c.bf16 %v4679_v15, %v4678_v14  ;;  %v4738_v14 = vld [vmem:[%s5893_s9 + $0x1e0] sm:$0xff]  ;;  %v4739_v15 = vld [vmem:[%s5893_s9 + $0x1e8] sm:$0xff] }
  0x85   : > { %5695 = vmatprep.subr.bf16.mxu1 %v5825_v0  ;;  %5306 = vmatprep.mubr.msk.f32.mxu0 %vm5826_vm0, %v5827_v1 }
  0x86   : > { %5317 = vmatprep.mubr.msk.f32.mxu1 %vm5826_vm0, %v5827_v1 }
  0x87   : > { %5691 = vmatpush3.bf16.msra.mxu0 %v5690_v22  ;;  %v4669_v22 = vld [vmem:[%s5907_s13 + $0x18] sm:$0x3] }
  0x88   : > { %5697 = vmatpush3.bf16.msra.mxu1 %v5696_v23  ;;  %5698 = vmatprep.subr.bf16.mxu0 %v5825_v0  ;;  %v5747_v23 = vpack.c.bf16 %v4682_v19, %v4681_v18  ;;  %v4726_v18 = vld [vmem:[%s5907_s13 + $0x1e] sm:$0x3]  ;;  %v5801_v19 = vpack.c.bf16 %v4739_v15, %v4738_v14 }
  0x89   : > { %5704 = vmatprep.subr.bf16.mxu1 %v5825_v0 }
  0x8a   : > { %5307 = vmatmul.mubr.msk.f32.vlgmr.msra.gmra.mrb[28].mxu0 %vm372_vm1, %v4613_v24  ;;  %v4670_v24 = vld [vmem:[%s5916_s16 + $0x18] sm:$0x3] }
  0x8b   : > { %5318 = vmatmul.mubr.msk.f32.vlgmr.msra.gmra.mrb[28].mxu1 %vm372_vm1, %v2735_v29  ;;  %5700 = vmatpush3.bf16.msra.mxu0 %v5699_v30  ;;  %v4693_v29 = vld [vmem:[%s5880_s27 + $0x1b8] sm:$0xff]  ;;  %v5750_v30 = vpack.c.bf16 %v4684_v27, %v4683_v26 }
  0x8c   : > { %5706 = vmatpush3.bf16.msra.mxu1 %v5705_v31  ;;  %5701 = vmatprep.subr.bf16.mxu0 %v5825_v0  ;;  %v5756_v31 = vpack.c.bf16 %v4693_v29, %v4692_v28  ;;  %v4727_v26 = vld [vmem:[%s5916_s16 + $0x1e] sm:$0x3] }
  0x8d   : > { %5707 = vmatprep.subr.bf16.mxu1 %v5825_v0  ;;  %5339 = vmatprep.mubr.msk.f32.mxu1 %vm5826_vm0, %v5827_v1  ;;  %v4211_v27 = vadd.f32 %v4727_v26, %v4726_v18 }
  0x8e   : > { %5328 = vmatprep.mubr.msk.f32.mxu0 %vm5826_vm0, %v5827_v1 }
  0x8f   : > { %5703 = vmatpush3.bf16.msra.mxu0 %v5702_v36  ;;  %v3473_v36 = vadd.f32 %v4670_v24, %v4669_v22 }
  0x90   : > { %5709 = vmatpush3.bf16.msra.mxu1 %v5708_v37  ;;  %5710 = vmatprep.subr.bf16.mxu0 %v5825_v0  ;;  %v5759_v37 = vpack.c.bf16 %v4696_v33, %v4695_v32 }
  0x91   : > { %5716 = vmatprep.subr.bf16.mxu1 %v5825_v0 }
  0x92   : > { %5329 = vmatmul.mubr.msk.f32.vlgmr.msra.gmra.mrb[30].mxu0 %vm372_vm1, %v4631_v42  ;;  %v4702_v42 = vld [vmem:[%s5893_s9 + $0x1b0] sm:$0xff] }
  0x93   : > { %5340 = vmatmul.mubr.msk.f32.vlgmr.msra.gmra.mrb[30].mxu1 %vm372_vm1, %v4632_v44  ;;  %5712 = vmatpush3.bf16.msra.mxu0 %v5711_v43  ;;  %v4703_v43 = vld [vmem:[%s5893_s9 + $0x1b8] sm:$0xff]  ;;  %v5762_v44 = vpack.c.bf16 %v4698_v41, %v4697_v40 }
  0x94   : > { %5718 = vmatpush3.bf16.msra.mxu1 %v5717_v45  ;;  %5713 = vmatprep.subr.bf16.mxu0 %v5825_v0  ;;  %v5768_v45 = vpack.c.bf16 %v4703_v43, %v4702_v42 }
  0x95   : > { %5719 = vmatprep.subr.bf16.mxu1 %v5825_v0  ;;  %5350 = vmatprep.mubr.msk.f32.mxu0 %vm5826_vm0, %v5827_v1 }
  0x96   : > { %5361 = vmatprep.mubr.msk.f32.mxu1 %vm5826_vm0, %v5827_v1 }
  0x97   : > { %5715 = vmatpush3.bf16.msra.mxu0 %v5714_v50  ;;  %v4715_v50 = vld [vmem:[%s5887_s30 + $0x1c8] sm:$0xff] }
  0x98   : > { %5721 = vmatpush3.bf16.msra.mxu1 %v5720_v51  ;;  %5722 = vmatprep.subr.bf16.mxu0 %v5825_v0  ;;  %v3719_v51 = vadd.f32 %v4689_v46, %v4688_v38  ;;  %v5777_v53 = vpack.c.bf16 %v4715_v50, %v4714_v49 }
  0x99   : > { %5728 = vmatprep.subr.bf16.mxu1 %v5825_v0 }
  0x9a   : > { %5351 = vmatmul.mubr.msk.f32.vlgmr.msra.gmra.mrb[32].mxu0 %vm372_vm1, %v2981_v56  ;;  %v4716_v56 = vld [vmem:[%s5887_s30 + $0x1d0] sm:$0xff] }
  0x9b   : > { %5362 = vmatmul.mubr.msk.f32.vlgmr.msra.gmra.mrb[32].mxu1 %vm372_vm1, %v4650_v58  ;;  %5724 = vmatpush3.bf16.msra.mxu0 %v5723_v57  ;;  %v4717_v57 = vld [vmem:[%s5887_s30 + $0x1d8] sm:$0xff]  ;;  %v5774_v58 = vpack.c.bf16 %v4712_v55, %v4711_v54 }
  0x9c   : > { %5730 = vmatpush3.bf16.msra.mxu1 %v5729_v59  ;;  %5725 = vmatprep.subr.bf16.mxu0 %v5825_v0  ;;  %v5780_v59 = vpack.c.bf16 %v4717_v57, %v4716_v56 }
  0x9d   : > { %5731 = vmatprep.subr.bf16.mxu1 %v5825_v0  ;;  %5372 = vmatprep.mubr.msk.f32.mxu0 %vm5826_vm0, %v5827_v1 }
  0x9e   : > { %5383 = vmatprep.mubr.msk.f32.mxu1 %vm5826_vm0, %v5827_v1 }
  0x9f   : > { %5727 = vmatpush3.bf16.msra.mxu0 %v5726_v2  ;;  %v4707_v2 = vld [vmem:[%s5907_s13 + $0x1c] sm:$0x3] }
  0xa0   : > { %5733 = vmatpush3.bf16.msra.mxu1 %v5732_v3  ;;  %5734 = vmatprep.subr.bf16.mxu0 %v5825_v0  ;;  %v5783_v3 = vpack.c.bf16 %v4720_v61, %v4719_v60 }
  0xa1   : > { %5740 = vmatprep.subr.bf16.mxu1 %v5825_v0 }
  0xa2   : > { %5373 = vmatmul.mubr.msk.f32.vlgmr.msra.gmra.mrb[34].mxu0 %vm372_vm1, %v4651_v4  ;;  %v4708_v4 = vld [vmem:[%s5916_s16 + $0x1c] sm:$0x3] }
  0xa3   : > { %5384 = vmatmul.mubr.msk.f32.vlgmr.msra.gmra.mrb[34].mxu1 %vm372_vm1, %v3227_v9  ;;  %5736 = vmatpush3.bf16.msra.mxu0 %v5735_v10  ;;  %v4731_v9 = vld [vmem:[%s5880_s27 + $0x1f8] sm:$0xff]  ;;  %v5786_v10 = vpack.c.bf16 %v4722_v7, %v4721_v6 }
  0xa4   : > { %5742 = vmatpush3.bf16.msra.mxu1 %v5741_v11  ;;  %5737 = vmatprep.subr.bf16.mxu0 %v5825_v0  ;;  %v5792_v11 = vpack.c.bf16 %v4731_v9, %v4730_v8 }
  0xa5   : > { %5743 = vmatprep.subr.bf16.mxu1 %v5825_v0  ;;  %5405 = vmatprep.mubr.msk.f32.mxu1 %vm5826_vm0, %v5827_v1 }
  0xa6   : > { %5394 = vmatprep.mubr.msk.f32.mxu0 %vm5826_vm0, %v5827_v1 }
  0xa7   : > { %5739 = vmatpush3.bf16.msra.mxu0 %v5738_v16  ;;  %v3965_v16 = vadd.f32 %v4708_v4, %v4707_v2 }
  0xa8   : > { %5745 = vmatpush3.bf16.msra.mxu1 %v5744_v17  ;;  %5746 = vmatprep.subr.bf16.mxu0 %v5825_v0  ;;  %v5795_v17 = vpack.c.bf16 %v4734_v13, %v4733_v12 }
  0xa9   : > { %5752 = vmatprep.subr.bf16.mxu1 %v5825_v0 }
  0xaa   : > { %5395 = vmatmul.mubr.msk.f32.vlgmr.msra.gmra.mrb[36].mxu0 %vm372_vm1, %v4669_v22  ;;  %v4740_v22 = vld [vmem:[%s5893_s9 + $0x1f0] sm:$0xff] }
  0xab   : > { %5406 = vmatmul.mubr.msk.f32.vlgmr.msra.gmra.mrb[36].mxu1 %vm372_vm1, %v4670_v24  ;;  %5748 = vmatpush3.bf16.msra.mxu0 %v5747_v23  ;;  %v4741_v23 = vld [vmem:[%s5893_s9 + $0x1f8] sm:$0xff]  ;;  %v5798_v24 = vpack.c.bf16 %v4736_v21, %v4735_v20 }
  0xac   : > { %5754 = vmatpush3.bf16.msra.mxu1 %v5753_v25  ;;  %5749 = vmatprep.subr.bf16.mxu0 %v5825_v0  ;;  %v5804_v25 = vpack.c.bf16 %v4741_v23, %v4740_v22 }
  0xad   : > { %5755 = vmatprep.subr.bf16.mxu1 %v5825_v0  ;;  %5416 = vmatprep.mubr.msk.f32.mxu0 %vm5826_vm0, %v5827_v1 }
  0xae   : > { %5427 = vmatprep.mubr.msk.f32.mxu1 %vm5826_vm0, %v5827_v1 }
  0xaf   : > { %5751 = vmatpush3.bf16.msra.mxu0 %v5750_v30 }
  0xb0   : > { %5757 = vmatpush3.bf16.msra.mxu1 %v5756_v31  ;;  %5758 = vmatprep.subr.bf16.mxu0 %v5825_v0 }
  0xb1   : > { %5764 = vmatprep.subr.bf16.mxu1 %v5825_v0 }
  0xb2   : > { %5417 = vmatmul.mubr.msk.f32.vlgmr.msra.gmra.mrb[38].mxu0 %vm372_vm1, %v3473_v36 }
  0xb3   : > { %5428 = vmatmul.mubr.msk.f32.vlgmr.msra.gmra.mrb[38].mxu1 %vm372_vm1, %v4688_v38  ;;  %5760 = vmatpush3.bf16.msra.mxu0 %v5759_v37 }
  0xb4   : > { %5766 = vmatpush3.bf16.msra.mxu1 %v5765_v39  ;;  %5761 = vmatprep.subr.bf16.mxu0 %v5825_v0 }
  0xb5   : > { %5767 = vmatprep.subr.bf16.mxu1 %v5825_v0  ;;  %5438 = vmatprep.mubr.msk.f32.mxu0 %vm5826_vm0, %v5827_v1 }
  0xb6   : > { %5449 = vmatprep.mubr.msk.f32.mxu1 %vm5826_vm0, %v5827_v1 }
  0xb7   : > { %5763 = vmatpush3.bf16.msra.mxu0 %v5762_v44 }
  0xb8   : > { %5769 = vmatpush3.bf16.msra.mxu1 %v5768_v45  ;;  %5770 = vmatprep.subr.bf16.mxu0 %v5825_v0 }
  0xb9   : > { %5776 = vmatprep.subr.bf16.mxu1 %v5825_v0 }
  0xba   : > { %5439 = vmatmul.mubr.msk.f32.vlgmr.msra.gmra.mrb[40].mxu0 %vm372_vm1, %v4689_v46 }
  0xbb   : > { %5450 = vmatmul.mubr.msk.f32.vlgmr.msra.gmra.mrb[40].mxu1 %vm372_vm1, %v3719_v51  ;;  %5772 = vmatpush3.bf16.msra.mxu0 %v5771_v52 }
  0xbc   : > { %5778 = vmatpush3.bf16.msra.mxu1 %v5777_v53  ;;  %5773 = vmatprep.subr.bf16.mxu0 %v5825_v0 }
  0xbd   : > { %5779 = vmatprep.subr.bf16.mxu1 %v5825_v0  ;;  %5471 = vmatprep.mubr.msk.f32.mxu1 %vm5826_vm0, %v5827_v1 }
  0xbe   : > { %5460 = vmatprep.mubr.msk.f32.mxu0 %vm5826_vm0, %v5827_v1 }
  0xbf   : > { %5775 = vmatpush3.bf16.msra.mxu0 %v5774_v58 }
  0xc0   : > { %5781 = vmatpush3.bf16.msra.mxu1 %v5780_v59  ;;  %5782 = vmatprep.subr.bf16.mxu0 %v5825_v0 }
  0xc1   : > { %5788 = vmatprep.subr.bf16.mxu1 %v5825_v0 }
  0xc2   : > { %5461 = vmatmul.mubr.msk.f32.vlgmr.msra.gmra.mrb[42].mxu0 %vm372_vm1, %v4707_v2 }
  0xc3   : > { %5472 = vmatmul.mubr.msk.f32.vlgmr.msra.gmra.mrb[42].mxu1 %vm372_vm1, %v4708_v4  ;;  %5784 = vmatpush3.bf16.msra.mxu0 %v5783_v3 }
  0xc4   : > { %5790 = vmatpush3.bf16.msra.mxu1 %v5789_v5  ;;  %5785 = vmatprep.subr.bf16.mxu0 %v5825_v0 }
  0xc5   : > { %5791 = vmatprep.subr.bf16.mxu1 %v5825_v0  ;;  %5482 = vmatprep.mubr.msk.f32.mxu0 %vm5826_vm0, %v5827_v1 }
  0xc6   : > { %5493 = vmatprep.mubr.msk.f32.mxu1 %vm5826_vm0, %v5827_v1 }
  0xc7   : > { %5787 = vmatpush3.bf16.msra.mxu0 %v5786_v10 }
  0xc8   : > { %5793 = vmatpush3.bf16.msra.mxu1 %v5792_v11  ;;  %5794 = vmatprep.subr.bf16.mxu0 %v5825_v0 }
  0xc9   : > { %5800 = vmatprep.subr.bf16.mxu1 %v5825_v0 }
  0xca   : > { %5483 = vmatmul.mubr.msk.f32.vlgmr.msra.gmra.mrb[44].mxu0 %vm372_vm1, %v3965_v16 }
  0xcb   : > { %5494 = vmatmul.mubr.msk.f32.vlgmr.msra.gmra.mrb[44].mxu1 %vm372_vm1, %v4726_v18  ;;  %5796 = vmatpush3.bf16.msra.mxu0 %v5795_v17 }
  0xcc   : > { %5802 = vmatpush3.bf16.msra.mxu1 %v5801_v19  ;;  %5797 = vmatprep.subr.bf16.mxu0 %v5825_v0 }
  0xcd   : > { %5803 = vmatprep.subr.bf16.mxu1 %v5825_v0  ;;  %5504 = vmatprep.mubr.msk.f32.mxu0 %vm5826_vm0, %v5827_v1 }
  0xce   : > { %5515 = vmatprep.mubr.msk.f32.mxu1 %vm5826_vm0, %v5827_v1 }
  0xcf   : > { %5799 = vmatpush3.bf16.msra.mxu0 %v5798_v24 }
  0xd0   : > { %5805 = vmatpush3.bf16.msra.mxu1 %v5804_v25 }
  0xd2   : > { %5505 = vmatmul.mubr.msk.f32.vlgmr.msra.gmra.mrb[46].mxu0 %vm372_vm1, %v4727_v26 }
  0xd3   : > { %5516 = vmatmul.mubr.msk.f32.vlgmr.msra.gmra.mrb[46].mxu1 %vm372_vm1, %v4211_v27 }
  0xed   : > { %v442_v28 = vpop.f32.mrb[0].mxu0 }
  0xee   : > { %v519_v29 = vpop.f32.mrb[0].mxu1  ;;  %v5000_v0 = vpop.f32.mrb[1].mxu0 }
  0xef   : > { %v601_v30 = vsub.f32 %v442_v28, %v519_v29  ;;  %v5011_v1 = vpop.f32.mrb[1].mxu1 }
  0xf1   : > { %603 = vst.msk [vmem:[%s6368_s19] sm:$0x3] %vm602_vm2, %v601_v30 }
  0xf5   : > { %v597_v31 = vpop.f32.mrb[2].mxu0 }
  0xf6   : > { %v604_v32 = vsub.f32 %v597_v31, %v442_v28  ;;  %v685_v33 = vpop.f32.mrb[2].mxu1  ;;  %v5022_v34 = vpop.f32.mrb[3].mxu0 }
  0xf7   : > { %v5033_v35 = vpop.f32.mrb[3].mxu1 }
  0xf8   : > { %v605_v36 = vsub.f32 %v604_v32, %v519_v29 }
  0xfa   : > { %606 = vst.msk [vmem:[%s6376_s23] sm:$0x3] %vm602_vm2, %v605_v36 }
  0xfd   : > { %v763_v37 = vpop.f32.mrb[4].mxu0 }
  0xfe   : > { %v846_v38 = vsub.f32 %v685_v33, %v763_v37  ;;  %v842_v39 = vpop.f32.mrb[4].mxu1  ;;  %v5044_v40 = vpop.f32.mrb[5].mxu0 }
  0xff   : > { %v849_v41 = vsub.f32 %v842_v39, %v685_v33  ;;  %v5055_v42 = vpop.f32.mrb[5].mxu1 }
 0x100   : > { %4477 = vst.msk [vmem:[%s6368_s19 + $0x2] sm:$0x3] %vm602_vm2, %v846_v38 }
 0x101   : > { %v850_v43 = vsub.f32 %v849_v41, %v763_v37 }
 0x103   : > { %4478 = vst.msk [vmem:[%s6376_s23 + $0x2] sm:$0x3] %vm602_vm2, %v850_v43 }
 0x105   : > { %v931_v44 = vpop.f32.mrb[6].mxu0 }
 0x106   : > { %v1009_v45 = vpop.f32.mrb[6].mxu1  ;;  %v5066_v46 = vpop.f32.mrb[7].mxu0 }
 0x107   : > { %v1092_v47 = vsub.f32 %v931_v44, %v1009_v45  ;;  %v5077_v48 = vpop.f32.mrb[7].mxu1 }
 0x109   : > { %4496 = vst.msk [vmem:[%s6368_s19 + $0x4] sm:$0x3] %vm602_vm2, %v1092_v47 }
 0x10d   : > { %v1088_v49 = vpop.f32.mrb[8].mxu0 }
 0x10e   : > { %v1095_v50 = vsub.f32 %v1088_v49, %v931_v44  ;;  %v1177_v51 = vpop.f32.mrb[8].mxu1  ;;  %v5088_v52 = vpop.f32.mrb[9].mxu0 }
 0x10f   : > { %v5099_v53 = vpop.f32.mrb[9].mxu1 }
 0x110   : > { %v1096_v54 = vsub.f32 %v1095_v50, %v1009_v45 }
 0x112   : > { %4497 = vst.msk [vmem:[%s6376_s23 + $0x4] sm:$0x3] %vm602_vm2, %v1096_v54 }
 0x115   : > { %v1255_v55 = vpop.f32.mrb[10].mxu0 }
 0x116   : > { %v1338_v56 = vsub.f32 %v1177_v51, %v1255_v55  ;;  %v1334_v57 = vpop.f32.mrb[10].mxu1  ;;  %v5110_v58 = vpop.f32.mrb[11].mxu0 }
 0x117   : > { %v1341_v59 = vsub.f32 %v1334_v57, %v1177_v51  ;;  %v5121_v60 = vpop.f32.mrb[11].mxu1 }
 0x118   : > { %4515 = vst.msk [vmem:[%s6368_s19 + $0x6] sm:$0x3] %vm602_vm2, %v1338_v56 }
 0x119   : > { %v1342_v61 = vsub.f32 %v1341_v59, %v1255_v55 }
 0x11b   : > { %4516 = vst.msk [vmem:[%s6376_s23 + $0x6] sm:$0x3] %vm602_vm2, %v1342_v61 }
 0x11d   : > { %v1423_v62 = vpop.f32.mrb[12].mxu0 }
 0x11e   : > { %v1501_v63 = vpop.f32.mrb[12].mxu1  ;;  %v5132_v2 = vpop.f32.mrb[13].mxu0 }
 0x11f   : > { %v1584_v3 = vsub.f32 %v1423_v62, %v1501_v63  ;;  %v5143_v4 = vpop.f32.mrb[13].mxu1 }
 0x121   : > { %4534 = vst.msk [vmem:[%s6368_s19 + $0x8] sm:$0x3] %vm602_vm2, %v1584_v3 }
 0x125   : > { %v1580_v5 = vpop.f32.mrb[14].mxu0 }
 0x126   : > { %v1587_v6 = vsub.f32 %v1580_v5, %v1423_v62  ;;  %v1669_v7 = vpop.f32.mrb[14].mxu1  ;;  %v5154_v8 = vpop.f32.mrb[15].mxu0 }
 0x127   : > { %v5165_v9 = vpop.f32.mrb[15].mxu1 }
 0x128   : > { %v1588_v10 = vsub.f32 %v1587_v6, %v1501_v63 }
 0x12a   : > { %4535 = vst.msk [vmem:[%s6376_s23 + $0x8] sm:$0x3] %vm602_vm2, %v1588_v10 }
 0x12d   : > { %v1747_v11 = vpop.f32.mrb[16].mxu0 }
 0x12e   : > { %v1830_v12 = vsub.f32 %v1669_v7, %v1747_v11  ;;  %v1826_v13 = vpop.f32.mrb[16].mxu1  ;;  %v5176_v14 = vpop.f32.mrb[17].mxu0 }
 0x12f   : > { %v1833_v15 = vsub.f32 %v1826_v13, %v1669_v7  ;;  %v5187_v16 = vpop.f32.mrb[17].mxu1 }
 0x130   : > { %4553 = vst.msk [vmem:[%s6368_s19 + $0xa] sm:$0x3] %vm602_vm2, %v1830_v12 }
 0x131   : > { %v1834_v17 = vsub.f32 %v1833_v15, %v1747_v11 }
 0x133   : > { %4554 = vst.msk [vmem:[%s6376_s23 + $0xa] sm:$0x3] %vm602_vm2, %v1834_v17 }
 0x135   : > { %v1915_v18 = vpop.f32.mrb[18].mxu0 }
 0x136   : > { %v1993_v19 = vpop.f32.mrb[18].mxu1  ;;  %v5198_v20 = vpop.f32.mrb[19].mxu0 }
 0x137   : > { %v2076_v21 = vsub.f32 %v1915_v18, %v1993_v19  ;;  %v5209_v22 = vpop.f32.mrb[19].mxu1 }
 0x139   : > { %4572 = vst.msk [vmem:[%s6368_s19 + $0xc] sm:$0x3] %vm602_vm2, %v2076_v21 }
 0x13d   : > { %v2072_v23 = vpop.f32.mrb[20].mxu0 }
 0x13e   : > { %v2079_v24 = vsub.f32 %v2072_v23, %v1915_v18  ;;  %v2161_v25 = vpop.f32.mrb[20].mxu1  ;;  %v5220_v26 = vpop.f32.mrb[21].mxu0 }
 0x13f   : > { %v5231_v27 = vpop.f32.mrb[21].mxu1 }
 0x140   : > { %v2080_v28 = vsub.f32 %v2079_v24, %v1993_v19 }
 0x142   : > { %4573 = vst.msk [vmem:[%s6376_s23 + $0xc] sm:$0x3] %vm602_vm2, %v2080_v28 }
 0x145   : > { %v2239_v29 = vpop.f32.mrb[22].mxu0 }
 0x146   : > { %v2322_v0 = vsub.f32 %v2161_v25, %v2239_v29  ;;  %v2318_v30 = vpop.f32.mrb[22].mxu1  ;;  %v5242_v1 = vpop.f32.mrb[23].mxu0 }
 0x147   : > { %v2325_v31 = vsub.f32 %v2318_v30, %v2161_v25  ;;  %v5253_v32 = vpop.f32.mrb[23].mxu1 }
 0x148   : > { %4591 = vst.msk [vmem:[%s6368_s19 + $0xe] sm:$0x3] %vm602_vm2, %v2322_v0 }
 0x149   : > { %v2326_v33 = vsub.f32 %v2325_v31, %v2239_v29 }
 0x14b   : > { %4592 = vst.msk [vmem:[%s6376_s23 + $0xe] sm:$0x3] %vm602_vm2, %v2326_v33 }
 0x14d   : > { %v2407_v34 = vpop.f32.mrb[24].mxu0 }
 0x14e   : > { %v2485_v35 = vpop.f32.mrb[24].mxu1  ;;  %v5264_v36 = vpop.f32.mrb[25].mxu0 }
 0x14f   : > { %v2568_v37 = vsub.f32 %v2407_v34, %v2485_v35  ;;  %v5275_v38 = vpop.f32.mrb[25].mxu1 }
 0x151   : > { %4610 = vst.msk [vmem:[%s6368_s19 + $0x10] sm:$0x3] %vm602_vm2, %v2568_v37 }
 0x155   : > { %v2564_v39 = vpop.f32.mrb[26].mxu0 }
 0x156   : > { %v2571_v40 = vsub.f32 %v2564_v39, %v2407_v34  ;;  %v2653_v41 = vpop.f32.mrb[26].mxu1  ;;  %v5286_v42 = vpop.f32.mrb[27].mxu0 }
 0x157   : > { %v5297_v43 = vpop.f32.mrb[27].mxu1 }
 0x158   : > { %v2572_v44 = vsub.f32 %v2571_v40, %v2485_v35 }
 0x15a   : > { %4611 = vst.msk [vmem:[%s6376_s23 + $0x10] sm:$0x3] %vm602_vm2, %v2572_v44 }
 0x15d   : > { %v2731_v45 = vpop.f32.mrb[28].mxu0 }
 0x15e   : > { %v2814_v46 = vsub.f32 %v2653_v41, %v2731_v45  ;;  %v2810_v47 = vpop.f32.mrb[28].mxu1  ;;  %v5308_v48 = vpop.f32.mrb[29].mxu0 }
 0x15f   : > { %v2817_v49 = vsub.f32 %v2810_v47, %v2653_v41  ;;  %v5319_v50 = vpop.f32.mrb[29].mxu1 }
 0x160   : > { %4629 = vst.msk [vmem:[%s6368_s19 + $0x12] sm:$0x3] %vm602_vm2, %v2814_v46 }
 0x161   : > { %v2818_v51 = vsub.f32 %v2817_v49, %v2731_v45 }
 0x163   : > { %4630 = vst.msk [vmem:[%s6376_s23 + $0x12] sm:$0x3] %vm602_vm2, %v2818_v51 }
 0x165   : > { %v2899_v52 = vpop.f32.mrb[30].mxu0 }
 0x166   : > { %v2977_v53 = vpop.f32.mrb[30].mxu1  ;;  %v5330_v54 = vpop.f32.mrb[31].mxu0 }
 0x167   : > { %v3060_v55 = vsub.f32 %v2899_v52, %v2977_v53  ;;  %v5341_v56 = vpop.f32.mrb[31].mxu1 }
 0x169   : > { %4648 = vst.msk [vmem:[%s6368_s19 + $0x14] sm:$0x3] %vm602_vm2, %v3060_v55 }
 0x16d   : > { %v3056_v57 = vpop.f32.mrb[32].mxu0 }
 0x16e   : > { %v3063_v58 = vsub.f32 %v3056_v57, %v2899_v52  ;;  %v3145_v59 = vpop.f32.mrb[32].mxu1  ;;  %v5352_v60 = vpop.f32.mrb[33].mxu0 }
 0x16f   : > { %v5363_v61 = vpop.f32.mrb[33].mxu1 }
 0x170   : > { %v3064_v62 = vsub.f32 %v3063_v58, %v2977_v53 }
 0x172   : > { %4649 = vst.msk [vmem:[%s6376_s23 + $0x14] sm:$0x3] %vm602_vm2, %v3064_v62 }
 0x175   : > { %v3223_v63 = vpop.f32.mrb[34].mxu0 }
 0x176   : > { %v3306_v2 = vsub.f32 %v3145_v59, %v3223_v63  ;;  %v3302_v3 = vpop.f32.mrb[34].mxu1  ;;  %v5374_v4 = vpop.f32.mrb[35].mxu0 }
 0x177   : > { %v3309_v5 = vsub.f32 %v3302_v3, %v3145_v59  ;;  %v5385_v6 = vpop.f32.mrb[35].mxu1 }
 0x178   : > { %4667 = vst.msk [vmem:[%s6368_s19 + $0x16] sm:$0x3] %vm602_vm2, %v3306_v2 }
 0x179   : > { %v3310_v7 = vsub.f32 %v3309_v5, %v3223_v63 }
 0x17b   : > { %4668 = vst.msk [vmem:[%s6376_s23 + $0x16] sm:$0x3] %vm602_vm2, %v3310_v7 }
 0x17d   : > { %v3391_v8 = vpop.f32.mrb[36].mxu0 }
 0x17e   : > { %v3469_v9 = vpop.f32.mrb[36].mxu1  ;;  %v5396_v10 = vpop.f32.mrb[37].mxu0 }
 0x17f   : > { %v3552_v11 = vsub.f32 %v3391_v8, %v3469_v9  ;;  %v5407_v12 = vpop.f32.mrb[37].mxu1 }
 0x181   : > { %4686 = vst.msk [vmem:[%s6368_s19 + $0x18] sm:$0x3] %vm602_vm2, %v3552_v11 }
 0x185   : > { %v3548_v13 = vpop.f32.mrb[38].mxu0 }
 0x186   : > { %v3555_v14 = vsub.f32 %v3548_v13, %v3391_v8  ;;  %v3637_v15 = vpop.f32.mrb[38].mxu1  ;;  %v5418_v16 = vpop.f32.mrb[39].mxu0 }
 0x187   : > { %v5429_v17 = vpop.f32.mrb[39].mxu1 }
 0x188   : > { %v3556_v18 = vsub.f32 %v3555_v14, %v3469_v9 }
 0x18a   : > { %4687 = vst.msk [vmem:[%s6376_s23 + $0x18] sm:$0x3] %vm602_vm2, %v3556_v18 }
 0x18d   : > { %v3715_v19 = vpop.f32.mrb[40].mxu0 }
 0x18e   : > { %v3798_v20 = vsub.f32 %v3637_v15, %v3715_v19  ;;  %v3794_v21 = vpop.f32.mrb[40].mxu1  ;;  %v5440_v22 = vpop.f32.mrb[41].mxu0 }
 0x18f   : > { %v3801_v23 = vsub.f32 %v3794_v21, %v3637_v15  ;;  %v5451_v24 = vpop.f32.mrb[41].mxu1 }
 0x190   : > { %4705 = vst.msk [vmem:[%s6368_s19 + $0x1a] sm:$0x3] %vm602_vm2, %v3798_v20 }
 0x191   : > { %v3802_v25 = vsub.f32 %v3801_v23, %v3715_v19 }
 0x193   : > { %4706 = vst.msk [vmem:[%s6376_s23 + $0x1a] sm:$0x3] %vm602_vm2, %v3802_v25 }
 0x195   : > { %v3883_v26 = vpop.f32.mrb[42].mxu0 }
 0x196   : > { %v3961_v27 = vpop.f32.mrb[42].mxu1  ;;  %v5462_v28 = vpop.f32.mrb[43].mxu0 }
 0x197   : > { %v4044_v29 = vsub.f32 %v3883_v26, %v3961_v27  ;;  %v5473_v0 = vpop.f32.mrb[43].mxu1 }
 0x199   : > { %4724 = vst.msk [vmem:[%s6368_s19 + $0x1c] sm:$0x3] %vm602_vm2, %v4044_v29 }
 0x19d   : > { %v4040_v30 = vpop.f32.mrb[44].mxu0 }
 0x19e   : > { %v4047_v1 = vsub.f32 %v4040_v30, %v3883_v26  ;;  %v4129_v31 = vpop.f32.mrb[44].mxu1  ;;  %v5484_v32 = vpop.f32.mrb[45].mxu0 }
 0x19f   : > { %v5495_v33 = vpop.f32.mrb[45].mxu1 }
 0x1a0   : > { %v4048_v34 = vsub.f32 %v4047_v1, %v3961_v27 }
 0x1a2   : > { %4725 = vst.msk [vmem:[%s6376_s23 + $0x1c] sm:$0x3] %vm602_vm2, %v4048_v34 }
 0x1a5   : > { %v4207_v35 = vpop.f32.mrb[46].mxu0 }
 0x1a6   : > { %v4290_v36 = vsub.f32 %v4129_v31, %v4207_v35  ;;  %v4286_v37 = vpop.f32.mrb[46].mxu1  ;;  %v5506_v38 = vpop.f32.mrb[47].mxu0 }
 0x1a7   : > { %v4293_v39 = vsub.f32 %v4286_v37, %v4129_v31  ;;  %v5517_v40 = vpop.f32.mrb[47].mxu1 }
 0x1a8   : > { %4743 = vst.msk [vmem:[%s6368_s19 + $0x1e] sm:$0x3] %vm602_vm2, %v4290_v36 }
 0x1a9   : > { %v4294_v41 = vsub.f32 %v4293_v39, %v4207_v35 }
 0x1ab   : > { %4744 = vst.msk [vmem:[%s6376_s23 + $0x1e] sm:$0x3] %vm602_vm2, %v4294_v41 }
 0x1ac PF: > { %s17_s21 = sadd.s32 1, %s5823_s21  }
 0x1ad   : > { %p14_p4 = scmp.ge.s32.totalorder %s17_s21, 4  }
 0x1af   :  { %16 = sbr.rel (!%p14_p4) target bundleno = 1 (0x1), region = 199 }

// kernel: fno2d_forward.18
= control target key start
LH: loop header
LB: loop body
LE: loop exit
PB: predicated region body
PF: predicated region fallthrough
CT: control target
= control target key end

     0   :  { %s628_s1 = inlined_call_operand.vmem [shape: f32[128,128], index: 1, kind: input, shape index: {}]   ;;  %s629_s0 = inlined_call_operand.vmem [shape: f32[128,128], index: 0, kind: input, shape index: {}]   ;;  %s630_s2 = inlined_call_operand.vmem [shape: f32[1,128], index: 2, kind: input, shape index: {}]   ;;  %s631_s3 = inlined_call_operand.vmem [shape: f32[128,128], index: 3, kind: input, shape index: {}]   ;;  %s632_s4 = inlined_call_operand.vmem [shape: f32[128,128], index: 4, kind: output, shape index: {}]  }
   0x1   :  { %v33_v0 = vld [vmem:[%s628_s1] sm:$0xff]  ;;  %v34_v1 = vld [vmem:[%s628_s1 + $0x8] sm:$0xff]  ;;  %v35_v2 = vld [vmem:[%s628_s1 + $0x10] sm:$0xff] }
   0x2   :  { %v342_v3 = vpack.c.bf16 %v34_v1, %v33_v0  ;;  %v36_v4 = vld [vmem:[%s628_s1 + $0x18] sm:$0xff]  ;;  %v37_v6 = vld [vmem:[%s628_s1 + $0x20] sm:$0xff]  ;;  %v38_v7 = vld [vmem:[%s628_s1 + $0x28] sm:$0xff] }
   0x3   :  { %v346_v5 = vpack.c.bf16 %v36_v4, %v35_v2  ;;  %v350_v8 = vpack.c.bf16 %v38_v7, %v37_v6  ;;  %v17_v9 = vld [vmem:[%s629_s0] sm:$0xff]  ;;  %v39_v11 = vld [vmem:[%s628_s1 + $0x30] sm:$0xff]  ;;  %v40_v12 = vld [vmem:[%s628_s1 + $0x38] sm:$0xff] }
   0x4   :  { %343 = vmatprep.subr.bf16.mxu0 %v342_v3  ;;  %374 = vmatprep.subr.bf16.mxu1 %v342_v3  ;;  %v25_v10 = vld [vmem:[%s629_s0 + $0x40] sm:$0xff]  ;;  %v354_v13 = vpack.c.bf16 %v40_v12, %v39_v11  ;;  %v42_v15 = vld [vmem:[%s628_s1 + $0x48] sm:$0xff]  ;;  %v43_v17 = vld [vmem:[%s628_s1 + $0x50] sm:$0xff] }
   0x5   :  { %345 = vmatpush3.bf16.msra.mxu0 %v342_v3  ;;  %382 = vmatpush3.bf16.msra.mxu1 %v342_v3  ;;  %v41_v14 = vld [vmem:[%s628_s1 + $0x40] sm:$0xff]  ;;  %v44_v18 = vld [vmem:[%s628_s1 + $0x58] sm:$0xff]  ;;  %v46_v21 = vld [vmem:[%s628_s1 + $0x68] sm:$0xff] }
   0x6   :  { %347 = vmatprep.subr.bf16.mxu0 %v346_v5  ;;  %375 = vmatprep.subr.bf16.mxu1 %v346_v5  ;;  %v358_v16 = vpack.c.bf16 %v42_v15, %v41_v14  ;;  %v362_v19 = vpack.c.bf16 %v44_v18, %v43_v17  ;;  %v45_v20 = vld [vmem:[%s628_s1 + $0x60] sm:$0xff]  ;;  %v47_v23 = vld [vmem:[%s628_s1 + $0x70] sm:$0xff]  ;;  %v48_v24 = vld [vmem:[%s628_s1 + $0x78] sm:$0xff] }
   0x7   :  { %318 = vmatprep.mubr.f32.mxu0 %v17_v9  ;;  %330 = vmatprep.mubr.f32.mxu1 %v25_v10  ;;  %v366_v22 = vpack.c.bf16 %v46_v21, %v45_v20  ;;  %v370_v25 = vpack.c.bf16 %v48_v24, %v47_v23  ;;  %v18_v26 = vld [vmem:[%s629_s0 + $0x8] sm:$0xff]  ;;  %v19_v28 = vld [vmem:[%s629_s0 + $0x10] sm:$0xff]  ;;  %v20_v30 = vld [vmem:[%s629_s0 + $0x18] sm:$0xff] }
   0x8   :  { %v26_v27 = vld [vmem:[%s629_s0 + $0x48] sm:$0xff]  ;;  %v27_v29 = vld [vmem:[%s629_s0 + $0x50] sm:$0xff]  ;;  %v28_v31 = vld [vmem:[%s629_s0 + $0x58] sm:$0xff] }
   0x9   :  { %349 = vmatpush3.bf16.msra.mxu0 %v346_v5  ;;  %383 = vmatpush3.bf16.msra.mxu1 %v346_v5  ;;  %v21_v32 = vld [vmem:[%s629_s0 + $0x20] sm:$0xff]  ;;  %v22_v34 = vld [vmem:[%s629_s0 + $0x28] sm:$0xff]  ;;  %v23_v36 = vld [vmem:[%s629_s0 + $0x30] sm:$0xff] }
   0xa   :  { %351 = vmatprep.subr.bf16.mxu0 %v350_v8  ;;  %376 = vmatprep.subr.bf16.mxu1 %v350_v8  ;;  %v29_v33 = vld [vmem:[%s629_s0 + $0x60] sm:$0xff]  ;;  %v30_v35 = vld [vmem:[%s629_s0 + $0x68] sm:$0xff]  ;;  %v31_v37 = vld [vmem:[%s629_s0 + $0x70] sm:$0xff] }
   0xb   :  { %v24_v38 = vld [vmem:[%s629_s0 + $0x38] sm:$0xff]  ;;  %v514_v40 = vld [vmem:[%s630_s2] ss:$0 sm:$0xff]  ;;  %v202_v42 = vld [vmem:[%s631_s3 + $0x8] sm:$0xff] }
   0xc   :  { %v32_v39 = vld [vmem:[%s629_s0 + $0x78] sm:$0xff]  ;;  %v210_v44 = vld [vmem:[%s631_s3 + $0x48] sm:$0xff]  ;;  %v201_v48 = vld [vmem:[%s631_s3] sm:$0xff] }
   0xd   :  { %353 = vmatpush3.bf16.msra.mxu0 %v350_v8  ;;  %384 = vmatpush3.bf16.msra.mxu1 %v350_v8  ;;  %v209_v50 = vld [vmem:[%s631_s3 + $0x40] sm:$0xff]  ;;  %v204_v58 = vld [vmem:[%s631_s3 + $0x18] sm:$0xff]  ;;  %v203_v0 = vld [vmem:[%s631_s3 + $0x10] sm:$0xff] }
   0xe   :  { %355 = vmatprep.subr.bf16.mxu0 %v354_v13  ;;  %377 = vmatprep.subr.bf16.mxu1 %v354_v13  ;;  %v212_v60 = vld [vmem:[%s631_s3 + $0x58] sm:$0xff]  ;;  %v211_v2 = vld [vmem:[%s631_s3 + $0x50] sm:$0xff]  ;;  %v206_v10 = vld [vmem:[%s631_s3 + $0x28] sm:$0xff] }
   0xf   :  { %v214_v12 = vld [vmem:[%s631_s3 + $0x68] sm:$0xff]  ;;  %v213_v18 = vld [vmem:[%s631_s3 + $0x60] sm:$0xff] }
  0x11   :  { %357 = vmatpush3.bf16.msra.mxu0 %v354_v13  ;;  %385 = vmatpush3.bf16.msra.mxu1 %v354_v13 }
  0x12   :  { %359 = vmatprep.subr.bf16.mxu0 %v358_v16  ;;  %378 = vmatprep.subr.bf16.mxu1 %v358_v16 }
  0x15   :  { %361 = vmatpush3.bf16.msra.mxu0 %v358_v16  ;;  %386 = vmatpush3.bf16.msra.mxu1 %v358_v16  ;;  %v205_v16 = vld [vmem:[%s631_s3 + $0x20] sm:$0xff] }
  0x16   :  { %363 = vmatprep.subr.bf16.mxu0 %v362_v19  ;;  %379 = vmatprep.subr.bf16.mxu1 %v362_v19 }
  0x19   :  { %365 = vmatpush3.bf16.msra.mxu0 %v362_v19  ;;  %387 = vmatpush3.bf16.msra.mxu1 %v362_v19 }
  0x1a   :  { %367 = vmatprep.subr.bf16.mxu0 %v366_v22  ;;  %380 = vmatprep.subr.bf16.mxu1 %v366_v22 }
  0x1d   :  { %369 = vmatpush3.bf16.msra.mxu0 %v366_v22  ;;  %388 = vmatpush3.bf16.msra.mxu1 %v366_v22 }
  0x1e   :  { %371 = vmatprep.subr.bf16.mxu0 %v370_v25  ;;  %381 = vmatprep.subr.bf16.mxu1 %v370_v25 }
  0x21   :  { %373 = vmatpush3.bf16.msra.mxu0 %v370_v25  ;;  %389 = vmatpush3.bf16.msra.mxu1 %v370_v25 }
  0x24   :  { %319 = vmatmul.mubr.f32.vlgmr.msra.gmra.mrb[0].mxu0 %v18_v26  ;;  %331 = vmatmul.mubr.f32.vlgmr.msra.gmra.mrb[0].mxu1 %v26_v27  ;;  %v208_v26 = vld [vmem:[%s631_s3 + $0x38] sm:$0xff] }
  0x25   :  { %321 = vmatprep.mubr.f32.mxu0 %v19_v28  ;;  %333 = vmatprep.mubr.f32.mxu1 %v27_v29  ;;  %v216_v28 = vld [vmem:[%s631_s3 + $0x78] sm:$0xff] }
  0x28   :  { %322 = vmatmul.mubr.f32.gmra.mrb[2].mxu0 %v20_v30  ;;  %334 = vmatmul.mubr.f32.gmra.mrb[2].mxu1 %v28_v31 }
  0x29   :  { %324 = vmatprep.mubr.f32.mxu0 %v21_v32  ;;  %336 = vmatprep.mubr.f32.mxu1 %v29_v33  ;;  %v207_v32 = vld [vmem:[%s631_s3 + $0x30] sm:$0xff] }
  0x2c   :  { %325 = vmatmul.mubr.f32.gmra.mrb[4].mxu0 %v22_v34  ;;  %337 = vmatmul.mubr.f32.gmra.mrb[4].mxu1 %v30_v35  ;;  %v215_v34 = vld [vmem:[%s631_s3 + $0x70] sm:$0xff] }
  0x2d   :  { %327 = vmatprep.mubr.f32.mxu0 %v23_v36  ;;  %339 = vmatprep.mubr.f32.mxu1 %v31_v37 }
  0x30   :  { %328 = vmatmul.mubr.f32.gmra.mrb[6].mxu0 %v24_v38  ;;  %340 = vmatmul.mubr.f32.gmra.mrb[6].mxu1 %v32_v39 }
  0xf7   :  { %v320_v41 = vpop.f32.mrb[0].mxu0  ;;  %v332_v43 = vpop.f32.mrb[0].mxu1 }
  0xf8   :  { %v128_v45 = vadd.f32 %v320_v41, %v514_v40  ;;  %v168_v46 = vadd.f32 %v332_v43, %v514_v40  ;;  %v122_v47 = vpop.f32.mrb[1].mxu0  ;;  %v162_v49 = vpop.f32.mrb[1].mxu1 }
  0xf9   :  { %v123_v51 = vadd.f32 %v514_v40, %v122_v47  ;;  %v163_v52 = vadd.f32 %v514_v40, %v162_v49 }
  0xfa   :  { %v218_v53 = vadd.f32 %v202_v42, %v128_v45  ;;  %v226_v54 = vadd.f32 %v210_v44, %v168_v46 }
  0xfb   :  { %v217_v55 = vadd.f32 %v201_v48, %v123_v51  ;;  %v225_v56 = vadd.f32 %v209_v50, %v163_v52  ;;  %v323_v57 = vpop.f32.mrb[2].mxu0  ;;  %v335_v59 = vpop.f32.mrb[2].mxu1 }
  0xfc   :  { %234 = vst [vmem:[%s632_s4 + $0x8] sm:$0xff] %v218_v53  ;;  %242 = vst [vmem:[%s632_s4 + $0x48] sm:$0xff] %v226_v54  ;;  %v138_v61 = vadd.f32 %v323_v57, %v514_v40  ;;  %v178_v62 = vadd.f32 %v335_v59, %v514_v40  ;;  %v132_v63 = vpop.f32.mrb[3].mxu0  ;;  %v172_v1 = vpop.f32.mrb[3].mxu1 }
  0xfd   :  { %233 = vst [vmem:[%s632_s4] sm:$0xff] %v217_v55  ;;  %241 = vst [vmem:[%s632_s4 + $0x40] sm:$0xff] %v225_v56  ;;  %v133_v3 = vadd.f32 %v514_v40, %v132_v63  ;;  %v173_v4 = vadd.f32 %v514_v40, %v172_v1 }
  0xfe   :  { %v220_v5 = vadd.f32 %v204_v58, %v138_v61  ;;  %v228_v6 = vadd.f32 %v212_v60, %v178_v62 }
  0xff   :  { %v219_v7 = vadd.f32 %v203_v0, %v133_v3  ;;  %v227_v8 = vadd.f32 %v211_v2, %v173_v4  ;;  %v326_v9 = vpop.f32.mrb[4].mxu0  ;;  %v338_v11 = vpop.f32.mrb[4].mxu1 }
 0x100   :  { %236 = vst [vmem:[%s632_s4 + $0x18] sm:$0xff] %v220_v5  ;;  %244 = vst [vmem:[%s632_s4 + $0x58] sm:$0xff] %v228_v6  ;;  %v148_v13 = vadd.f32 %v326_v9, %v514_v40  ;;  %v188_v14 = vadd.f32 %v338_v11, %v514_v40  ;;  %v142_v15 = vpop.f32.mrb[5].mxu0  ;;  %v182_v17 = vpop.f32.mrb[5].mxu1 }
 0x101   :  { %235 = vst [vmem:[%s632_s4 + $0x10] sm:$0xff] %v219_v7  ;;  %243 = vst [vmem:[%s632_s4 + $0x50] sm:$0xff] %v227_v8  ;;  %v143_v19 = vadd.f32 %v514_v40, %v142_v15  ;;  %v183_v20 = vadd.f32 %v514_v40, %v182_v17 }
 0x102   :  { %v222_v21 = vadd.f32 %v206_v10, %v148_v13  ;;  %v230_v22 = vadd.f32 %v214_v12, %v188_v14 }
 0x103   :  { %v221_v23 = vadd.f32 %v205_v16, %v143_v19  ;;  %v229_v24 = vadd.f32 %v213_v18, %v183_v20  ;;  %v329_v25 = vpop.f32.mrb[6].mxu0  ;;  %v341_v27 = vpop.f32.mrb[6].mxu1 }
 0x104   :  { %238 = vst [vmem:[%s632_s4 + $0x28] sm:$0xff] %v222_v21  ;;  %246 = vst [vmem:[%s632_s4 + $0x68] sm:$0xff] %v230_v22  ;;  %v158_v29 = vadd.f32 %v329_v25, %v514_v40  ;;  %v198_v30 = vadd.f32 %v341_v27, %v514_v40  ;;  %v152_v31 = vpop.f32.mrb[7].mxu0  ;;  %v192_v33 = vpop.f32.mrb[7].mxu1 }
 0x105   :  { %237 = vst [vmem:[%s632_s4 + $0x20] sm:$0xff] %v221_v23  ;;  %245 = vst [vmem:[%s632_s4 + $0x60] sm:$0xff] %v229_v24  ;;  %v153_v35 = vadd.f32 %v514_v40, %v152_v31  ;;  %v193_v36 = vadd.f32 %v514_v40, %v192_v33 }
 0x106   :  { %v224_v37 = vadd.f32 %v208_v26, %v158_v29  ;;  %v232_v38 = vadd.f32 %v216_v28, %v198_v30 }
 0x107   :  { %v223_v39 = vadd.f32 %v207_v32, %v153_v35  ;;  %v231_v41 = vadd.f32 %v215_v34, %v193_v36 }
 0x108   :  { %240 = vst [vmem:[%s632_s4 + $0x38] sm:$0xff] %v224_v37  ;;  %248 = vst [vmem:[%s632_s4 + $0x78] sm:$0xff] %v232_v38 }
 0x109   :  { %239 = vst [vmem:[%s632_s4 + $0x30] sm:$0xff] %v223_v39  ;;  %247 = vst [vmem:[%s632_s4 + $0x70] sm:$0xff] %v231_v41 }

// kernel: fno2d_forward.12
= control target key start
LH: loop header
LB: loop body
LE: loop exit
PB: predicated region body
PF: predicated region fallthrough
CT: control target
= control target key end

     0   :  { %s644_s1 = inlined_call_operand.vmem [shape: f32[128,128], index: 1, kind: input, shape index: {}]   ;;  %s645_s0 = inlined_call_operand.vmem [shape: f32[128,128], index: 0, kind: input, shape index: {}]   ;;  %s646_s2 = inlined_call_operand.vmem [shape: f32[1,128], index: 2, kind: input, shape index: {}]   ;;  %s647_s3 = inlined_call_operand.vmem [shape: f32[128,128], index: 3, kind: input, shape index: {}]   ;;  %s648_s4 = inlined_call_operand.vmem [shape: f32[128,128], index: 4, kind: output, shape index: {}]  }
   0x1   :  { %v33_v0 = vld [vmem:[%s644_s1] sm:$0xff]  ;;  %v34_v1 = vld [vmem:[%s644_s1 + $0x8] sm:$0xff]  ;;  %v35_v2 = vld [vmem:[%s644_s1 + $0x10] sm:$0xff] }
   0x2   :  { %v358_v3 = vpack.c.bf16 %v34_v1, %v33_v0  ;;  %v36_v4 = vld [vmem:[%s644_s1 + $0x18] sm:$0xff]  ;;  %v37_v6 = vld [vmem:[%s644_s1 + $0x20] sm:$0xff]  ;;  %v38_v7 = vld [vmem:[%s644_s1 + $0x28] sm:$0xff] }
   0x3   :  { %v362_v5 = vpack.c.bf16 %v36_v4, %v35_v2  ;;  %v366_v8 = vpack.c.bf16 %v38_v7, %v37_v6  ;;  %v17_v9 = vld [vmem:[%s645_s0] sm:$0xff]  ;;  %v39_v11 = vld [vmem:[%s644_s1 + $0x30] sm:$0xff]  ;;  %v40_v12 = vld [vmem:[%s644_s1 + $0x38] sm:$0xff] }
   0x4   :  { %359 = vmatprep.subr.bf16.mxu0 %v358_v3  ;;  %390 = vmatprep.subr.bf16.mxu1 %v358_v3  ;;  %v25_v10 = vld [vmem:[%s645_s0 + $0x40] sm:$0xff]  ;;  %v370_v13 = vpack.c.bf16 %v40_v12, %v39_v11  ;;  %v42_v15 = vld [vmem:[%s644_s1 + $0x48] sm:$0xff]  ;;  %v43_v17 = vld [vmem:[%s644_s1 + $0x50] sm:$0xff] }
   0x5   :  { %361 = vmatpush3.bf16.msra.mxu0 %v358_v3  ;;  %398 = vmatpush3.bf16.msra.mxu1 %v358_v3  ;;  %v41_v14 = vld [vmem:[%s644_s1 + $0x40] sm:$0xff]  ;;  %v44_v18 = vld [vmem:[%s644_s1 + $0x58] sm:$0xff]  ;;  %v46_v21 = vld [vmem:[%s644_s1 + $0x68] sm:$0xff] }
   0x6   :  { %363 = vmatprep.subr.bf16.mxu0 %v362_v5  ;;  %391 = vmatprep.subr.bf16.mxu1 %v362_v5  ;;  %v374_v16 = vpack.c.bf16 %v42_v15, %v41_v14  ;;  %v378_v19 = vpack.c.bf16 %v44_v18, %v43_v17  ;;  %v45_v20 = vld [vmem:[%s644_s1 + $0x60] sm:$0xff]  ;;  %v47_v23 = vld [vmem:[%s644_s1 + $0x70] sm:$0xff]  ;;  %v48_v24 = vld [vmem:[%s644_s1 + $0x78] sm:$0xff] }
   0x7   :  { %334 = vmatprep.mubr.f32.mxu0 %v17_v9  ;;  %346 = vmatprep.mubr.f32.mxu1 %v25_v10  ;;  %v382_v22 = vpack.c.bf16 %v46_v21, %v45_v20  ;;  %v386_v25 = vpack.c.bf16 %v48_v24, %v47_v23  ;;  %v18_v26 = vld [vmem:[%s645_s0 + $0x8] sm:$0xff]  ;;  %v19_v28 = vld [vmem:[%s645_s0 + $0x10] sm:$0xff]  ;;  %v20_v30 = vld [vmem:[%s645_s0 + $0x18] sm:$0xff] }
   0x8   :  { %v26_v27 = vld [vmem:[%s645_s0 + $0x48] sm:$0xff]  ;;  %v27_v29 = vld [vmem:[%s645_s0 + $0x50] sm:$0xff]  ;;  %v28_v31 = vld [vmem:[%s645_s0 + $0x58] sm:$0xff] }
   0x9   :  { %365 = vmatpush3.bf16.msra.mxu0 %v362_v5  ;;  %399 = vmatpush3.bf16.msra.mxu1 %v362_v5  ;;  %v21_v32 = vld [vmem:[%s645_s0 + $0x20] sm:$0xff]  ;;  %v22_v34 = vld [vmem:[%s645_s0 + $0x28] sm:$0xff]  ;;  %v23_v36 = vld [vmem:[%s645_s0 + $0x30] sm:$0xff] }
   0xa   :  { %367 = vmatprep.subr.bf16.mxu0 %v366_v8  ;;  %392 = vmatprep.subr.bf16.mxu1 %v366_v8  ;;  %v29_v33 = vld [vmem:[%s645_s0 + $0x60] sm:$0xff]  ;;  %v30_v35 = vld [vmem:[%s645_s0 + $0x68] sm:$0xff]  ;;  %v31_v37 = vld [vmem:[%s645_s0 + $0x70] sm:$0xff] }
   0xb   :  { %v24_v38 = vld [vmem:[%s645_s0 + $0x38] sm:$0xff]  ;;  %v530_v40 = vld [vmem:[%s646_s2] ss:$0 sm:$0xff]  ;;  %v202_v42 = vld [vmem:[%s647_s3 + $0x8] sm:$0xff] }
   0xc   :  { %v32_v39 = vld [vmem:[%s645_s0 + $0x78] sm:$0xff]  ;;  %v210_v44 = vld [vmem:[%s647_s3 + $0x48] sm:$0xff]  ;;  %v201_v48 = vld [vmem:[%s647_s3] sm:$0xff] }
   0xd   :  { %369 = vmatpush3.bf16.msra.mxu0 %v366_v8  ;;  %400 = vmatpush3.bf16.msra.mxu1 %v366_v8  ;;  %v209_v50 = vld [vmem:[%s647_s3 + $0x40] sm:$0xff]  ;;  %v204_v58 = vld [vmem:[%s647_s3 + $0x18] sm:$0xff]  ;;  %v203_v2 = vld [vmem:[%s647_s3 + $0x10] sm:$0xff] }
   0xe   :  { %371 = vmatprep.subr.bf16.mxu0 %v370_v13  ;;  %393 = vmatprep.subr.bf16.mxu1 %v370_v13  ;;  %v212_v60 = vld [vmem:[%s647_s3 + $0x58] sm:$0xff]  ;;  %v211_v4 = vld [vmem:[%s647_s3 + $0x50] sm:$0xff]  ;;  %v206_v14 = vld [vmem:[%s647_s3 + $0x28] sm:$0xff] }
   0xf   :  { %v213_v24 = vld [vmem:[%s647_s3 + $0x60] sm:$0xff] }
  0x11   :  { %373 = vmatpush3.bf16.msra.mxu0 %v370_v13  ;;  %401 = vmatpush3.bf16.msra.mxu1 %v370_v13 }
  0x12   :  { %375 = vmatprep.subr.bf16.mxu0 %v374_v16  ;;  %394 = vmatprep.subr.bf16.mxu1 %v374_v16 }
  0x15   :  { %377 = vmatpush3.bf16.msra.mxu0 %v374_v16  ;;  %402 = vmatpush3.bf16.msra.mxu1 %v374_v16  ;;  %v214_v16 = vld [vmem:[%s647_s3 + $0x68] sm:$0xff] }
  0x16   :  { %379 = vmatprep.subr.bf16.mxu0 %v378_v19  ;;  %395 = vmatprep.subr.bf16.mxu1 %v378_v19 }
  0x19   :  { %381 = vmatpush3.bf16.msra.mxu0 %v378_v19  ;;  %403 = vmatpush3.bf16.msra.mxu1 %v378_v19 }
  0x1a   :  { %383 = vmatprep.subr.bf16.mxu0 %v382_v22  ;;  %396 = vmatprep.subr.bf16.mxu1 %v382_v22 }
  0x1d   :  { %385 = vmatpush3.bf16.msra.mxu0 %v382_v22  ;;  %404 = vmatpush3.bf16.msra.mxu1 %v382_v22  ;;  %v205_v22 = vld [vmem:[%s647_s3 + $0x20] sm:$0xff] }
  0x1e   :  { %387 = vmatprep.subr.bf16.mxu0 %v386_v25  ;;  %397 = vmatprep.subr.bf16.mxu1 %v386_v25 }
  0x21   :  { %389 = vmatpush3.bf16.msra.mxu0 %v386_v25  ;;  %405 = vmatpush3.bf16.msra.mxu1 %v386_v25 }
  0x24   :  { %335 = vmatmul.mubr.f32.vlgmr.msra.gmra.mrb[0].mxu0 %v18_v26  ;;  %347 = vmatmul.mubr.f32.vlgmr.msra.gmra.mrb[0].mxu1 %v26_v27 }
  0x25   :  { %337 = vmatprep.mubr.f32.mxu0 %v19_v28  ;;  %349 = vmatprep.mubr.f32.mxu1 %v27_v29 }
  0x28   :  { %338 = vmatmul.mubr.f32.gmra.mrb[2].mxu0 %v20_v30  ;;  %350 = vmatmul.mubr.f32.gmra.mrb[2].mxu1 %v28_v31 }
  0x29   :  { %340 = vmatprep.mubr.f32.mxu0 %v21_v32  ;;  %352 = vmatprep.mubr.f32.mxu1 %v29_v33 }
  0x2c   :  { %341 = vmatmul.mubr.f32.gmra.mrb[4].mxu0 %v22_v34  ;;  %353 = vmatmul.mubr.f32.gmra.mrb[4].mxu1 %v30_v35  ;;  %v208_v34 = vld [vmem:[%s647_s3 + $0x38] sm:$0xff] }
  0x2d   :  { %343 = vmatprep.mubr.f32.mxu0 %v23_v36  ;;  %355 = vmatprep.mubr.f32.mxu1 %v31_v37  ;;  %v216_v36 = vld [vmem:[%s647_s3 + $0x78] sm:$0xff] }
  0x30   :  { %344 = vmatmul.mubr.f32.gmra.mrb[6].mxu0 %v24_v38  ;;  %356 = vmatmul.mubr.f32.gmra.mrb[6].mxu1 %v32_v39 }
  0xf7   :  { %v336_v41 = vpop.f32.mrb[0].mxu0  ;;  %v348_v43 = vpop.f32.mrb[0].mxu1 }
  0xf8   :  { %v128_v45 = vadd.f32 %v336_v41, %v530_v40  ;;  %v168_v46 = vadd.f32 %v348_v43, %v530_v40  ;;  %v122_v47 = vpop.f32.mrb[1].mxu0  ;;  %v162_v49 = vpop.f32.mrb[1].mxu1  ;;  %v207_v43 = vld [vmem:[%s647_s3 + $0x30] sm:$0xff] }
  0xf9   :  { %v123_v51 = vadd.f32 %v530_v40, %v122_v47  ;;  %v163_v52 = vadd.f32 %v530_v40, %v162_v49 }
  0xfa   :  { %v218_v53 = vadd.f32 %v202_v42, %v128_v45  ;;  %v226_v54 = vadd.f32 %v210_v44, %v168_v46  ;;  %v215_v45 = vld [vmem:[%s647_s3 + $0x70] sm:$0xff] }
  0xfb   :  { %v217_v55 = vadd.f32 %v201_v48, %v123_v51  ;;  %v225_v56 = vadd.f32 %v209_v50, %v163_v52  ;;  %v339_v57 = vpop.f32.mrb[2].mxu0  ;;  %v351_v59 = vpop.f32.mrb[2].mxu1 }
  0xfc   :  { %v234_v61 = vmax.f32 %v218_v53, 0.0  ;;  %v242_v62 = vmax.f32 %v226_v54, 0.0  ;;  %v138_v63 = vadd.f32 %v339_v57, %v530_v40  ;;  %v178_v0 = vadd.f32 %v351_v59, %v530_v40  ;;  %v132_v1 = vpop.f32.mrb[3].mxu0  ;;  %v172_v3 = vpop.f32.mrb[3].mxu1 }
  0xfd   :  { %v233_v5 = vmax.f32 %v217_v55, 0.0  ;;  %v241_v6 = vmax.f32 %v225_v56, 0.0  ;;  %v133_v7 = vadd.f32 %v530_v40, %v132_v1  ;;  %v173_v8 = vadd.f32 %v530_v40, %v172_v3 }
  0xfe   :  { %250 = vst [vmem:[%s648_s4 + $0x8] sm:$0xff] %v234_v61  ;;  %258 = vst [vmem:[%s648_s4 + $0x48] sm:$0xff] %v242_v62  ;;  %v220_v9 = vadd.f32 %v204_v58, %v138_v63  ;;  %v228_v10 = vadd.f32 %v212_v60, %v178_v0 }
  0xff   :  { %249 = vst [vmem:[%s648_s4] sm:$0xff] %v233_v5  ;;  %257 = vst [vmem:[%s648_s4 + $0x40] sm:$0xff] %v241_v6  ;;  %v219_v11 = vadd.f32 %v203_v2, %v133_v7  ;;  %v227_v12 = vadd.f32 %v211_v4, %v173_v8  ;;  %v342_v13 = vpop.f32.mrb[4].mxu0  ;;  %v354_v15 = vpop.f32.mrb[4].mxu1 }
 0x100   :  { %v236_v17 = vmax.f32 %v220_v9, 0.0  ;;  %v244_v18 = vmax.f32 %v228_v10, 0.0  ;;  %v148_v19 = vadd.f32 %v342_v13, %v530_v40  ;;  %v188_v20 = vadd.f32 %v354_v15, %v530_v40  ;;  %v142_v21 = vpop.f32.mrb[5].mxu0  ;;  %v182_v23 = vpop.f32.mrb[5].mxu1 }
 0x101   :  { %v235_v25 = vmax.f32 %v219_v11, 0.0  ;;  %v243_v26 = vmax.f32 %v227_v12, 0.0  ;;  %v143_v27 = vadd.f32 %v530_v40, %v142_v21  ;;  %v183_v28 = vadd.f32 %v530_v40, %v182_v23 }
 0x102   :  { %252 = vst [vmem:[%s648_s4 + $0x18] sm:$0xff] %v236_v17  ;;  %260 = vst [vmem:[%s648_s4 + $0x58] sm:$0xff] %v244_v18  ;;  %v222_v29 = vadd.f32 %v206_v14, %v148_v19  ;;  %v230_v30 = vadd.f32 %v214_v16, %v188_v20 }
 0x103   :  { %251 = vst [vmem:[%s648_s4 + $0x10] sm:$0xff] %v235_v25  ;;  %259 = vst [vmem:[%s648_s4 + $0x50] sm:$0xff] %v243_v26  ;;  %v221_v31 = vadd.f32 %v205_v22, %v143_v27  ;;  %v229_v32 = vadd.f32 %v213_v24, %v183_v28  ;;  %v345_v33 = vpop.f32.mrb[6].mxu0  ;;  %v357_v35 = vpop.f32.mrb[6].mxu1 }
 0x104   :  { %v238_v37 = vmax.f32 %v222_v29, 0.0  ;;  %v246_v38 = vmax.f32 %v230_v30, 0.0  ;;  %v158_v39 = vadd.f32 %v345_v33, %v530_v40  ;;  %v198_v41 = vadd.f32 %v357_v35, %v530_v40  ;;  %v152_v42 = vpop.f32.mrb[7].mxu0  ;;  %v192_v44 = vpop.f32.mrb[7].mxu1 }
 0x105   :  { %v237_v46 = vmax.f32 %v221_v31, 0.0  ;;  %v245_v47 = vmax.f32 %v229_v32, 0.0  ;;  %v153_v48 = vadd.f32 %v530_v40, %v152_v42  ;;  %v193_v49 = vadd.f32 %v530_v40, %v192_v44 }
 0x106   :  { %254 = vst [vmem:[%s648_s4 + $0x28] sm:$0xff] %v238_v37  ;;  %262 = vst [vmem:[%s648_s4 + $0x68] sm:$0xff] %v246_v38  ;;  %v224_v50 = vadd.f32 %v208_v34, %v158_v39  ;;  %v232_v51 = vadd.f32 %v216_v36, %v198_v41 }
 0x107   :  { %253 = vst [vmem:[%s648_s4 + $0x20] sm:$0xff] %v237_v46  ;;  %261 = vst [vmem:[%s648_s4 + $0x60] sm:$0xff] %v245_v47  ;;  %v223_v52 = vadd.f32 %v207_v43, %v153_v48  ;;  %v231_v40 = vadd.f32 %v215_v45, %v193_v49 }
 0x108   :  { %v240_v53 = vmax.f32 %v224_v50, 0.0  ;;  %v248_v54 = vmax.f32 %v232_v51, 0.0 }
 0x109   :  { %v239_v55 = vmax.f32 %v223_v52, 0.0  ;;  %v247_v56 = vmax.f32 %v231_v40, 0.0 }
 0x10a   :  { %256 = vst [vmem:[%s648_s4 + $0x38] sm:$0xff] %v240_v53  ;;  %264 = vst [vmem:[%s648_s4 + $0x78] sm:$0xff] %v248_v54 }
 0x10b   :  { %255 = vst [vmem:[%s648_s4 + $0x30] sm:$0xff] %v239_v55  ;;  %263 = vst [vmem:[%s648_s4 + $0x70] sm:$0xff] %v247_v56 }

// kernel: fno2d_forward.19
= control target key start
LH: loop header
LB: loop body
LE: loop exit
PB: predicated region body
PF: predicated region fallthrough
CT: control target
= control target key end

     0   :  { %vm66_vm0 = vcmask 261120   ;;  %s2609_s22 = smov 96   ;;  %s2610_s9 = smov 64   ;;  %vm1729_vm1 = vcmask 7168   ;;  %vm1746_vm2 = vcmask 15360   ;;  %vm1763_vm3 = vcmask 23552   ;;  %s3413_s0 = inlined_call_operand.vmem [shape: f32[128,128], index: 0, kind: input, shape index: {}]   ;;  %s3414_s1 = inlined_call_operand.vmem [shape: f32[32,128], index: 1, kind: input, shape index: {}]   ;;  %s3415_s3 = inlined_call_operand.vmem [shape: f32[128,1], index: 3, kind: input, shape index: {}]   ;;  %s3416_s2 = inlined_call_operand.vmem [shape: f32[1,128], index: 2, kind: input, shape index: {}]   ;;  %s3417_s4 = inlined_call_operand.<no memory space> [shape: f32[1,1], index: 4, kind: input, shape index: {}]   ;;  %s3418_s5 = inlined_call_operand.vmem [shape: f32[128,4], index: 5, kind: output, shape index: {}]  }
   0x1   :  { %v2648_v0 = vld [vmem:[%s3413_s0] sm:$0xff]  ;;  %v2653_v1 = vld [vmem:[%s3413_s0 + $0x10] sm:$0xff]  ;;  %v2662_v2 = vld [vmem:[%s3413_s0 + $0x8] sm:$0xff]  ;;  %s2613_s16 = smov 2   ;;  %s2614_s17 = smov 3   ;;  %vm1780_vm4 = vcmask 31744  }
   0x2   :  { %427 = vrot.lane.b32.xlu0 %v2648_v0, %s2609_s22  ;;  %431 = vrot.lane.b32.xlu1 %v2653_v1, %s2609_s22  ;;  %v2667_v3 = vld [vmem:[%s3413_s0 + $0x18] sm:$0xff]  ;;  %v2678_v4 = vld [vmem:[%s3413_s0 + $0x20] sm:$0xff] }
   0x3   :  { %2083 = vmatprep.mubr.msk.f32.mxu0 %vm66_vm0, %v2648_v0  ;;  %v2683_v5 = vld [vmem:[%s3413_s0 + $0x28] sm:$0xff]  ;;  %v38_v6 = vld [vmem:[%s3414_s1] sm:$0xff]  ;;  %v40_v8 = vld [vmem:[%s3414_s1 + $0x10] sm:$0xff] }
   0x4   :  { %v39_v7 = vld [vmem:[%s3414_s1 + $0x8] sm:$0xff]  ;;  %v41_v10 = vld [vmem:[%s3414_s1 + $0x18] sm:$0xff]  ;;  %v2708_v12 = vld [vmem:[%s3413_s0 + $0x30] sm:$0xff] }
   0x5   :  { %v2694_v9 = vpack.c.bf16 %v39_v7, %v38_v6  ;;  %v2699_v11 = vpack.c.bf16 %v41_v10, %v40_v8  ;;  %v2713_v13 = vld [vmem:[%s3413_s0 + $0x38] sm:$0xff]  ;;  %v30_v14 = vld [vmem:[%s3413_s0 + $0x40] sm:$0xff]  ;;  %v31_v15 = vld [vmem:[%s3413_s0 + $0x48] sm:$0xff] }
   0x6   :  { %429 = vrot.lane.b32.xlu0 %v2662_v2, %s2609_s22  ;;  %433 = vrot.lane.b32.xlu1 %v2667_v3, %s2609_s22  ;;  %v32_v16 = vld [vmem:[%s3413_s0 + $0x50] sm:$0xff]  ;;  %v33_v17 = vld [vmem:[%s3413_s0 + $0x58] sm:$0xff] }
   0x7   :  { %2428 = vmatprep.subr.bf16.mxu0 %v2694_v9  ;;  %v34_v18 = vld [vmem:[%s3413_s0 + $0x60] sm:$0xff]  ;;  %v35_v19 = vld [vmem:[%s3413_s0 + $0x68] sm:$0xff]  ;;  %v36_v20 = vld [vmem:[%s3413_s0 + $0x70] sm:$0xff] }
   0x8   :  { %2430 = vmatpush3.bf16.msra.mxu0 %v2694_v9  ;;  %v37_v21 = vld [vmem:[%s3413_s0 + $0x78] sm:$0xff]  ;;  %s2611_s0 = smov 32   ;;  %v43_v22 = vld [vmem:[%s3415_s3] sm:$0xff]  ;;  %v44_v23 = vld [vmem:[%s3415_s3 + $0x8] sm:$0xff] }
   0x9   :  { %2432 = vmatprep.subr.bf16.mxu0 %v2699_v11  ;;  %v2816_v24 = vpack.c.bf16 %v44_v23, %v43_v22  ;;  %v45_v25 = vld [vmem:[%s3415_s3 + $0x10] sm:$0xff]  ;;  %v46_v26 = vld [vmem:[%s3415_s3 + $0x18] sm:$0xff]  ;;  %v47_v28 = vld [vmem:[%s3415_s3 + $0x20] sm:$0xff] }
   0xa   :  { %435 = vrot.lane.b32.xlu0 %v2678_v4, %s2609_s22  ;;  %437 = vrot.lane.b32.xlu1 %v2683_v5, %s2609_s22  ;;  %v2824_v27 = vpack.c.bf16 %v46_v26, %v45_v25  ;;  %v48_v29 = vld [vmem:[%s3415_s3 + $0x28] sm:$0xff]  ;;  %v49_v31 = vld [vmem:[%s3415_s3 + $0x30] sm:$0xff] }
   0xb   :  { %2436 = vmatprep.subr.bf16.mxu1 %v2816_v24  ;;  %v2837_v30 = vpack.c.bf16 %v48_v29, %v47_v28  ;;  %v50_v32 = vld [vmem:[%s3415_s3 + $0x38] sm:$0xff]  ;;  %v51_v34 = vld [vmem:[%s3415_s3 + $0x40] sm:$0xff]  ;;  %v52_v35 = vld [vmem:[%s3415_s3 + $0x48] sm:$0xff] }
   0xc   :  { %2434 = vmatpush3.bf16.msra.mxu0 %v2699_v11  ;;  %2438 = vmatpush3.bf16.msra.mxu1 %v2816_v24  ;;  %v2849_v33 = vpack.c.bf16 %v50_v32, %v49_v31  ;;  %v2859_v36 = vpack.c.bf16 %v52_v35, %v51_v34  ;;  %v53_v37 = vld [vmem:[%s3415_s3 + $0x50] sm:$0xff]  ;;  %v54_v38 = vld [vmem:[%s3415_s3 + $0x58] sm:$0xff]  ;;  %v55_v40 = vld [vmem:[%s3415_s3 + $0x60] sm:$0xff] }
   0xd   :  { %2468 = vmatprep.subr.bf16.mxu0 %v2694_v9  ;;  %2440 = vmatprep.subr.bf16.mxu1 %v2824_v27  ;;  %v2869_v39 = vpack.c.bf16 %v54_v38, %v53_v37  ;;  %v56_v41 = vld [vmem:[%s3415_s3 + $0x68] sm:$0xff]  ;;  %v57_v43 = vld [vmem:[%s3415_s3 + $0x70] sm:$0xff]  ;;  %v58_v44 = vld [vmem:[%s3415_s3 + $0x78] sm:$0xff] }
   0xe   :  { %439 = vrot.lane.b32.xlu0 %v2708_v12, %s2609_s22  ;;  %441 = vrot.lane.b32.xlu1 %v2713_v13, %s2609_s22  ;;  %v2879_v42 = vpack.c.bf16 %v56_v41, %v55_v40  ;;  %v2889_v45 = vpack.c.bf16 %v58_v44, %v57_v43  ;;  %v2969_v34 = vld [vmem:[%s3416_s2] ss:$0 sm:$0xff] }
   0xf   :  { %2084 = vmatmul.mubr.msk.f32.vlgmr.msra.gmra.mrb[0].mxu0 %vm66_vm0, %v2662_v2 }
  0x10   :  { %2086 = vmatprep.mubr.msk.f32.mxu0 %vm66_vm0, %v2653_v1  ;;  %2470 = vmatpush3.bf16.msra.mxu0 %v2694_v9 }
  0x11   :  { %2472 = vmatprep.subr.bf16.mxu0 %v2699_v11  ;;  %2442 = vmatpush3.bf16.msra.mxu1 %v2824_v27 }
  0x12   :  { %443 = vrot.lane.b32.xlu0 %v30_v14, %s2609_s22  ;;  %445 = vrot.lane.b32.xlu1 %v31_v15, %s2609_s22 }
  0x13   :  { %2087 = vmatmul.mubr.msk.f32.gmra.mrb[2].mxu0 %vm66_vm0, %v2667_v3  ;;  %2444 = vmatprep.subr.bf16.mxu1 %v2837_v30 }
  0x14   :  { %2089 = vmatprep.mubr.msk.f32.mxu0 %vm66_vm0, %v2678_v4  ;;  %2474 = vmatpush3.bf16.msra.mxu0 %v2699_v11 }
  0x15   :  { %2508 = vmatprep.subr.bf16.mxu0 %v2694_v9  ;;  %2446 = vmatpush3.bf16.msra.mxu1 %v2837_v30 }
  0x16   :  { %447 = vrot.lane.b32.xlu0 %v32_v16, %s2609_s22  ;;  %449 = vrot.lane.b32.xlu1 %v33_v17, %s2609_s22 }
  0x17   :  { %2090 = vmatmul.mubr.msk.f32.gmra.mrb[4].mxu0 %vm66_vm0, %v2683_v5  ;;  %2448 = vmatprep.subr.bf16.mxu1 %v2849_v33 }
  0x18   :  { %2092 = vmatprep.mubr.msk.f32.mxu0 %vm66_vm0, %v2708_v12 }
  0x19   :  { %2450 = vmatpush3.bf16.msra.mxu1 %v2849_v33 }
  0x1a   :  { %451 = vrot.lane.b32.xlu0 %v34_v18, %s2609_s22  ;;  %453 = vrot.lane.b32.xlu1 %v35_v19, %s2609_s22 }
  0x1b   :  { %2093 = vmatmul.mubr.msk.f32.gmra.mrb[6].mxu0 %vm66_vm0, %v2713_v13  ;;  %2452 = vmatprep.subr.bf16.mxu1 %v2859_v36 }
  0x1c   :  { %2095 = vmatprep.mubr.msk.f32.mxu0 %vm66_vm0, %v30_v14 }
  0x1d   :  { %2454 = vmatpush3.bf16.msra.mxu1 %v2859_v36 }
  0x1e   :  { %455 = vrot.lane.b32.xlu0 %v36_v20, %s2609_s22  ;;  %457 = vrot.lane.b32.xlu1 %v37_v21, %s2609_s22 }
  0x1f   :  { %2096 = vmatmul.mubr.msk.f32.gmra.mrb[8].mxu0 %vm66_vm0, %v31_v15  ;;  %2456 = vmatprep.subr.bf16.mxu1 %v2869_v39 }
  0x20   :  { %2098 = vmatprep.mubr.msk.f32.mxu0 %vm66_vm0, %v32_v16 }
  0x21   :  { %2458 = vmatpush3.bf16.msra.mxu1 %v2869_v39 }
  0x22   :  { %797 = vrot.lane.b32.xlu0 %v2648_v0, %s2610_s9  ;;  %799 = vrot.lane.b32.xlu1 %v2662_v2, %s2610_s9 }
  0x23   :  { %2099 = vmatmul.mubr.msk.f32.gmra.mrb[10].mxu0 %vm66_vm0, %v33_v17  ;;  %2460 = vmatprep.subr.bf16.mxu1 %v2879_v42 }
  0x24   :  { %2101 = vmatprep.mubr.msk.f32.mxu0 %vm66_vm0, %v34_v18 }
  0x25   :  { %2462 = vmatpush3.bf16.msra.mxu1 %v2879_v42 }
  0x26   :  { %801 = vrot.lane.b32.xlu0 %v2653_v1, %s2610_s9  ;;  %803 = vrot.lane.b32.xlu1 %v2667_v3, %s2610_s9 }
  0x27   :  { %2102 = vmatmul.mubr.msk.f32.gmra.mrb[12].mxu0 %vm66_vm0, %v35_v19  ;;  %2464 = vmatprep.subr.bf16.mxu1 %v2889_v45 }
  0x28   :  { %2104 = vmatprep.mubr.msk.f32.mxu0 %vm66_vm0, %v36_v20 }
  0x29   :  { %2466 = vmatpush3.bf16.msra.mxu1 %v2889_v45 }
  0x2a   :  { %805 = vrot.lane.b32.xlu0 %v2678_v4, %s2610_s9  ;;  %807 = vrot.lane.b32.xlu1 %v2683_v5, %s2610_s9 }
  0x2b   :  { %2105 = vmatmul.mubr.msk.f32.gmra.mrb[14].mxu0 %vm66_vm0, %v37_v21  ;;  %2476 = vmatprep.subr.bf16.mxu1 %v2816_v24 }
  0x2e   :  { %809 = vrot.lane.b32.xlu0 %v2708_v12, %s2610_s9  ;;  %811 = vrot.lane.b32.xlu1 %v2713_v13, %s2610_s9 }
  0x32   :  { %813 = vrot.lane.b32.xlu0 %v30_v14, %s2610_s9  ;;  %815 = vrot.lane.b32.xlu1 %v31_v15, %s2610_s9 }
  0x36   :  { %817 = vrot.lane.b32.xlu0 %v32_v16, %s2610_s9  ;;  %819 = vrot.lane.b32.xlu1 %v33_v17, %s2610_s9 }
  0x3a   :  { %821 = vrot.lane.b32.xlu0 %v34_v18, %s2610_s9  ;;  %823 = vrot.lane.b32.xlu1 %v35_v19, %s2610_s9 }
  0x3e   :  { %825 = vrot.lane.b32.xlu0 %v36_v20, %s2610_s9  ;;  %827 = vrot.lane.b32.xlu1 %v37_v21, %s2610_s9 }
  0x42   :  { %1167 = vrot.lane.b32.xlu0 %v2648_v0, %s2611_s0  ;;  %1169 = vrot.lane.b32.xlu1 %v2662_v2, %s2611_s0 }
  0x46   :  { %1171 = vrot.lane.b32.xlu0 %v2653_v1, %s2611_s0  ;;  %1173 = vrot.lane.b32.xlu1 %v2667_v3, %s2611_s0 }
  0x4a   :  { %1175 = vrot.lane.b32.xlu0 %v2678_v4, %s2611_s0  ;;  %1177 = vrot.lane.b32.xlu1 %v2683_v5, %s2611_s0 }
  0x4e   :  { %1179 = vrot.lane.b32.xlu0 %v2708_v12, %s2611_s0  ;;  %1181 = vrot.lane.b32.xlu1 %v2713_v13, %s2611_s0 }
  0x52   :  { %1183 = vrot.lane.b32.xlu0 %v30_v14, %s2611_s0  ;;  %1185 = vrot.lane.b32.xlu1 %v31_v15, %s2611_s0 }
  0x56   :  { %1187 = vrot.lane.b32.xlu0 %v32_v16, %s2611_s0  ;;  %1189 = vrot.lane.b32.xlu1 %v33_v17, %s2611_s0 }
  0x5a   :  { %1191 = vrot.lane.b32.xlu0 %v34_v18, %s2611_s0  ;;  %1193 = vrot.lane.b32.xlu1 %v35_v19, %s2611_s0 }
  0x5e   :  { %1195 = vrot.lane.b32.xlu0 %v36_v20, %s2611_s0  ;;  %1197 = vrot.lane.b32.xlu1 %v37_v21, %s2611_s0 }
  0x74   :  { %v428_v46 = vpop.permute.xlu0 %427  ;;  %v432_v47 = vpop.permute.xlu1 %431 }
  0x75   :  { %2171 = vmatprep.mubr.msk.f32.mxu0 %vm66_vm0, %v428_v46 }
  0x78   :  { %v430_v48 = vpop.permute.xlu0 %429  ;;  %v434_v49 = vpop.permute.xlu1 %433 }
  0x79   :  { %2172 = vmatmul.mubr.msk.f32.vlgmr.msra.gmra.mrb[16].mxu0 %vm66_vm0, %v430_v48 }
  0x7a   :  { %2510 = vmatpush3.bf16.msra.mxu0 %v2694_v9  ;;  %2174 = vmatprep.mubr.msk.f32.mxu0 %vm66_vm0, %v432_v47 }
  0x7b   :  { %2512 = vmatprep.subr.bf16.mxu0 %v2699_v11 }
  0x7c   :  { %v436_v50 = vpop.permute.xlu0 %435  ;;  %v438_v51 = vpop.permute.xlu1 %437 }
  0x7d   :  { %2175 = vmatmul.mubr.msk.f32.gmra.mrb[18].mxu0 %vm66_vm0, %v434_v49 }
  0x7e   :  { %2177 = vmatprep.mubr.msk.f32.mxu0 %vm66_vm0, %v436_v50  ;;  %2514 = vmatpush3.bf16.msra.mxu0 %v2699_v11 }
  0x7f   :  { %2548 = vmatprep.subr.bf16.mxu0 %v2694_v9 }
  0x80   :  { %v440_v52 = vpop.permute.xlu0 %439  ;;  %v442_v53 = vpop.permute.xlu1 %441 }
  0x81   :  { %2178 = vmatmul.mubr.msk.f32.gmra.mrb[20].mxu0 %vm66_vm0, %v438_v51 }
  0x82   :  { %2180 = vmatprep.mubr.msk.f32.mxu0 %vm66_vm0, %v440_v52 }
  0x84   :  { %v444_v54 = vpop.permute.xlu0 %443  ;;  %v446_v55 = vpop.permute.xlu1 %445 }
  0x85   :  { %2181 = vmatmul.mubr.msk.f32.gmra.mrb[22].mxu0 %vm66_vm0, %v442_v53 }
  0x86   :  { %2183 = vmatprep.mubr.msk.f32.mxu0 %vm66_vm0, %v444_v54 }
  0x88   :  { %v448_v56 = vpop.permute.xlu0 %447  ;;  %v450_v57 = vpop.permute.xlu1 %449 }
  0x89   :  { %2184 = vmatmul.mubr.msk.f32.gmra.mrb[24].mxu0 %vm66_vm0, %v446_v55 }
  0x8a   :  { %2186 = vmatprep.mubr.msk.f32.mxu0 %vm66_vm0, %v448_v56 }
  0x8c   :  { %v452_v58 = vpop.permute.xlu0 %451  ;;  %v454_v59 = vpop.permute.xlu1 %453 }
  0x8d   :  { %2187 = vmatmul.mubr.msk.f32.gmra.mrb[26].mxu0 %vm66_vm0, %v450_v57 }
  0x8e   :  { %2189 = vmatprep.mubr.msk.f32.mxu0 %vm66_vm0, %v452_v58 }
  0x90   :  { %v456_v60 = vpop.permute.xlu0 %455  ;;  %v458_v61 = vpop.permute.xlu1 %457 }
  0x91   :  { %2190 = vmatmul.mubr.msk.f32.gmra.mrb[28].mxu0 %vm66_vm0, %v454_v59 }
  0x92   :  { %2192 = vmatprep.mubr.msk.f32.mxu0 %vm66_vm0, %v456_v60 }
  0x94   :  { %v798_v62 = vpop.permute.xlu0 %797  ;;  %v800_v63 = vpop.permute.xlu1 %799 }
  0x95   :  { %2193 = vmatmul.mubr.msk.f32.gmra.mrb[30].mxu0 %vm66_vm0, %v458_v61 }
  0x96   :  { %2259 = vmatprep.mubr.msk.f32.mxu0 %vm66_vm0, %v798_v62 }
  0x98   :  { %v802_v0 = vpop.permute.xlu0 %801  ;;  %v804_v1 = vpop.permute.xlu1 %803 }
  0x99   :  { %2260 = vmatmul.mubr.msk.f32.vlgmr.msra.gmra.mrb[32].mxu0 %vm66_vm0, %v800_v63 }
  0x9a   :  { %2550 = vmatpush3.bf16.msra.mxu0 %v2694_v9  ;;  %2262 = vmatprep.mubr.msk.f32.mxu0 %vm66_vm0, %v802_v0 }
  0x9b   :  { %2552 = vmatprep.subr.bf16.mxu0 %v2699_v11 }
  0x9c   :  { %v806_v2 = vpop.permute.xlu0 %805  ;;  %v808_v3 = vpop.permute.xlu1 %807 }
  0x9d   :  { %2263 = vmatmul.mubr.msk.f32.gmra.mrb[34].mxu0 %vm66_vm0, %v804_v1 }
  0x9e   :  { %2265 = vmatprep.mubr.msk.f32.mxu0 %vm66_vm0, %v806_v2  ;;  %2554 = vmatpush3.bf16.msra.mxu0 %v2699_v11 }
  0x9f   :  { %2556 = vmatprep.subr.bf16.mxu0 %v2816_v24 }
  0xa0   :  { %v810_v4 = vpop.permute.xlu0 %809  ;;  %v812_v5 = vpop.permute.xlu1 %811 }
  0xa1   :  { %2266 = vmatmul.mubr.msk.f32.gmra.mrb[36].mxu0 %vm66_vm0, %v808_v3 }
  0xa2   :  { %2268 = vmatprep.mubr.msk.f32.mxu0 %vm66_vm0, %v810_v4 }
  0xa4   :  { %v814_v6 = vpop.permute.xlu0 %813  ;;  %v816_v7 = vpop.permute.xlu1 %815 }
  0xa5   :  { %2269 = vmatmul.mubr.msk.f32.gmra.mrb[38].mxu0 %vm66_vm0, %v812_v5 }
  0xa6   :  { %2271 = vmatprep.mubr.msk.f32.mxu0 %vm66_vm0, %v814_v6 }
  0xa8   :  { %v818_v8 = vpop.permute.xlu0 %817  ;;  %v820_v9 = vpop.permute.xlu1 %819 }
  0xa9   :  { %2272 = vmatmul.mubr.msk.f32.gmra.mrb[40].mxu0 %vm66_vm0, %v816_v7 }
  0xaa   :  { %2274 = vmatprep.mubr.msk.f32.mxu0 %vm66_vm0, %v818_v8 }
  0xac   :  { %v822_v10 = vpop.permute.xlu0 %821  ;;  %v824_v11 = vpop.permute.xlu1 %823 }
  0xad   :  { %2275 = vmatmul.mubr.msk.f32.gmra.mrb[42].mxu0 %vm66_vm0, %v820_v9 }
  0xae   :  { %2277 = vmatprep.mubr.msk.f32.mxu0 %vm66_vm0, %v822_v10 }
  0xb0   :  { %v826_v12 = vpop.permute.xlu0 %825  ;;  %v828_v13 = vpop.permute.xlu1 %827 }
  0xb1   :  { %2278 = vmatmul.mubr.msk.f32.gmra.mrb[44].mxu0 %vm66_vm0, %v824_v11 }
  0xb2   :  { %2280 = vmatprep.mubr.msk.f32.mxu0 %vm66_vm0, %v826_v12 }
  0xb4   :  { %v1168_v14 = vpop.permute.xlu0 %1167  ;;  %v1170_v15 = vpop.permute.xlu1 %1169 }
  0xb5   :  { %2281 = vmatmul.mubr.msk.f32.gmra.mrb[46].mxu0 %vm66_vm0, %v828_v13 }
  0xb6   :  { %2347 = vmatprep.mubr.msk.f32.mxu0 %vm66_vm0, %v1168_v14 }
  0xb8   :  { %v1172_v16 = vpop.permute.xlu0 %1171  ;;  %v1174_v17 = vpop.permute.xlu1 %1173 }
  0xb9   :  { %2348 = vmatmul.mubr.msk.f32.vlgmr.msra.gmra.mrb[48].mxu0 %vm66_vm0, %v1170_v15 }
  0xba   :  { %2350 = vmatprep.mubr.msk.f32.mxu0 %vm66_vm0, %v1172_v16  ;;  %2558 = vmatpush3.bf16.msra.mxu0 %v2816_v24 }
  0xbb   :  { %2560 = vmatprep.subr.bf16.mxu0 %v2824_v27 }
  0xbc   :  { %v1176_v18 = vpop.permute.xlu0 %1175  ;;  %v1178_v19 = vpop.permute.xlu1 %1177 }
  0xbd   :  { %2351 = vmatmul.mubr.msk.f32.gmra.mrb[50].mxu0 %vm66_vm0, %v1174_v17 }
  0xbe   :  { %2353 = vmatprep.mubr.msk.f32.mxu0 %vm66_vm0, %v1176_v18  ;;  %2562 = vmatpush3.bf16.msra.mxu0 %v2824_v27 }
  0xbf   :  { %2564 = vmatprep.subr.bf16.mxu0 %v2837_v30 }
  0xc0   :  { %v1180_v20 = vpop.permute.xlu0 %1179  ;;  %v1182_v21 = vpop.permute.xlu1 %1181 }
  0xc1   :  { %2354 = vmatmul.mubr.msk.f32.gmra.mrb[52].mxu0 %vm66_vm0, %v1178_v19 }
  0xc2   :  { %2356 = vmatprep.mubr.msk.f32.mxu0 %vm66_vm0, %v1180_v20  ;;  %2566 = vmatpush3.bf16.msra.mxu0 %v2837_v30 }
  0xc3   :  { %2568 = vmatprep.subr.bf16.mxu0 %v2849_v33 }
  0xc4   :  { %v1184_v22 = vpop.permute.xlu0 %1183  ;;  %v1186_v23 = vpop.permute.xlu1 %1185 }
  0xc5   :  { %2357 = vmatmul.mubr.msk.f32.gmra.mrb[54].mxu0 %vm66_vm0, %v1182_v21 }
  0xc6   :  { %2359 = vmatprep.mubr.msk.f32.mxu0 %vm66_vm0, %v1184_v22  ;;  %2570 = vmatpush3.bf16.msra.mxu0 %v2849_v33 }
  0xc7   :  { %2572 = vmatprep.subr.bf16.mxu0 %v2859_v36 }
  0xc8   :  { %v1188_v25 = vpop.permute.xlu0 %1187  ;;  %v1190_v26 = vpop.permute.xlu1 %1189 }
  0xc9   :  { %2360 = vmatmul.mubr.msk.f32.gmra.mrb[56].mxu0 %vm66_vm0, %v1186_v23  ;;  %v10_v23 = vstv %s3417_s4  ;;  %s2612_s4 = smov 1  }
  0xca   :  { %2362 = vmatprep.mubr.msk.f32.mxu0 %vm66_vm0, %v1188_v25  ;;  %2574 = vmatpush3.bf16.msra.mxu0 %v2859_v36  ;;  %11 = vst [vmem:[#allocation2] sm:$0x1] %v10_v23 }
  0xcb   :  { %2576 = vmatprep.subr.bf16.mxu0 %v2869_v39 }
  0xcc   :  { %v1192_v28 = vpop.permute.xlu0 %1191  ;;  %v1194_v29 = vpop.permute.xlu1 %1193 }
  0xcd   :  { %2363 = vmatmul.mubr.msk.f32.gmra.mrb[58].mxu0 %vm66_vm0, %v1190_v26 }
  0xce   :  { %2365 = vmatprep.mubr.msk.f32.mxu0 %vm66_vm0, %v1192_v28  ;;  %2578 = vmatpush3.bf16.msra.mxu0 %v2869_v39 }
  0xcf   :  { %2580 = vmatprep.subr.bf16.mxu0 %v2879_v42 }
  0xd0   :  { %v1196_v31 = vpop.permute.xlu0 %1195  ;;  %v1198_v32 = vpop.permute.xlu1 %1197 }
  0xd1   :  { %2366 = vmatmul.mubr.msk.f32.gmra.mrb[60].mxu0 %vm66_vm0, %v1194_v29 }
  0xd2   :  { %2368 = vmatprep.mubr.msk.f32.mxu0 %vm66_vm0, %v1196_v31  ;;  %2582 = vmatpush3.bf16.msra.mxu0 %v2879_v42 }
  0xd3   :  { %2584 = vmatprep.subr.bf16.mxu0 %v2889_v45 }
  0xd5   :  { %2369 = vmatmul.mubr.msk.f32.gmra.mrb[62].mxu0 %vm66_vm0, %v1198_v32 }
  0xd6   :  { %2586 = vmatpush3.bf16.msra.mxu0 %v2889_v45 }
  0xe2   :  { %v2085_v35 = vpop.f32.mrb[0].mxu0 }
  0xe3   :  { %v187_v37 = vadd.f32 %v2085_v35, %v2969_v34  ;;  %v181_v38 = vpop.f32.mrb[1].mxu0 }
  0xe4   :  { %v182_v40 = vadd.f32 %v2969_v34, %v181_v38 }
  0xe5   :  { %v261_v41 = vmax.f32 %v187_v37, 0.0 }
  0xe6   :  { %v2088_v43 = vpop.f32.mrb[2].mxu0  ;;  %v260_v44 = vmax.f32 %v182_v40, 0.0 }
  0xe7   :  { %v197_v46 = vadd.f32 %v2088_v43, %v2969_v34  ;;  %v191_v47 = vpop.f32.mrb[3].mxu0 }
  0xe8   :  { %v192_v48 = vadd.f32 %v2969_v34, %v191_v47  ;;  %2139 = vmatprep.mubr.f32.mxu1 %v260_v44 }
  0xe9   :  { %v263_v49 = vmax.f32 %v197_v46, 0.0  ;;  %2140 = vmatmul.mubr.f32.vlgmr.msra.gmra.mrb[0].mxu1 %v261_v41 }
  0xea   :  { %v262_v50 = vmax.f32 %v192_v48, 0.0  ;;  %v2091_v51 = vpop.f32.mrb[4].mxu0  ;;  %2478 = vmatpush3.bf16.msra.mxu1 %v2816_v24 }
  0xeb   :  { %v207_v52 = vadd.f32 %v2091_v51, %v2969_v34  ;;  %v201_v53 = vpop.f32.mrb[5].mxu0  ;;  %2480 = vmatprep.subr.bf16.mxu1 %v2824_v27 }
  0xec   :  { %v202_v54 = vadd.f32 %v2969_v34, %v201_v53  ;;  %2142 = vmatprep.mubr.f32.mxu1 %v262_v50 }
  0xed   :  { %v265_v55 = vmax.f32 %v207_v52, 0.0  ;;  %2143 = vmatmul.mubr.f32.gmra.mrb[2].mxu1 %v263_v49 }
  0xee   :  { %v264_v56 = vmax.f32 %v202_v54, 0.0  ;;  %v2094_v57 = vpop.f32.mrb[6].mxu0  ;;  %2482 = vmatpush3.bf16.msra.mxu1 %v2824_v27 }
  0xef   :  { %v217_v58 = vadd.f32 %v2094_v57, %v2969_v34  ;;  %v211_v59 = vpop.f32.mrb[7].mxu0  ;;  %2484 = vmatprep.subr.bf16.mxu1 %v2837_v30 }
  0xf0   :  { %v212_v60 = vadd.f32 %v2969_v34, %v211_v59  ;;  %2145 = vmatprep.mubr.f32.mxu1 %v264_v56 }
  0xf1   :  { %v267_v61 = vmax.f32 %v217_v58, 0.0  ;;  %2146 = vmatmul.mubr.f32.gmra.mrb[4].mxu1 %v265_v55 }
  0xf2   :  { %v266_v62 = vmax.f32 %v212_v60, 0.0  ;;  %v2097_v63 = vpop.f32.mrb[8].mxu0  ;;  %2486 = vmatpush3.bf16.msra.mxu1 %v2837_v30 }
  0xf3   :  { %v227_v0 = vadd.f32 %v2097_v63, %v2969_v34  ;;  %v221_v1 = vpop.f32.mrb[9].mxu0  ;;  %2488 = vmatprep.subr.bf16.mxu1 %v2849_v33 }
  0xf4   :  { %v222_v2 = vadd.f32 %v2969_v34, %v221_v1  ;;  %2148 = vmatprep.mubr.f32.mxu1 %v266_v62 }
  0xf5   :  { %v269_v3 = vmax.f32 %v227_v0, 0.0  ;;  %2149 = vmatmul.mubr.f32.gmra.mrb[6].mxu1 %v267_v61 }
  0xf6   :  { %v268_v4 = vmax.f32 %v222_v2, 0.0  ;;  %v2100_v5 = vpop.f32.mrb[10].mxu0  ;;  %2490 = vmatpush3.bf16.msra.mxu1 %v2849_v33 }
  0xf7   :  { %v237_v6 = vadd.f32 %v2100_v5, %v2969_v34  ;;  %v231_v7 = vpop.f32.mrb[11].mxu0  ;;  %2492 = vmatprep.subr.bf16.mxu1 %v2859_v36 }
  0xf8   :  { %v232_v8 = vadd.f32 %v2969_v34, %v231_v7  ;;  %2151 = vmatprep.mubr.f32.mxu1 %v268_v4 }
  0xf9   :  { %v271_v9 = vmax.f32 %v237_v6, 0.0  ;;  %2152 = vmatmul.mubr.f32.gmra.mrb[8].mxu1 %v269_v3 }
  0xfa   :  { %v270_v10 = vmax.f32 %v232_v8, 0.0  ;;  %v2103_v11 = vpop.f32.mrb[12].mxu0  ;;  %2494 = vmatpush3.bf16.msra.mxu1 %v2859_v36 }
  0xfb   :  { %v247_v12 = vadd.f32 %v2103_v11, %v2969_v34  ;;  %v241_v13 = vpop.f32.mrb[13].mxu0  ;;  %2496 = vmatprep.subr.bf16.mxu1 %v2869_v39 }
  0xfc   :  { %v242_v14 = vadd.f32 %v2969_v34, %v241_v13  ;;  %2154 = vmatprep.mubr.f32.mxu1 %v270_v10 }
  0xfd   :  { %v273_v15 = vmax.f32 %v247_v12, 0.0  ;;  %2155 = vmatmul.mubr.f32.gmra.mrb[10].mxu1 %v271_v9 }
  0xfe   :  { %v272_v16 = vmax.f32 %v242_v14, 0.0  ;;  %v2106_v17 = vpop.f32.mrb[14].mxu0  ;;  %2498 = vmatpush3.bf16.msra.mxu1 %v2869_v39 }
  0xff   :  { %v257_v18 = vadd.f32 %v2106_v17, %v2969_v34  ;;  %v251_v19 = vpop.f32.mrb[15].mxu0  ;;  %2500 = vmatprep.subr.bf16.mxu1 %v2879_v42 }
 0x100   :  { %v252_v20 = vadd.f32 %v2969_v34, %v251_v19  ;;  %2157 = vmatprep.mubr.f32.mxu1 %v272_v16 }
 0x101   :  { %v275_v21 = vmax.f32 %v257_v18, 0.0  ;;  %2158 = vmatmul.mubr.f32.gmra.mrb[12].mxu1 %v273_v15 }
 0x102   :  { %v274_v22 = vmax.f32 %v252_v20, 0.0  ;;  %2502 = vmatpush3.bf16.msra.mxu1 %v2879_v42 }
 0x103   :  { %2504 = vmatprep.subr.bf16.mxu1 %v2889_v45 }
 0x104   :  { %2160 = vmatprep.mubr.f32.mxu1 %v274_v22 }
 0x105   :  { %2161 = vmatmul.mubr.f32.gmra.mrb[14].mxu1 %v275_v21 }
 0x106   :  { %2506 = vmatpush3.bf16.msra.mxu1 %v2889_v45 }
 0x107   :  { %2516 = vmatprep.subr.bf16.mxu1 %v2816_v24 }
 0x14c   :  { %v2173_v25 = vpop.f32.mrb[16].mxu0 }
 0x14d   :  { %v563_v26 = vadd.f32 %v2173_v25, %v2969_v34  ;;  %v557_v28 = vpop.f32.mrb[17].mxu0 }
 0x14e   :  { %v558_v29 = vadd.f32 %v2969_v34, %v557_v28 }
 0x14f   :  { %v637_v35 = vmax.f32 %v563_v26, 0.0 }
 0x150   :  { %v636_v31 = vmax.f32 %v558_v29, 0.0  ;;  %v2176_v32 = vpop.f32.mrb[18].mxu0 }
 0x151   :  { %v573_v37 = vadd.f32 %v2176_v32, %v2969_v34  ;;  %v567_v38 = vpop.f32.mrb[19].mxu0 }
 0x152   :  { %v568_v40 = vadd.f32 %v2969_v34, %v567_v38  ;;  %2227 = vmatprep.mubr.f32.mxu1 %v636_v31 }
 0x153   :  { %2228 = vmatmul.mubr.f32.vlgmr.msra.gmra.mrb[16].mxu1 %v637_v35  ;;  %v639_v44 = vmax.f32 %v573_v37, 0.0 }
 0x154   :  { %v638_v41 = vmax.f32 %v568_v40, 0.0  ;;  %2518 = vmatpush3.bf16.msra.mxu1 %v2816_v24  ;;  %v2179_v43 = vpop.f32.mrb[20].mxu0 }
 0x155   :  { %v583_v46 = vadd.f32 %v2179_v43, %v2969_v34  ;;  %v577_v47 = vpop.f32.mrb[21].mxu0  ;;  %2520 = vmatprep.subr.bf16.mxu1 %v2824_v27 }
 0x156   :  { %v578_v48 = vadd.f32 %v2969_v34, %v577_v47  ;;  %2230 = vmatprep.mubr.f32.mxu1 %v638_v41 }
 0x157   :  { %2231 = vmatmul.mubr.f32.gmra.mrb[18].mxu1 %v639_v44  ;;  %v641_v51 = vmax.f32 %v583_v46, 0.0 }
 0x158   :  { %v640_v49 = vmax.f32 %v578_v48, 0.0  ;;  %2522 = vmatpush3.bf16.msra.mxu1 %v2824_v27  ;;  %v2182_v50 = vpop.f32.mrb[22].mxu0 }
 0x159   :  { %v593_v52 = vadd.f32 %v2182_v50, %v2969_v34  ;;  %v587_v53 = vpop.f32.mrb[23].mxu0  ;;  %2524 = vmatprep.subr.bf16.mxu1 %v2837_v30 }
 0x15a   :  { %v588_v54 = vadd.f32 %v2969_v34, %v587_v53  ;;  %2233 = vmatprep.mubr.f32.mxu1 %v640_v49 }
 0x15b   :  { %2234 = vmatmul.mubr.f32.gmra.mrb[20].mxu1 %v641_v51  ;;  %v643_v57 = vmax.f32 %v593_v52, 0.0 }
 0x15c   :  { %v642_v55 = vmax.f32 %v588_v54, 0.0  ;;  %2526 = vmatpush3.bf16.msra.mxu1 %v2837_v30  ;;  %v2185_v56 = vpop.f32.mrb[24].mxu0 }
 0x15d   :  { %v603_v58 = vadd.f32 %v2185_v56, %v2969_v34  ;;  %v597_v59 = vpop.f32.mrb[25].mxu0  ;;  %2528 = vmatprep.subr.bf16.mxu1 %v2849_v33 }
 0x15e   :  { %v598_v60 = vadd.f32 %v2969_v34, %v597_v59  ;;  %2236 = vmatprep.mubr.f32.mxu1 %v642_v55 }
 0x15f   :  { %2237 = vmatmul.mubr.f32.gmra.mrb[22].mxu1 %v643_v57  ;;  %v645_v63 = vmax.f32 %v603_v58, 0.0 }
 0x160   :  { %v644_v61 = vmax.f32 %v598_v60, 0.0  ;;  %2530 = vmatpush3.bf16.msra.mxu1 %v2849_v33  ;;  %v2188_v62 = vpop.f32.mrb[26].mxu0 }
 0x161   :  { %v613_v0 = vadd.f32 %v2188_v62, %v2969_v34  ;;  %v607_v1 = vpop.f32.mrb[27].mxu0  ;;  %2532 = vmatprep.subr.bf16.mxu1 %v2859_v36 }
 0x162   :  { %v608_v2 = vadd.f32 %v2969_v34, %v607_v1  ;;  %2239 = vmatprep.mubr.f32.mxu1 %v644_v61 }
 0x163   :  { %2240 = vmatmul.mubr.f32.gmra.mrb[24].mxu1 %v645_v63  ;;  %v647_v5 = vmax.f32 %v613_v0, 0.0 }
 0x164   :  { %v646_v3 = vmax.f32 %v608_v2, 0.0  ;;  %2534 = vmatpush3.bf16.msra.mxu1 %v2859_v36  ;;  %v2191_v4 = vpop.f32.mrb[28].mxu0 }
 0x165   :  { %v623_v6 = vadd.f32 %v2191_v4, %v2969_v34  ;;  %v617_v7 = vpop.f32.mrb[29].mxu0  ;;  %2536 = vmatprep.subr.bf16.mxu1 %v2869_v39 }
 0x166   :  { %v618_v8 = vadd.f32 %v2969_v34, %v617_v7  ;;  %2242 = vmatprep.mubr.f32.mxu1 %v646_v3 }
 0x167   :  { %2243 = vmatmul.mubr.f32.gmra.mrb[26].mxu1 %v647_v5  ;;  %v649_v11 = vmax.f32 %v623_v6, 0.0 }
 0x168   :  { %v648_v9 = vmax.f32 %v618_v8, 0.0  ;;  %2538 = vmatpush3.bf16.msra.mxu1 %v2869_v39  ;;  %v2194_v10 = vpop.f32.mrb[30].mxu0 }
 0x169   :  { %v633_v12 = vadd.f32 %v2194_v10, %v2969_v34  ;;  %v627_v13 = vpop.f32.mrb[31].mxu0  ;;  %2540 = vmatprep.subr.bf16.mxu1 %v2879_v42 }
 0x16a   :  { %v628_v14 = vadd.f32 %v2969_v34, %v627_v13  ;;  %2245 = vmatprep.mubr.f32.mxu1 %v648_v9 }
 0x16b   :  { %2246 = vmatmul.mubr.f32.gmra.mrb[28].mxu1 %v649_v11  ;;  %v651_v17 = vmax.f32 %v633_v12, 0.0 }
 0x16c   :  { %v650_v15 = vmax.f32 %v628_v14, 0.0  ;;  %2542 = vmatpush3.bf16.msra.mxu1 %v2879_v42  ;;  %v2261_v16 = vpop.f32.mrb[32].mxu0 }
 0x16d   :  { %v933_v18 = vadd.f32 %v2261_v16, %v2969_v34  ;;  %v927_v19 = vpop.f32.mrb[33].mxu0  ;;  %2544 = vmatprep.subr.bf16.mxu1 %v2889_v45 }
 0x16e   :  { %v928_v20 = vadd.f32 %v2969_v34, %v927_v19  ;;  %2248 = vmatprep.mubr.f32.mxu1 %v650_v15 }
 0x16f   :  { %2249 = vmatmul.mubr.f32.gmra.mrb[30].mxu1 %v651_v17  ;;  %v1007_v23 = vmax.f32 %v933_v18, 0.0 }
 0x170   :  { %v1006_v21 = vmax.f32 %v928_v20, 0.0  ;;  %2546 = vmatpush3.bf16.msra.mxu1 %v2889_v45  ;;  %v2264_v22 = vpop.f32.mrb[34].mxu0 }
 0x171   :  { %v943_v25 = vadd.f32 %v2264_v22, %v2969_v34  ;;  %v937_v26 = vpop.f32.mrb[35].mxu0  ;;  %2587 = vmatprep.subr.bf16.mxu1 %v2816_v24 }
 0x172   :  { %v938_v28 = vadd.f32 %v2969_v34, %v937_v26  ;;  %2315 = vmatprep.mubr.f32.mxu1 %v1006_v21 }
 0x173   :  { %2316 = vmatmul.mubr.f32.vlgmr.msra.gmra.mrb[32].mxu1 %v1007_v23  ;;  %v1009_v32 = vmax.f32 %v943_v25, 0.0 }
 0x174   :  { %v1008_v29 = vmax.f32 %v938_v28, 0.0  ;;  %v2267_v31 = vpop.f32.mrb[36].mxu0  ;;  %2595 = vmatpush3.bf16.msra.mxu1 %v2816_v24 }
 0x175   :  { %v953_v35 = vadd.f32 %v2267_v31, %v2969_v34  ;;  %v947_v37 = vpop.f32.mrb[37].mxu0  ;;  %2588 = vmatprep.subr.bf16.mxu1 %v2824_v27 }
 0x176   :  { %v948_v38 = vadd.f32 %v2969_v34, %v947_v37  ;;  %2318 = vmatprep.mubr.f32.mxu1 %v1008_v29 }
 0x177   :  { %2319 = vmatmul.mubr.f32.gmra.mrb[34].mxu1 %v1009_v32  ;;  %v1011_v43 = vmax.f32 %v953_v35, 0.0 }
 0x178   :  { %v1010_v40 = vmax.f32 %v948_v38, 0.0  ;;  %v2270_v41 = vpop.f32.mrb[38].mxu0  ;;  %2596 = vmatpush3.bf16.msra.mxu1 %v2824_v27 }
 0x179   :  { %v963_v44 = vadd.f32 %v2270_v41, %v2969_v34  ;;  %v957_v46 = vpop.f32.mrb[39].mxu0  ;;  %2589 = vmatprep.subr.bf16.mxu1 %v2837_v30 }
 0x17a   :  { %v958_v24 = vadd.f32 %v2969_v34, %v957_v46  ;;  %2321 = vmatprep.mubr.f32.mxu1 %v1010_v40 }
 0x17b   :  { %2322 = vmatmul.mubr.f32.gmra.mrb[36].mxu1 %v1011_v43  ;;  %v1013_v49 = vmax.f32 %v963_v44, 0.0 }
 0x17c   :  { %v1012_v47 = vmax.f32 %v958_v24, 0.0  ;;  %v2273_v48 = vpop.f32.mrb[40].mxu0  ;;  %2597 = vmatpush3.bf16.msra.mxu1 %v2837_v30 }
 0x17d   :  { %v973_v50 = vadd.f32 %v2273_v48, %v2969_v34  ;;  %v967_v51 = vpop.f32.mrb[41].mxu0  ;;  %2590 = vmatprep.subr.bf16.mxu1 %v2849_v33 }
 0x17e   :  { %v968_v27 = vadd.f32 %v2969_v34, %v967_v51  ;;  %2324 = vmatprep.mubr.f32.mxu1 %v1012_v47 }
 0x17f   :  { %2325 = vmatmul.mubr.f32.gmra.mrb[38].mxu1 %v1013_v49  ;;  %v1015_v54 = vmax.f32 %v973_v50, 0.0 }
 0x180   :  { %v1014_v52 = vmax.f32 %v968_v27, 0.0  ;;  %v2276_v53 = vpop.f32.mrb[42].mxu0  ;;  %2598 = vmatpush3.bf16.msra.mxu1 %v2849_v33 }
 0x181   :  { %v983_v55 = vadd.f32 %v2276_v53, %v2969_v34  ;;  %v977_v56 = vpop.f32.mrb[43].mxu0  ;;  %2591 = vmatprep.subr.bf16.mxu1 %v2859_v36 }
 0x182   :  { %v978_v30 = vadd.f32 %v2969_v34, %v977_v56  ;;  %2327 = vmatprep.mubr.f32.mxu1 %v1014_v52 }
 0x183   :  { %2328 = vmatmul.mubr.f32.gmra.mrb[40].mxu1 %v1015_v54  ;;  %v1017_v59 = vmax.f32 %v983_v55, 0.0 }
 0x184   :  { %v1016_v57 = vmax.f32 %v978_v30, 0.0  ;;  %v2279_v58 = vpop.f32.mrb[44].mxu0  ;;  %2599 = vmatpush3.bf16.msra.mxu1 %v2859_v36 }
 0x185   :  { %v993_v60 = vadd.f32 %v2279_v58, %v2969_v34  ;;  %v987_v61 = vpop.f32.mrb[45].mxu0  ;;  %2592 = vmatprep.subr.bf16.mxu1 %v2869_v39 }
 0x186   :  { %v988_v33 = vadd.f32 %v2969_v34, %v987_v61  ;;  %2330 = vmatprep.mubr.f32.mxu1 %v1016_v57 }
 0x187   :  { %2331 = vmatmul.mubr.f32.gmra.mrb[42].mxu1 %v1017_v59  ;;  %v1019_v0 = vmax.f32 %v993_v60, 0.0 }
 0x188   :  { %v1018_v62 = vmax.f32 %v988_v33, 0.0  ;;  %v2282_v63 = vpop.f32.mrb[46].mxu0  ;;  %2600 = vmatpush3.bf16.msra.mxu1 %v2869_v39 }
 0x189   :  { %v1003_v1 = vadd.f32 %v2282_v63, %v2969_v34  ;;  %v997_v2 = vpop.f32.mrb[47].mxu0  ;;  %2593 = vmatprep.subr.bf16.mxu1 %v2879_v42 }
 0x18a   :  { %v998_v36 = vadd.f32 %v2969_v34, %v997_v2  ;;  %2333 = vmatprep.mubr.f32.mxu1 %v1018_v62 }
 0x18b   :  { %2334 = vmatmul.mubr.f32.gmra.mrb[44].mxu1 %v1019_v0  ;;  %v1021_v5 = vmax.f32 %v1003_v1, 0.0 }
 0x18c   :  { %v1020_v3 = vmax.f32 %v998_v36, 0.0  ;;  %v2349_v4 = vpop.f32.mrb[48].mxu0  ;;  %2601 = vmatpush3.bf16.msra.mxu1 %v2879_v42 }
 0x18d   :  { %v1303_v6 = vadd.f32 %v2349_v4, %v2969_v34  ;;  %v1297_v7 = vpop.f32.mrb[49].mxu0  ;;  %2594 = vmatprep.subr.bf16.mxu1 %v2889_v45 }
 0x18e   :  { %v1298_v39 = vadd.f32 %v2969_v34, %v1297_v7  ;;  %2336 = vmatprep.mubr.f32.mxu1 %v1020_v3 }
 0x18f   :  { %2337 = vmatmul.mubr.f32.gmra.mrb[46].mxu1 %v1021_v5  ;;  %v1377_v10 = vmax.f32 %v1303_v6, 0.0  ;;  %v3117_v5 = vld [vmem:[#allocation2] ss:$0 sm:$0xff] }
 0x190   :  { %v1376_v8 = vmax.f32 %v1298_v39, 0.0  ;;  %v2352_v9 = vpop.f32.mrb[50].mxu0  ;;  %2602 = vmatpush3.bf16.msra.mxu1 %v2889_v45 }
 0x191   :  { %v1313_v11 = vadd.f32 %v2352_v9, %v2969_v34  ;;  %v1307_v12 = vpop.f32.mrb[51].mxu0 }
 0x192   :  { %v1308_v42 = vadd.f32 %v2969_v34, %v1307_v12  ;;  %2403 = vmatprep.mubr.f32.mxu0 %v1376_v8 }
 0x193   :  { %2404 = vmatmul.mubr.f32.vlgmr.msra.gmra.mrb[64].mxu0 %v1377_v10  ;;  %v1379_v15 = vmax.f32 %v1313_v11, 0.0 }
 0x194   :  { %v1378_v13 = vmax.f32 %v1308_v42, 0.0  ;;  %v2355_v14 = vpop.f32.mrb[52].mxu0 }
 0x195   :  { %v1323_v16 = vadd.f32 %v2355_v14, %v2969_v34  ;;  %v1317_v17 = vpop.f32.mrb[53].mxu0 }
 0x196   :  { %v1318_v18 = vadd.f32 %v2969_v34, %v1317_v17  ;;  %2406 = vmatprep.mubr.f32.mxu0 %v1378_v13 }
 0x197   :  { %2407 = vmatmul.mubr.f32.gmra.mrb[66].mxu0 %v1379_v15  ;;  %v1381_v20 = vmax.f32 %v1323_v16, 0.0 }
 0x198   :  { %v1380_v19 = vmax.f32 %v1318_v18, 0.0  ;;  %v2358_v45 = vpop.f32.mrb[54].mxu0 }
 0x199   :  { %v1333_v21 = vadd.f32 %v2358_v45, %v2969_v34  ;;  %v1327_v22 = vpop.f32.mrb[55].mxu0 }
 0x19a   :  { %v1328_v23 = vadd.f32 %v2969_v34, %v1327_v22  ;;  %2409 = vmatprep.mubr.f32.mxu0 %v1380_v19 }
 0x19b   :  { %2410 = vmatmul.mubr.f32.gmra.mrb[68].mxu0 %v1381_v20  ;;  %v1383_v28 = vmax.f32 %v1333_v21, 0.0 }
 0x19c   :  { %v1382_v25 = vmax.f32 %v1328_v23, 0.0  ;;  %v2361_v26 = vpop.f32.mrb[56].mxu0 }
 0x19d   :  { %v1343_v29 = vadd.f32 %v2361_v26, %v2969_v34  ;;  %v1337_v31 = vpop.f32.mrb[57].mxu0 }
 0x19e   :  { %v1338_v32 = vadd.f32 %v2969_v34, %v1337_v31  ;;  %2412 = vmatprep.mubr.f32.mxu1 %v1382_v25 }
 0x19f   :  { %2413 = vmatmul.mubr.f32.vlgmr.msra.gmra.mrb[48].mxu1 %v1383_v28  ;;  %v1385_v38 = vmax.f32 %v1343_v29, 0.0 }
 0x1a0   :  { %v1384_v35 = vmax.f32 %v1338_v32, 0.0  ;;  %v2364_v37 = vpop.f32.mrb[58].mxu0 }
 0x1a1   :  { %v1353_v40 = vadd.f32 %v2364_v37, %v2969_v34  ;;  %v1347_v41 = vpop.f32.mrb[59].mxu0 }
 0x1a2   :  { %v1348_v43 = vadd.f32 %v2969_v34, %v1347_v41  ;;  %2415 = vmatprep.mubr.f32.mxu1 %v1384_v35 }
 0x1a3   :  { %2416 = vmatmul.mubr.f32.gmra.mrb[50].mxu1 %v1385_v38  ;;  %v1387_v24 = vmax.f32 %v1353_v40, 0.0 }
 0x1a4   :  { %v1386_v44 = vmax.f32 %v1348_v43, 0.0  ;;  %v2367_v46 = vpop.f32.mrb[60].mxu0 }
 0x1a5   :  { %v1363_v47 = vadd.f32 %v2367_v46, %v2969_v34  ;;  %v1357_v48 = vpop.f32.mrb[61].mxu0 }
 0x1a6   :  { %v1358_v49 = vadd.f32 %v2969_v34, %v1357_v48  ;;  %2418 = vmatprep.mubr.f32.mxu1 %v1386_v44 }
 0x1a7   :  { %2419 = vmatmul.mubr.f32.gmra.mrb[52].mxu1 %v1387_v24  ;;  %v1389_v27 = vmax.f32 %v1363_v47, 0.0 }
 0x1a8   :  { %v1388_v50 = vmax.f32 %v1358_v49, 0.0  ;;  %v2370_v51 = vpop.f32.mrb[62].mxu0 }
 0x1a9   :  { %v1373_v52 = vadd.f32 %v2370_v51, %v2969_v34  ;;  %v1367_v53 = vpop.f32.mrb[63].mxu0 }
 0x1aa   :  { %v1368_v54 = vadd.f32 %v2969_v34, %v1367_v53  ;;  %2421 = vmatprep.mubr.f32.mxu1 %v1388_v50 }
 0x1ab   :  { %2422 = vmatmul.mubr.f32.gmra.mrb[54].mxu1 %v1389_v27  ;;  %v1391_v56 = vmax.f32 %v1373_v52, 0.0 }
 0x1ac   :  { %v1390_v55 = vmax.f32 %v1368_v54, 0.0 }
 0x1ae   :  { %2424 = vmatprep.mubr.f32.mxu1 %v1390_v55 }
 0x1af   :  { %2425 = vmatmul.mubr.f32.gmra.mrb[56].mxu1 %v1391_v56 }
 0x1bc   :  { %v3085_v30 = vpop.f32.mrb[0].mxu1 }
 0x1bd   :  { %v3087_v57 = vpop.f32.mrb[1].mxu1 }
 0x1c0   :  { %v3089_v58 = vpop.f32.mrb[2].mxu1 }
 0x1c1   :  { %v3091_v59 = vpop.f32.mrb[3].mxu1 }
 0x1c4   :  { %v3093_v60 = vpop.f32.mrb[4].mxu1 }
 0x1c5   :  { %v3095_v61 = vpop.f32.mrb[5].mxu1 }
 0x1c8   :  { %v3097_v33 = vpop.f32.mrb[6].mxu1 }
 0x1c9   :  { %v3099_v34 = vpop.f32.mrb[7].mxu1 }
 0x1cc   :  { %v3101_v62 = vpop.f32.mrb[8].mxu1 }
 0x1cd   :  { %v3103_v63 = vpop.f32.mrb[9].mxu1 }
 0x1d0   :  { %v3105_v0 = vpop.f32.mrb[10].mxu1 }
 0x1d1   :  { %v3107_v1 = vpop.f32.mrb[11].mxu1 }
 0x1d4   :  { %v3109_v2 = vpop.f32.mrb[12].mxu1 }
 0x1d5   :  { %v3111_v36 = vpop.f32.mrb[13].mxu1 }
 0x1d8   :  { %v3113_v3 = vpop.f32.mrb[14].mxu1 }
 0x1d9   :  { %v3115_v4 = vpop.f32.mrb[15].mxu1 }
 0x226   :  { %v2229_v6 = vpop.f32.mrb[16].mxu1 }
 0x227   :  { %v724_v7 = vadd.f32 %v2229_v6, %v3117_v5  ;;  %v718_v39 = vpop.f32.mrb[17].mxu1 }
 0x228   :  { %v719_v8 = vadd.f32 %v3117_v5, %v718_v39 }
 0x229   :  { %1555 = vrot.lane.b32.xlu1 %v724_v7, %s2612_s4 }
 0x22a   :  { %v2232_v9 = vpop.f32.mrb[18].mxu1  ;;  %1553 = vrot.lane.b32.xlu0 %v719_v8, %s2612_s4 }
 0x22b   :  { %v734_v10 = vadd.f32 %v2232_v9, %v3117_v5  ;;  %v728_v11 = vpop.f32.mrb[19].mxu1 }
 0x22c   :  { %v729_v12 = vadd.f32 %v3117_v5, %v728_v11 }
 0x22d   :  { %1559 = vrot.lane.b32.xlu1 %v734_v10, %s2612_s4 }
 0x22e   :  { %v2235_v42 = vpop.f32.mrb[20].mxu1  ;;  %1557 = vrot.lane.b32.xlu0 %v729_v12, %s2612_s4 }
 0x22f   :  { %v744_v13 = vadd.f32 %v2235_v42, %v3117_v5  ;;  %v738_v14 = vpop.f32.mrb[21].mxu1 }
 0x230   :  { %v739_v15 = vadd.f32 %v3117_v5, %v738_v14 }
 0x231   :  { %1563 = vrot.lane.b32.xlu1 %v744_v13, %s2612_s4 }
 0x232   :  { %v2238_v16 = vpop.f32.mrb[22].mxu1  ;;  %1561 = vrot.lane.b32.xlu0 %v739_v15, %s2612_s4 }
 0x233   :  { %v754_v17 = vadd.f32 %v2238_v16, %v3117_v5  ;;  %v748_v18 = vpop.f32.mrb[23].mxu1 }
 0x234   :  { %v749_v19 = vadd.f32 %v3117_v5, %v748_v18 }
 0x235   :  { %1567 = vrot.lane.b32.xlu1 %v754_v17, %s2612_s4 }
 0x236   :  { %v2241_v45 = vpop.f32.mrb[24].mxu1  ;;  %1565 = vrot.lane.b32.xlu0 %v749_v19, %s2612_s4 }
 0x237   :  { %v764_v20 = vadd.f32 %v2241_v45, %v3117_v5  ;;  %v758_v21 = vpop.f32.mrb[25].mxu1 }
 0x238   :  { %v759_v22 = vadd.f32 %v3117_v5, %v758_v21 }
 0x239   :  { %1571 = vrot.lane.b32.xlu1 %v764_v20, %s2612_s4 }
 0x23a   :  { %v2244_v23 = vpop.f32.mrb[26].mxu1  ;;  %1569 = vrot.lane.b32.xlu0 %v759_v22, %s2612_s4 }
 0x23b   :  { %v774_v25 = vadd.f32 %v2244_v23, %v3117_v5  ;;  %v768_v26 = vpop.f32.mrb[27].mxu1 }
 0x23c   :  { %v769_v28 = vadd.f32 %v3117_v5, %v768_v26 }
 0x23d   :  { %1575 = vrot.lane.b32.xlu1 %v774_v25, %s2612_s4 }
 0x23e   :  { %v2247_v29 = vpop.f32.mrb[28].mxu1  ;;  %1573 = vrot.lane.b32.xlu0 %v769_v28, %s2612_s4 }
 0x23f   :  { %v784_v31 = vadd.f32 %v2247_v29, %v3117_v5  ;;  %v778_v32 = vpop.f32.mrb[29].mxu1 }
 0x240   :  { %v779_v35 = vadd.f32 %v3117_v5, %v778_v32 }
 0x241   :  { %1579 = vrot.lane.b32.xlu1 %v784_v31, %s2612_s4 }
 0x242   :  { %v2250_v37 = vpop.f32.mrb[30].mxu1  ;;  %1577 = vrot.lane.b32.xlu0 %v779_v35, %s2612_s4 }
 0x243   :  { %v794_v38 = vadd.f32 %v2250_v37, %v3117_v5  ;;  %v788_v40 = vpop.f32.mrb[31].mxu1 }
 0x244   :  { %v789_v41 = vadd.f32 %v3117_v5, %v788_v40 }
 0x245   :  { %1583 = vrot.lane.b32.xlu1 %v794_v38, %s2612_s4 }
 0x246   :  { %v2317_v43 = vpop.f32.mrb[32].mxu1  ;;  %1581 = vrot.lane.b32.xlu0 %v789_v41, %s2612_s4 }
 0x247   :  { %v1094_v44 = vadd.f32 %v2317_v43, %v3117_v5  ;;  %v1088_v46 = vpop.f32.mrb[33].mxu1 }
 0x248   :  { %v1089_v24 = vadd.f32 %v3117_v5, %v1088_v46 }
 0x249   :  { %1619 = vrot.lane.b32.xlu1 %v1094_v44, %s2613_s16 }
 0x24a   :  { %v2320_v47 = vpop.f32.mrb[34].mxu1  ;;  %1617 = vrot.lane.b32.xlu0 %v1089_v24, %s2613_s16 }
 0x24b   :  { %v1104_v48 = vadd.f32 %v2320_v47, %v3117_v5  ;;  %v1098_v49 = vpop.f32.mrb[35].mxu1 }
 0x24c   :  { %v1099_v50 = vadd.f32 %v3117_v5, %v1098_v49 }
 0x24d   :  { %1623 = vrot.lane.b32.xlu1 %v1104_v48, %s2613_s16 }
 0x24e   :  { %v2323_v51 = vpop.f32.mrb[36].mxu1  ;;  %1621 = vrot.lane.b32.xlu0 %v1099_v50, %s2613_s16 }
 0x24f   :  { %v1114_v27 = vadd.f32 %v2323_v51, %v3117_v5  ;;  %v1108_v52 = vpop.f32.mrb[37].mxu1 }
 0x250   :  { %v1109_v53 = vadd.f32 %v3117_v5, %v1108_v52 }
 0x251   :  { %1627 = vrot.lane.b32.xlu1 %v1114_v27, %s2613_s16 }
 0x252   :  { %v2326_v54 = vpop.f32.mrb[38].mxu1  ;;  %1625 = vrot.lane.b32.xlu0 %v1109_v53, %s2613_s16 }
 0x253   :  { %v1124_v55 = vadd.f32 %v2326_v54, %v3117_v5  ;;  %v1118_v56 = vpop.f32.mrb[39].mxu1 }
 0x254   :  { %v1119_v6 = vadd.f32 %v3117_v5, %v1118_v56 }
 0x255   :  { %1631 = vrot.lane.b32.xlu1 %v1124_v55, %s2613_s16 }
 0x256   :  { %v2329_v7 = vpop.f32.mrb[40].mxu1  ;;  %1629 = vrot.lane.b32.xlu0 %v1119_v6, %s2613_s16 }
 0x257   :  { %v1134_v39 = vadd.f32 %v2329_v7, %v3117_v5  ;;  %v1128_v8 = vpop.f32.mrb[41].mxu1 }
 0x258   :  { %v1129_v9 = vadd.f32 %v3117_v5, %v1128_v8 }
 0x259   :  { %1635 = vrot.lane.b32.xlu1 %v1134_v39, %s2613_s16 }
 0x25a   :  { %v2332_v10 = vpop.f32.mrb[42].mxu1  ;;  %1633 = vrot.lane.b32.xlu0 %v1129_v9, %s2613_s16 }
 0x25b   :  { %v1144_v11 = vadd.f32 %v2332_v10, %v3117_v5  ;;  %v1138_v12 = vpop.f32.mrb[43].mxu1 }
 0x25c   :  { %v1139_v42 = vadd.f32 %v3117_v5, %v1138_v12 }
 0x25d   :  { %1639 = vrot.lane.b32.xlu1 %v1144_v11, %s2613_s16 }
 0x25e   :  { %v2335_v13 = vpop.f32.mrb[44].mxu1  ;;  %1637 = vrot.lane.b32.xlu0 %v1139_v42, %s2613_s16 }
 0x25f   :  { %v1154_v14 = vadd.f32 %v2335_v13, %v3117_v5  ;;  %v1148_v15 = vpop.f32.mrb[45].mxu1 }
 0x260   :  { %v1149_v16 = vadd.f32 %v3117_v5, %v1148_v15 }
 0x261   :  { %1643 = vrot.lane.b32.xlu1 %v1154_v14, %s2613_s16 }
 0x262   :  { %v2338_v17 = vpop.f32.mrb[46].mxu1  ;;  %1641 = vrot.lane.b32.xlu0 %v1149_v16, %s2613_s16 }
 0x263   :  { %v1164_v18 = vadd.f32 %v2338_v17, %v3117_v5  ;;  %v1158_v19 = vpop.f32.mrb[47].mxu1 }
 0x264   :  { %v1159_v45 = vadd.f32 %v3117_v5, %v1158_v19 }
 0x265   :  { %1647 = vrot.lane.b32.xlu1 %v1164_v18, %s2613_s16 }
 0x266   :  { %v2405_v20 = vpop.f32.mrb[64].mxu0  ;;  %1645 = vrot.lane.b32.xlu0 %v1159_v45, %s2613_s16 }
 0x267   :  { %v1464_v21 = vadd.f32 %v2405_v20, %v3117_v5  ;;  %v1458_v22 = vpop.f32.mrb[65].mxu0 }
 0x268   :  { %v1459_v23 = vadd.f32 %v3117_v5, %v1458_v22 }
 0x269   :  { %1683 = vrot.lane.b32.xlu1 %v1464_v21, %s2614_s17 }
 0x26a   :  { %v2408_v25 = vpop.f32.mrb[66].mxu0  ;;  %1681 = vrot.lane.b32.xlu0 %v1459_v23, %s2614_s17 }
 0x26b   :  { %v1474_v26 = vadd.f32 %v2408_v25, %v3117_v5  ;;  %v1468_v28 = vpop.f32.mrb[67].mxu0 }
 0x26c   :  { %v1469_v29 = vadd.f32 %v3117_v5, %v1468_v28 }
 0x26d   :  { %1687 = vrot.lane.b32.xlu1 %v1474_v26, %s2614_s17 }
 0x26e   :  { %v2411_v31 = vpop.f32.mrb[68].mxu0  ;;  %1685 = vrot.lane.b32.xlu0 %v1469_v29, %s2614_s17 }
 0x26f   :  { %v1484_v32 = vadd.f32 %v2411_v31, %v3117_v5  ;;  %v1478_v35 = vpop.f32.mrb[69].mxu0 }
 0x270   :  { %v1479_v37 = vadd.f32 %v3117_v5, %v1478_v35 }
 0x271   :  { %1691 = vrot.lane.b32.xlu1 %v1484_v32, %s2614_s17 }
 0x272   :  { %v2414_v38 = vpop.f32.mrb[48].mxu1  ;;  %1689 = vrot.lane.b32.xlu0 %v1479_v37, %s2614_s17 }
 0x273   :  { %v1494_v40 = vadd.f32 %v2414_v38, %v3117_v5  ;;  %v1488_v41 = vpop.f32.mrb[49].mxu1 }
 0x274   :  { %v1489_v43 = vadd.f32 %v3117_v5, %v1488_v41 }
 0x275   :  { %1695 = vrot.lane.b32.xlu1 %v1494_v40, %s2614_s17 }
 0x276   :  { %v2417_v44 = vpop.f32.mrb[50].mxu1  ;;  %1693 = vrot.lane.b32.xlu0 %v1489_v43, %s2614_s17 }
 0x277   :  { %v1504_v46 = vadd.f32 %v2417_v44, %v3117_v5  ;;  %v1498_v24 = vpop.f32.mrb[51].mxu1  ;;  %v354_v44 = vadd.f32 %v3085_v30, %v3117_v5 }
 0x278   :  { %v1499_v47 = vadd.f32 %v3117_v5, %v1498_v24  ;;  %v349_v24 = vadd.f32 %v3117_v5, %v3087_v57  ;;  %v359_v57 = vadd.f32 %v3117_v5, %v3091_v59  ;;  %v374_v59 = vadd.f32 %v3093_v60, %v3117_v5 }
 0x279   :  { %1699 = vrot.lane.b32.xlu1 %v1504_v46, %s2614_s17 }
 0x27a   :  { %v2420_v48 = vpop.f32.mrb[52].mxu1  ;;  %1697 = vrot.lane.b32.xlu0 %v1499_v47, %s2614_s17 }
 0x27b   :  { %v1514_v49 = vadd.f32 %v2420_v48, %v3117_v5  ;;  %v1508_v50 = vpop.f32.mrb[53].mxu1 }
 0x27c   :  { %v1509_v51 = vadd.f32 %v3117_v5, %v1508_v50 }
 0x27d   :  { %1703 = vrot.lane.b32.xlu1 %v1514_v49, %s2614_s17 }
 0x27e   :  { %v2423_v27 = vpop.f32.mrb[54].mxu1  ;;  %1701 = vrot.lane.b32.xlu0 %v1509_v51, %s2614_s17  ;;  %v364_v51 = vadd.f32 %v3089_v58, %v3117_v5 }
 0x27f   :  { %v1524_v52 = vadd.f32 %v2423_v27, %v3117_v5  ;;  %v1518_v53 = vpop.f32.mrb[55].mxu1 }
 0x280   :  { %v1519_v54 = vadd.f32 %v3117_v5, %v1518_v53 }
 0x281   :  { %1707 = vrot.lane.b32.xlu1 %v1524_v52, %s2614_s17 }
 0x282   :  { %v2426_v55 = vpop.f32.mrb[56].mxu1  ;;  %1705 = vrot.lane.b32.xlu0 %v1519_v54, %s2614_s17 }
 0x283   :  { %v1534_v56 = vadd.f32 %v2426_v55, %v3117_v5  ;;  %v1528_v6 = vpop.f32.mrb[57].mxu1 }
 0x284   :  { %v1529_v7 = vadd.f32 %v3117_v5, %v1528_v6 }
 0x285   :  { %1711 = vrot.lane.b32.xlu1 %v1534_v56, %s2614_s17 }
 0x286   :  { %1709 = vrot.lane.b32.xlu0 %v1529_v7, %s2614_s17 }
 0x29b   :  { %v1556_v39 = vpop.permute.xlu1 %1555 }
 0x29c   :  { %v1554_v8 = vpop.permute.xlu0 %1553  ;;  %v1731_v47 = vsel %vm1729_vm1, %v354_v44, %v1556_v39 }
 0x29d   :  { %v1730_v48 = vsel %vm1729_vm1, %v349_v24, %v1554_v8  ;;  %v369_v8 = vadd.f32 %v3117_v5, %v3095_v61  ;;  %v384_v61 = vadd.f32 %v3097_v33, %v3117_v5  ;;  %v394_v24 = vadd.f32 %v3101_v62, %v3117_v5 }
 0x29f   :  { %v1560_v9 = vpop.permute.xlu1 %1559 }
 0x2a0   :  { %v1558_v10 = vpop.permute.xlu0 %1557  ;;  %v1733_v54 = vsel %vm1729_vm1, %v364_v51, %v1560_v9 }
 0x2a1   :  { %v1732_v58 = vsel %vm1729_vm1, %v359_v57, %v1558_v10 }
 0x2a3   :  { %v1564_v11 = vpop.permute.xlu1 %1563 }
 0x2a4   :  { %v1562_v12 = vpop.permute.xlu0 %1561  ;;  %v1735_v10 = vsel %vm1729_vm1, %v374_v59, %v1564_v11  ;;  %v379_v11 = vadd.f32 %v3117_v5, %v3099_v34  ;;  %v419_v59 = vadd.f32 %v3117_v5, %v3115_v4 }
 0x2a5   :  { %v1734_v60 = vsel %vm1729_vm1, %v369_v8, %v1562_v12 }
 0x2a7   :  { %v3215_v42 = vpop.permute.xlu1 %1567 }
 0x2a8   :  { %v3217_v13 = vpop.permute.xlu0 %1565 }
 0x2a9   :  { %v1736_v33 = vsel %vm1729_vm1, %v379_v11, %v3217_v13 }
 0x2ab   :  { %v3219_v14 = vpop.permute.xlu1 %1571 }
 0x2ac   :  { %v3221_v15 = vpop.permute.xlu0 %1569 }
 0x2af   :  { %v3223_v16 = vpop.permute.xlu1 %1575 }
 0x2b0   :  { %v3225_v17 = vpop.permute.xlu0 %1573 }
 0x2b3   :  { %v3227_v18 = vpop.permute.xlu1 %1579 }
 0x2b4   :  { %v3229_v19 = vpop.permute.xlu0 %1577 }
 0x2b7   :  { %v3231_v45 = vpop.permute.xlu1 %1583 }
 0x2b8   :  { %v3233_v20 = vpop.permute.xlu0 %1581 }
 0x2bb   :  { %v1620_v21 = vpop.permute.xlu1 %1619 }
 0x2bc   :  { %v1618_v22 = vpop.permute.xlu0 %1617  ;;  %v1748_v49 = vsel %vm1746_vm2, %v1731_v47, %v1620_v21 }
 0x2bd   :  { %v1747_v30 = vsel %vm1746_vm2, %v1730_v48, %v1618_v22 }
 0x2bf   :  { %v1624_v23 = vpop.permute.xlu1 %1623 }
 0x2c0   :  { %v1622_v25 = vpop.permute.xlu0 %1621  ;;  %v1750_v55 = vsel %vm1746_vm2, %v1733_v54, %v1624_v23  ;;  %v409_v54 = vadd.f32 %v3117_v5, %v3111_v36 }
 0x2c1   :  { %v1749_v6 = vsel %vm1746_vm2, %v1732_v58, %v1622_v25  ;;  %v424_v58 = vadd.f32 %v3113_v3, %v3117_v5  ;;  %v1744_v3 = vsel %vm1729_vm1, %v419_v59, %v3233_v20 }
 0x2c3   :  { %v1628_v26 = vpop.permute.xlu1 %1627 }
 0x2c4   :  { %v1626_v28 = vpop.permute.xlu0 %1625  ;;  %v1752_v21 = vsel %vm1746_vm2, %v1735_v10, %v1628_v26  ;;  %v1737_v26 = vsel %vm1729_vm1, %v384_v61, %v3215_v42  ;;  %v389_v42 = vadd.f32 %v3117_v5, %v3103_v63 }
 0x2c5   :  { %v1751_v23 = vsel %vm1746_vm2, %v1734_v60, %v1626_v28 }
 0x2c6   :  { %v1738_v62 = vsel %vm1729_vm1, %v389_v42, %v3221_v15 }
 0x2c7   :  { %v1632_v29 = vpop.permute.xlu1 %1631 }
 0x2c8   :  { %v1630_v31 = vpop.permute.xlu0 %1629  ;;  %v1754_v34 = vsel %vm1746_vm2, %v1737_v26, %v1632_v29  ;;  %v1739_v29 = vsel %vm1729_vm1, %v394_v24, %v3219_v14 }
 0x2c9   :  { %v1753_v47 = vsel %vm1746_vm2, %v1736_v33, %v1630_v31 }
 0x2cb   :  { %v3235_v32 = vpop.permute.xlu1 %1635 }
 0x2cc   :  { %v3237_v35 = vpop.permute.xlu0 %1633  ;;  %v1756_v63 = vsel %vm1746_vm2, %v1739_v29, %v3235_v32 }
 0x2cd   :  { %v1755_v51 = vsel %vm1746_vm2, %v1738_v62, %v3237_v35 }
 0x2cf   :  { %v3239_v37 = vpop.permute.xlu1 %1639 }
 0x2d0   :  { %v3241_v38 = vpop.permute.xlu0 %1637 }
 0x2d3   :  { %v3243_v40 = vpop.permute.xlu1 %1643 }
 0x2d4   :  { %v3245_v41 = vpop.permute.xlu0 %1641 }
 0x2d7   :  { %v3247_v43 = vpop.permute.xlu1 %1647 }
 0x2d8   :  { %v3251_v46 = vpop.permute.xlu0 %1645 }
 0x2db   :  { %v1684_v50 = vpop.permute.xlu1 %1683 }
 0x2dc   :  { %v1765_v27 = vsel %vm1763_vm3, %v1748_v49, %v1684_v50  ;;  %v1682_v52 = vpop.permute.xlu0 %1681  ;;  %v404_v50 = vadd.f32 %v3105_v0, %v3117_v5 }
 0x2dd   :  { %1782 = vst.msk [vmem:[%s3418_s5 + $0x8] sm:$0xff] %vm1780_vm4, %v1765_v27  ;;  %v1764_v53 = vsel %vm1763_vm3, %v1747_v30, %v1682_v52  ;;  %v399_v27 = vadd.f32 %v3117_v5, %v3107_v1  ;;  %v414_v52 = vadd.f32 %v3109_v2, %v3117_v5  ;;  %v1742_v2 = vsel %vm1729_vm1, %v409_v54, %v3229_v19 }
 0x2de   :  { %1781 = vst.msk [vmem:[%s3418_s5] sm:$0xff] %vm1780_vm4, %v1764_v53  ;;  %v1741_v32 = vsel %vm1729_vm1, %v404_v50, %v3223_v16 }
 0x2df   :  { %v1688_v56 = vpop.permute.xlu1 %1687  ;;  %v1740_v0 = vsel %vm1729_vm1, %v399_v27, %v3225_v17  ;;  %v1758_v1 = vsel %vm1746_vm2, %v1741_v32, %v3239_v37  ;;  %v1743_v37 = vsel %vm1729_vm1, %v414_v52, %v3227_v18 }
 0x2e0   :  { %v1767_v7 = vsel %vm1763_vm3, %v1750_v55, %v1688_v56  ;;  %v1686_v39 = vpop.permute.xlu0 %1685  ;;  %v1757_v57 = vsel %vm1746_vm2, %v1740_v0, %v3241_v38  ;;  %v1760_v36 = vsel %vm1746_vm2, %v1743_v37, %v3243_v40  ;;  %v1759_v55 = vsel %vm1746_vm2, %v1742_v2, %v3245_v41 }
 0x2e1   :  { %1784 = vst.msk [vmem:[%s3418_s5 + $0x18] sm:$0xff] %vm1780_vm4, %v1767_v7  ;;  %v1766_v9 = vsel %vm1763_vm3, %v1749_v6, %v1686_v39  ;;  %v1745_v40 = vsel %vm1729_vm1, %v424_v58, %v3231_v45  ;;  %v1761_v41 = vsel %vm1746_vm2, %v1744_v3, %v3251_v46 }
 0x2e2   :  { %1783 = vst.msk [vmem:[%s3418_s5 + $0x10] sm:$0xff] %vm1780_vm4, %v1766_v9  ;;  %v1762_v4 = vsel %vm1746_vm2, %v1745_v40, %v3247_v43 }
 0x2e3   :  { %v1692_v22 = vpop.permute.xlu1 %1691 }
 0x2e4   :  { %v1769_v25 = vsel %vm1763_vm3, %v1752_v21, %v1692_v22  ;;  %v1690_v44 = vpop.permute.xlu0 %1689 }
 0x2e5   :  { %1786 = vst.msk [vmem:[%s3418_s5 + $0x28] sm:$0xff] %vm1780_vm4, %v1769_v25  ;;  %v1768_v12 = vsel %vm1763_vm3, %v1751_v23, %v1690_v44 }
 0x2e6   :  { %1785 = vst.msk [vmem:[%s3418_s5 + $0x20] sm:$0xff] %vm1780_vm4, %v1768_v12 }
 0x2e7   :  { %v1696_v28 = vpop.permute.xlu1 %1695 }
 0x2e8   :  { %v1771_v48 = vsel %vm1763_vm3, %v1754_v34, %v1696_v28  ;;  %v1694_v49 = vpop.permute.xlu0 %1693 }
 0x2e9   :  { %1788 = vst.msk [vmem:[%s3418_s5 + $0x38] sm:$0xff] %vm1780_vm4, %v1771_v48  ;;  %v1770_v13 = vsel %vm1763_vm3, %v1753_v47, %v1694_v49 }
 0x2ea   :  { %1787 = vst.msk [vmem:[%s3418_s5 + $0x30] sm:$0xff] %vm1780_vm4, %v1770_v13 }
 0x2eb   :  { %v1700_v31 = vpop.permute.xlu1 %1699 }
 0x2ec   :  { %v1773_v14 = vsel %vm1763_vm3, %v1756_v63, %v1700_v31  ;;  %v1698_v30 = vpop.permute.xlu0 %1697 }
 0x2ed   :  { %1790 = vst.msk [vmem:[%s3418_s5 + $0x48] sm:$0xff] %vm1780_vm4, %v1773_v14  ;;  %v1772_v15 = vsel %vm1763_vm3, %v1755_v51, %v1698_v30 }
 0x2ee   :  { %1789 = vst.msk [vmem:[%s3418_s5 + $0x40] sm:$0xff] %vm1780_vm4, %v1772_v15 }
 0x2ef   :  { %v1704_v35 = vpop.permute.xlu1 %1703 }
 0x2f0   :  { %v1775_v16 = vsel %vm1763_vm3, %v1758_v1, %v1704_v35  ;;  %v1702_v53 = vpop.permute.xlu0 %1701 }
 0x2f1   :  { %1792 = vst.msk [vmem:[%s3418_s5 + $0x58] sm:$0xff] %vm1780_vm4, %v1775_v16  ;;  %v1774_v17 = vsel %vm1763_vm3, %v1757_v57, %v1702_v53 }
 0x2f2   :  { %1791 = vst.msk [vmem:[%s3418_s5 + $0x50] sm:$0xff] %vm1780_vm4, %v1774_v17 }
 0x2f3   :  { %v1708_v38 = vpop.permute.xlu1 %1707 }
 0x2f4   :  { %v1777_v18 = vsel %vm1763_vm3, %v1760_v36, %v1708_v38  ;;  %v1706_v56 = vpop.permute.xlu0 %1705 }
 0x2f5   :  { %1794 = vst.msk [vmem:[%s3418_s5 + $0x68] sm:$0xff] %vm1780_vm4, %v1777_v18  ;;  %v1776_v19 = vsel %vm1763_vm3, %v1759_v55, %v1706_v56 }
 0x2f6   :  { %1793 = vst.msk [vmem:[%s3418_s5 + $0x60] sm:$0xff] %vm1780_vm4, %v1776_v19 }
 0x2f7   :  { %v1712_v5 = vpop.permute.xlu1 %1711 }
 0x2f8   :  { %v1779_v6 = vsel %vm1763_vm3, %v1762_v4, %v1712_v5  ;;  %v1710_v7 = vpop.permute.xlu0 %1709 }
 0x2f9   :  { %1796 = vst.msk [vmem:[%s3418_s5 + $0x78] sm:$0xff] %vm1780_vm4, %v1779_v6  ;;  %v1778_v45 = vsel %vm1763_vm3, %v1761_v41, %v1710_v7 }
 0x2fa   :  { %1795 = vst.msk [vmem:[%s3418_s5 + $0x70] sm:$0xff] %vm1780_vm4, %v1778_v45 }

</bundles_post_ra>
